<compile_context>
chip_gen: v7x
topology: tpu7x:2x2x1
jax: 0.10.0
libtpu: 0.0.40
codegen_flags: <defaults>
</compile_context>

<pallas_src>
import jax
import jax.numpy as jnp
from jax import lax
from jax.experimental import pallas as pl
from jax.experimental.pallas import tpu as pltpu

BN_EPS = 1e-5
_VMEM_LIMIT = 32 * 1024 * 1024   # fits v5e/v6e (128 MiB) and v7x (64 MiB) VMEM


# ----------------------------- helpers ---------------------------------------

def _row_tile(m, target):
    """Largest row tile: a multiple of 8 (sublane) capped at `target`, or the
    full extent when m is not 8-aligned (full-extent blocks are always legal).
    For this model m is 8-aligned whenever the batch size is even."""
    if m % 8 != 0 or m <= target:
        return m
    return (target // 8) * 8


def _mosaic_params():
    return pltpu.CompilerParams(dimension_semantics=("parallel",),
                                vmem_limit_bytes=_VMEM_LIMIT)


# ----------------------------- Pallas kernels --------------------------------

def conv_bn_relu_kernel(p_ref, w_ref, scale_ref, shift_ref, o_ref):
    # p: (TM, K) bf16 patches, w: (K, Cout) bf16, scale/shift: (1, Cout) f32.
    acc = jnp.dot(p_ref[...], w_ref[...], preferred_element_type=jnp.float32)
    y = acc * scale_ref[...] + shift_ref[...]            # conv-bias + BN folded
    o_ref[...] = jnp.maximum(y, 0.0).astype(o_ref.dtype)


def halfmax_kernel(x_ref, o_ref):
    # x: (TM, 2h) -> o: (TM, h), elementwise max of the two lane halves.
    h = o_ref.shape[-1]
    x = x_ref[...]
    o_ref[...] = jnp.maximum(x[:, :h], x[:, h:])


def linear_kernel(x_ref, w_ref, b_ref, o_ref):
    o_ref[...] = (jnp.dot(x_ref[...], w_ref[...],
                          preferred_element_type=jnp.float32)
                  + b_ref[...]).astype(o_ref.dtype)


# ----------------------------- Pallas wrappers -------------------------------

def conv_bn_relu(patches, w_mat, scale, shift, *, tile_rows=4096):
    """(M, K) bf16 patches x (K, Cout) bf16 weights -> (M, Cout) bf16, with the
    folded conv-bias/BN affine and ReLU fused into the matmul epilogue.
    Output stays (M, Cout) NHWC-flat (minimal HBM bytes; feeds the next fused
    patch-extraction op directly) at the cost of masked 16/32-lane stores."""
    m, k = patches.shape
    c = w_mat.shape[1]
    tm = _row_tile(m, tile_rows)
    return pl.pallas_call(
        conv_bn_relu_kernel,
        out_shape=jax.ShapeDtypeStruct((m, c), jnp.bfloat16),
        grid=(pl.cdiv(m, tm),),
        in_specs=[
            pl.BlockSpec((tm, k), lambda i: (i, 0)),     # patches: tiled over M
            pl.BlockSpec((k, c), lambda i: (0, 0)),      # weights: resident
            pl.BlockSpec((1, c), lambda i: (0, 0)),
            pl.BlockSpec((1, c), lambda i: (0, 0)),
        ],
        out_specs=pl.BlockSpec((tm, c), lambda i: (i, 0)),
        compiler_params=_mosaic_params(),
    )(patches, w_mat, scale, shift)


def _halfmax(x, *, tile_rows):
    """(M, 2h) -> (M, h): per-row max of the two contiguous lane halves."""
    m, w2 = x.shape
    h = w2 // 2
    tm = _row_tile(m, tile_rows)
    return pl.pallas_call(
        halfmax_kernel,
        out_shape=jax.ShapeDtypeStruct((m, h), x.dtype),
        grid=(pl.cdiv(m, tm),),
        in_specs=[pl.BlockSpec((tm, w2), lambda i: (i, 0))],
        out_specs=pl.BlockSpec((tm, h), lambda i: (i, 0)),
        compiler_params=_mosaic_params(),
    )(x)


def maxpool2_nhwc_flat(x_flat, n, h, w, c):
    """MaxPool2d(2).  x_flat = NHWC activation flattened to (N*H*W, C);
    returns (N*(H/2)*(W/2), C).  The row-major reshapes are free bitcasts; both
    passes read lane-dense rows (2*W*C = 896 lanes, then 2*C) instead of four
    strided HBM slices with a 14/7-wide last dim."""
    # pool over H: row (n, i) holds input rows y=2i and y=2i+1 back to back.
    v = _halfmax(x_flat.reshape(n * h // 2, 2 * w * c), tile_rows=1024)
    # pool over W: row (n, i, j) holds pixels x=2j and x=2j+1 back to back.
    return _halfmax(v.reshape(n * (h // 2) * (w // 2), 2 * c), tile_rows=8192)


def linear(x, w_t, b, *, tile_rows=1024):
    """x: (N, F) bf16, w_t: (F, out) bf16 (pre-transposed), b: (1, out) f32."""
    m, k = x.shape
    out_dim = w_t.shape[1]
    tm = _row_tile(m, tile_rows)
    return pl.pallas_call(
        linear_kernel,
        out_shape=jax.ShapeDtypeStruct((m, out_dim), jnp.float32),
        grid=(pl.cdiv(m, tm),),
        in_specs=[
            pl.BlockSpec((tm, k), lambda i: (i, 0)),
            pl.BlockSpec((k, out_dim), lambda i: (0, 0)),
            pl.BlockSpec((1, out_dim), lambda i: (0, 0)),
        ],
        out_specs=pl.BlockSpec((tm, out_dim), lambda i: (i, 0)),
        compiler_params=_mosaic_params(),
    )(x, w_t, b)


# ----------------------------- JAX glue --------------------------------------

def extract_patches(x_nhwc, k=5, pad=2):
    """(N, H, W, C) -> (N*H*W, C*k*k) im2col patches via one fused XLA op
    (no 25 slices / stack / transpose).  Column ordering is handled by the
    permutation computed in fold_params, so no convention is assumed here."""
    n, h, w, c = x_nhwc.shape
    p = lax.conv_general_dilated_patches(
        x_nhwc, filter_shape=(k, k), window_strides=(1, 1),
        padding=((pad, pad), (pad, pad)),
        dimension_numbers=("NHWC", "HWIO", "NHWC"))
    return p.reshape(n * h * w, c * k * k)


def _patch_col_order(cin, k=5):
    """perm[j] = torch-flat index (ci*k*k + dy*k + dx) feeding patch column j,
    derived numerically from the same primitive used in extract_patches."""
    codes = jnp.arange(cin * k * k, dtype=jnp.float32).reshape(cin, k, k)
    probe = jnp.transpose(codes, (1, 2, 0))[None]            # (1, k, k, cin)
    cols = lax.conv_general_dilated_patches(
        probe, filter_shape=(k, k), window_strides=(1, 1),
        padding=((0, 0), (0, 0)),
        dimension_numbers=("NHWC", "HWIO", "NHWC"))          # (1, 1, 1, cin*k*k)
    return cols.reshape(-1).astype(jnp.int32)


# ----------------------------- model -----------------------------------------

def init_params(key):
    ks = jax.random.split(key, 8)
    p = {}
    # layer1: Conv2d(1, 16, 5, padding=2) + BatchNorm2d(16)
    p["w1"] = 0.05 * jax.random.normal(ks[0], (16, 1, 5, 5), jnp.float32)
    p["b1"] = 0.05 * jax.random.normal(ks[1], (16,), jnp.float32)
    p["g1"] = 1.0 + 0.1 * jax.random.normal(ks[2], (16,), jnp.float32)
    p["be1"] = 0.1 * jax.random.normal(ks[3], (16,), jnp.float32)
    p["m1"] = jnp.zeros((16,), jnp.float32)
    p["v1"] = jnp.ones((16,), jnp.float32)
    # layer2: Conv2d(16, 32, 5, padding=2) + BatchNorm2d(32)
    p["w2"] = 0.05 * jax.random.normal(ks[4], (32, 16, 5, 5), jnp.float32)
    p["b2"] = 0.05 * jax.random.normal(ks[5], (32,), jnp.float32)
    p["g2"] = jnp.ones((32,), jnp.float32)
    p["be2"] = jnp.zeros((32,), jnp.float32)
    p["m2"] = jnp.zeros((32,), jnp.float32)
    p["v2"] = jnp.ones((32,), jnp.float32)
    # fc: Linear(7*7*32, 10)
    p["wf"] = 0.02 * jax.random.normal(ks[6], (10, 7 * 7 * 32), jnp.float32)
    p["bf"] = 0.02 * jax.random.normal(ks[7], (10,), jnp.float32)
    return p


def fold_params(p):
    """One-time host-side fold (not jitted): BN(eval)+conv-bias -> per-channel
    scale/shift; conv weights -> (K, Cout) bf16 in patch-column order; FC weight
    permuted to the NHWC flatten order and pre-transposed (no per-call w.T)."""
    def fold_conv(w, b, g, be, m, v):
        cout, cin, kk = w.shape[0], w.shape[1], w.shape[2]
        scale = g / jnp.sqrt(v + BN_EPS)
        shift = be + (b - m) * scale                     # conv bias folded in
        perm = _patch_col_order(cin, k=kk)
        w_mat = w.reshape(cout, -1)[:, perm].T.astype(jnp.bfloat16)  # (K, Cout)
        return w_mat, scale.reshape(1, cout), shift.reshape(1, cout)

    f = {}
    f["w1m"], f["s1"], f["t1"] = fold_conv(p["w1"], p["b1"], p["g1"], p["be1"],
                                           p["m1"], p["v1"])
    f["w2m"], f["s2"], f["t2"] = fold_conv(p["w2"], p["b2"], p["g2"], p["be2"],
                                           p["m2"], p["v2"])
    # torch flattens (N, C=32, H=7, W=7) in (C, H, W) order; our activations are
    # flattened NHWC -> permute the FC weight columns to (H, W, C) order once.
    wf = p["wf"].reshape(10, 32, 7, 7).transpose(0, 2, 3, 1).reshape(10, -1)
    f["wf_t"] = wf.T.astype(jnp.bfloat16)                # (1568, 10)
    f["bf"] = p["bf"].reshape(1, 10)
    return f


def cnn_forward(f, x):
    """x: (N, 1, 28, 28) NCHW float32 -> logits (N, 10) float32."""
    n = x.shape[0]
    x = jnp.transpose(x, (0, 2, 3, 1)).astype(jnp.bfloat16)      # NHWC bf16

    # layer1: Conv(1->16, 5, pad 2) + BN + ReLU + MaxPool(2)
    p1 = extract_patches(x)                                      # (N*784, 25)
    a1 = conv_bn_relu(p1, f["w1m"], f["s1"], f["t1"])            # (N*784, 16)
    a1 = maxpool2_nhwc_flat(a1, n, 28, 28, 16)                   # (N*196, 16)

    # layer2: Conv(16->32, 5, pad 2) + BN + ReLU + MaxPool(2)
    p2 = extract_patches(a1.reshape(n, 14, 14, 16))              # (N*196, 400)
    a2 = conv_bn_relu(p2, f["w2m"], f["s2"], f["t2"])            # (N*196, 32)
    a2 = maxpool2_nhwc_flat(a2, n, 14, 14, 32)                   # (N*49, 32)

    # fc: flatten is NHWC order; the weight permutation in fold_params makes
    # this equivalent to torch's NCHW .view(N, -1).
    return linear(a2.reshape(n, 7 * 7 * 32), f["wf_t"], f["bf"])  # (N, 10)


# ----------------------------- reference -------------------------------------

def reference_forward(p, x):
    """Pure-JAX (lax.conv) reference with the same bf16 rounding points as the
    Pallas pipeline, used for a numerical check."""
    bf = lambda a: a.astype(jnp.bfloat16).astype(jnp.float32)

    def block(x_nhwc, w, b, g, be, m, v):
        scale = g / jnp.sqrt(v + BN_EPS)
        shift = be + (b - m) * scale
        y = lax.conv_general_dilated(
            x_nhwc, bf(w), window_strides=(1, 1),
            padding=((2, 2), (2, 2)),
            dimension_numbers=("NHWC", "OIHW", "NHWC"))
        y = bf(jnp.maximum(y * scale + shift, 0.0))
        return lax.reduce_window(y, -jnp.inf, lax.max,
                                 (1, 2, 2, 1), (1, 2, 2, 1), "VALID")

    xh = bf(jnp.transpose(x, (0, 2, 3, 1)))
    o = block(xh, p["w1"], p["b1"], p["g1"], p["be1"], p["m1"], p["v1"])
    o = block(o, p["w2"], p["b2"], p["g2"], p["be2"], p["m2"], p["v2"])
    o = jnp.transpose(o, (0, 3, 1, 2)).reshape(o.shape[0], -1)   # NCHW flatten
    return o @ bf(p["wf"]).T + p["bf"]


# ----------------------------- main -------------------------------------------

if __name__ == "__main__":
    key = jax.random.PRNGKey(0)
    pkey, xkey = jax.random.split(key)
    params = init_params(pkey)
    folded = fold_params(params)

    # fc expects 7*7*32 features, which pins the input to 1x28x28 (MNIST).
    x = jax.random.normal(xkey, (2, 1, 28, 28), jnp.float32)

    logits = jax.jit(cnn_forward)(folded, x)
    jax.block_until_ready(logits)
    assert logits.shape == (2, 10) and logits.dtype == jnp.float32

    ref = reference_forward(params, x)
    err = float(jnp.max(jnp.abs(logits - ref)))
    assert err < 3e-2, f"mismatch vs pure-JAX reference: max|diff|={err}"

    print("KERNEL_OK")
</pallas_src>

<mosaic_0001>
module attributes {stable_mosaic.version = 11 : i64} {
  func.func @conv_bn_relu_kernel(%arg0: i32, %arg1: memref<1568x25xbf16, #tpu.memory_space<vmem>>, %arg2: memref<25x16xbf16, #tpu.memory_space<vmem>>, %arg3: memref<1x16xf32, #tpu.memory_space<vmem>>, %arg4: memref<1x16xf32, #tpu.memory_space<vmem>>, %arg5: memref<1568x16xbf16, #tpu.memory_space<vmem>>) attributes {dimension_semantics = [#tpu.dimension_semantics<parallel>], iteration_bounds = array<i64: 1>, scalar_prefetch = 0 : i64, scratch_operands = 0 : i64, tpu.core_type = #tpu.core_type<tc>, window_params = [{transform_indices = @transform_0, window_bounds = array<i64: 1568, 25>}, {pipeline_mode = #tpu.pipeline_mode<synchronous>, transform_indices = @transform_1, window_bounds = array<i64: 25, 16>}, {pipeline_mode = #tpu.pipeline_mode<synchronous>, transform_indices = @transform_2, window_bounds = array<i64: 1, 16>}, {pipeline_mode = #tpu.pipeline_mode<synchronous>, transform_indices = @transform_3, window_bounds = array<i64: 1, 16>}, {transform_indices = @transform_4, window_bounds = array<i64: 1568, 16>}]} {
    %c0 = arith.constant 0 : index
    %c0_0 = arith.constant 0 : index
    %0 = vector.load %arg1[%c0, %c0_0] : memref<1568x25xbf16, #tpu.memory_space<vmem>>, vector<1568x25xbf16>
    %c0_1 = arith.constant 0 : index
    %c0_2 = arith.constant 0 : index
    %1 = vector.load %arg2[%c0_1, %c0_2] : memref<25x16xbf16, #tpu.memory_space<vmem>>, vector<25x16xbf16>
    %cst = arith.constant dense<0.000000e+00> : vector<1568x16xf32>
    %2 = tpu.matmul %0, %1, %cst {dimension_numbers = #tpu.dot_dimension_numbers<[1], [0], [0], [1], [0, 0, 1, 1], [], []>} : vector<1568x25xbf16>, vector<25x16xbf16>, vector<1568x16xf32> -> vector<1568x16xf32>
    %c0_3 = arith.constant 0 : index
    %c0_4 = arith.constant 0 : index
    %3 = vector.load %arg3[%c0_3, %c0_4] : memref<1x16xf32, #tpu.memory_space<vmem>>, vector<1x16xf32>
    %4 = vector.broadcast %3 : vector<1x16xf32> to vector<1568x16xf32>
    %5 = arith.mulf %2, %4 : vector<1568x16xf32>
    %c0_5 = arith.constant 0 : index
    %c0_6 = arith.constant 0 : index
    %6 = vector.load %arg4[%c0_5, %c0_6] : memref<1x16xf32, #tpu.memory_space<vmem>>, vector<1x16xf32>
    %7 = vector.broadcast %6 : vector<1x16xf32> to vector<1568x16xf32>
    %8 = arith.addf %5, %7 : vector<1568x16xf32>
    %cst_7 = arith.constant 0.000000e+00 : f32
    %9 = vector.broadcast %cst_7 : f32 to vector<1568x16xf32>
    %10 = arith.maximumf %8, %9 : vector<1568x16xf32>
    %11 = arith.truncf %10 : vector<1568x16xf32> to vector<1568x16xbf16>
    %c0_8 = arith.constant 0 : index
    %c0_9 = arith.constant 0 : index
    %12 = vector.load %arg5[%c0_8, %c0_9] : memref<1568x16xbf16, #tpu.memory_space<vmem>>, vector<1568x16xbf16>
    tpu.vector_store %arg5[%c0_8, %c0_9], %11 {strides = array<i32>} : memref<1568x16xbf16, #tpu.memory_space<vmem>>, vector<1568x16xbf16>,
    return
  }
  func.func @transform_0(%arg0: i32) -> (i32, i32) {
    %c0_i32 = arith.constant 0 : i32
    %c0_i32_0 = arith.constant 0 : i32
    return %arg0, %c0_i32 : i32, i32
  }
  func.func @transform_1(%arg0: i32) -> (i32, i32) {
    %c0_i32 = arith.constant 0 : i32
    %c0_i32_0 = arith.constant 0 : i32
    %c0_i32_1 = arith.constant 0 : i32
    return %c0_i32, %c0_i32_0 : i32, i32
  }
  func.func @transform_2(%arg0: i32) -> (i32, i32) {
    %c0_i32 = arith.constant 0 : i32
    %c0_i32_0 = arith.constant 0 : i32
    %c0_i32_1 = arith.constant 0 : i32
    return %c0_i32, %c0_i32_0 : i32, i32
  }
  func.func @transform_3(%arg0: i32) -> (i32, i32) {
    %c0_i32 = arith.constant 0 : i32
    %c0_i32_0 = arith.constant 0 : i32
    %c0_i32_1 = arith.constant 0 : i32
    return %c0_i32, %c0_i32_0 : i32, i32
  }
  func.func @transform_4(%arg0: i32) -> (i32, i32) {
    %c0_i32 = arith.constant 0 : i32
    %c0_i32_0 = arith.constant 0 : i32
    return %arg0, %c0_i32 : i32, i32
  }
}

module attributes {stable_mosaic.version = 11 : i64} {
  func.func @halfmax_kernel(%arg0: i32, %arg1: memref<28x896xbf16, #tpu.memory_space<vmem>>, %arg2: memref<28x448xbf16, #tpu.memory_space<vmem>>) attributes {dimension_semantics = [#tpu.dimension_semantics<parallel>], iteration_bounds = array<i64: 1>, scalar_prefetch = 0 : i64, scratch_operands = 0 : i64, tpu.core_type = #tpu.core_type<tc>, window_params = [{transform_indices = @transform_0, window_bounds = array<i64: 28, 896>}, {transform_indices = @transform_1, window_bounds = array<i64: 28, 448>}]} {
    %c0 = arith.constant 0 : index
    %c0_0 = arith.constant 0 : index
    %0 = vector.load %arg1[%c0, %c0_0] : memref<28x896xbf16, #tpu.memory_space<vmem>>, vector<28x896xbf16>
    %1 = vector.extract_strided_slice %0 {offsets = [0, 0], sizes = [28, 448], strides = [1, 1]} : vector<28x896xbf16> to vector<28x448xbf16>
    %2 = vector.extract_strided_slice %0 {offsets = [0, 448], sizes = [28, 448], strides = [1, 1]} : vector<28x896xbf16> to vector<28x448xbf16>
    %3 = arith.maximumf %1, %2 : vector<28x448xbf16>
    %c0_1 = arith.constant 0 : index
    %c0_2 = arith.constant 0 : index
    %4 = vector.load %arg2[%c0_1, %c0_2] : memref<28x448xbf16, #tpu.memory_space<vmem>>, vector<28x448xbf16>
    tpu.vector_store %arg2[%c0_1, %c0_2], %3 {strides = array<i32>} : memref<28x448xbf16, #tpu.memory_space<vmem>>, vector<28x448xbf16>,
    return
  }
  func.func @transform_0(%arg0: i32) -> (i32, i32) {
    %c0_i32 = arith.constant 0 : i32
    %c0_i32_0 = arith.constant 0 : i32
    return %arg0, %c0_i32 : i32, i32
  }
  func.func @transform_1(%arg0: i32) -> (i32, i32) {
    %c0_i32 = arith.constant 0 : i32
    %c0_i32_0 = arith.constant 0 : i32
    return %arg0, %c0_i32 : i32, i32
  }
}

module attributes {stable_mosaic.version = 11 : i64} {
  func.func @halfmax_kernel(%arg0: i32, %arg1: memref<392x32xbf16, #tpu.memory_space<vmem>>, %arg2: memref<392x16xbf16, #tpu.memory_space<vmem>>) attributes {dimension_semantics = [#tpu.dimension_semantics<parallel>], iteration_bounds = array<i64: 1>, scalar_prefetch = 0 : i64, scratch_operands = 0 : i64, tpu.core_type = #tpu.core_type<tc>, window_params = [{transform_indices = @transform_0, window_bounds = array<i64: 392, 32>}, {transform_indices = @transform_1, window_bounds = array<i64: 392, 16>}]} {
    %c0 = arith.constant 0 : index
    %c0_0 = arith.constant 0 : index
    %0 = vector.load %arg1[%c0, %c0_0] : memref<392x32xbf16, #tpu.memory_space<vmem>>, vector<392x32xbf16>
    %1 = vector.extract_strided_slice %0 {offsets = [0, 0], sizes = [392, 16], strides = [1, 1]} : vector<392x32xbf16> to vector<392x16xbf16>
    %2 = vector.extract_strided_slice %0 {offsets = [0, 16], sizes = [392, 16], strides = [1, 1]} : vector<392x32xbf16> to vector<392x16xbf16>
    %3 = arith.maximumf %1, %2 : vector<392x16xbf16>
    %c0_1 = arith.constant 0 : index
    %c0_2 = arith.constant 0 : index
    %4 = vector.load %arg2[%c0_1, %c0_2] : memref<392x16xbf16, #tpu.memory_space<vmem>>, vector<392x16xbf16>
    tpu.vector_store %arg2[%c0_1, %c0_2], %3 {strides = array<i32>} : memref<392x16xbf16, #tpu.memory_space<vmem>>, vector<392x16xbf16>,
    return
  }
  func.func @transform_0(%arg0: i32) -> (i32, i32) {
    %c0_i32 = arith.constant 0 : i32
    %c0_i32_0 = arith.constant 0 : i32
    return %arg0, %c0_i32 : i32, i32
  }
  func.func @transform_1(%arg0: i32) -> (i32, i32) {
    %c0_i32 = arith.constant 0 : i32
    %c0_i32_0 = arith.constant 0 : i32
    return %arg0, %c0_i32 : i32, i32
  }
}

module attributes {stable_mosaic.version = 11 : i64} {
  func.func @conv_bn_relu_kernel(%arg0: i32, %arg1: memref<392x400xbf16, #tpu.memory_space<vmem>>, %arg2: memref<400x32xbf16, #tpu.memory_space<vmem>>, %arg3: memref<1x32xf32, #tpu.memory_space<vmem>>, %arg4: memref<1x32xf32, #tpu.memory_space<vmem>>, %arg5: memref<392x32xbf16, #tpu.memory_space<vmem>>) attributes {dimension_semantics = [#tpu.dimension_semantics<parallel>], iteration_bounds = array<i64: 1>, scalar_prefetch = 0 : i64, scratch_operands = 0 : i64, tpu.core_type = #tpu.core_type<tc>, window_params = [{transform_indices = @transform_0, window_bounds = array<i64: 392, 400>}, {pipeline_mode = #tpu.pipeline_mode<synchronous>, transform_indices = @transform_1, window_bounds = array<i64: 400, 32>}, {pipeline_mode = #tpu.pipeline_mode<synchronous>, transform_indices = @transform_2, window_bounds = array<i64: 1, 32>}, {pipeline_mode = #tpu.pipeline_mode<synchronous>, transform_indices = @transform_3, window_bounds = array<i64: 1, 32>}, {transform_indices = @transform_4, window_bounds = array<i64: 392, 32>}]} {
    %c0 = arith.constant 0 : index
    %c0_0 = arith.constant 0 : index
    %0 = vector.load %arg1[%c0, %c0_0] : memref<392x400xbf16, #tpu.memory_space<vmem>>, vector<392x400xbf16>
    %c0_1 = arith.constant 0 : index
    %c0_2 = arith.constant 0 : index
    %1 = vector.load %arg2[%c0_1, %c0_2] : memref<400x32xbf16, #tpu.memory_space<vmem>>, vector<400x32xbf16>
    %cst = arith.constant dense<0.000000e+00> : vector<392x32xf32>
    %2 = tpu.matmul %0, %1, %cst {dimension_numbers = #tpu.dot_dimension_numbers<[1], [0], [0], [1], [0, 0, 1, 1], [], []>} : vector<392x400xbf16>, vector<400x32xbf16>, vector<392x32xf32> -> vector<392x32xf32>
    %c0_3 = arith.constant 0 : index
    %c0_4 = arith.constant 0 : index
    %3 = vector.load %arg3[%c0_3, %c0_4] : memref<1x32xf32, #tpu.memory_space<vmem>>, vector<1x32xf32>
    %4 = vector.broadcast %3 : vector<1x32xf32> to vector<392x32xf32>
    %5 = arith.mulf %2, %4 : vector<392x32xf32>
    %c0_5 = arith.constant 0 : index
    %c0_6 = arith.constant 0 : index
    %6 = vector.load %arg4[%c0_5, %c0_6] : memref<1x32xf32, #tpu.memory_space<vmem>>, vector<1x32xf32>
    %7 = vector.broadcast %6 : vector<1x32xf32> to vector<392x32xf32>
    %8 = arith.addf %5, %7 : vector<392x32xf32>
    %cst_7 = arith.constant 0.000000e+00 : f32
    %9 = vector.broadcast %cst_7 : f32 to vector<392x32xf32>
    %10 = arith.maximumf %8, %9 : vector<392x32xf32>
    %11 = arith.truncf %10 : vector<392x32xf32> to vector<392x32xbf16>
    %c0_8 = arith.constant 0 : index
    %c0_9 = arith.constant 0 : index
    %12 = vector.load %arg5[%c0_8, %c0_9] : memref<392x32xbf16, #tpu.memory_space<vmem>>, vector<392x32xbf16>
    tpu.vector_store %arg5[%c0_8, %c0_9], %11 {strides = array<i32>} : memref<392x32xbf16, #tpu.memory_space<vmem>>, vector<392x32xbf16>,
    return
  }
  func.func @transform_0(%arg0: i32) -> (i32, i32) {
    %c0_i32 = arith.constant 0 : i32
    %c0_i32_0 = arith.constant 0 : i32
    return %arg0, %c0_i32 : i32, i32
  }
  func.func @transform_1(%arg0: i32) -> (i32, i32) {
    %c0_i32 = arith.constant 0 : i32
    %c0_i32_0 = arith.constant 0 : i32
    %c0_i32_1 = arith.constant 0 : i32
    return %c0_i32, %c0_i32_0 : i32, i32
  }
  func.func @transform_2(%arg0: i32) -> (i32, i32) {
    %c0_i32 = arith.constant 0 : i32
    %c0_i32_0 = arith.constant 0 : i32
    %c0_i32_1 = arith.constant 0 : i32
    return %c0_i32, %c0_i32_0 : i32, i32
  }
  func.func @transform_3(%arg0: i32) -> (i32, i32) {
    %c0_i32 = arith.constant 0 : i32
    %c0_i32_0 = arith.constant 0 : i32
    %c0_i32_1 = arith.constant 0 : i32
    return %c0_i32, %c0_i32_0 : i32, i32
  }
  func.func @transform_4(%arg0: i32) -> (i32, i32) {
    %c0_i32 = arith.constant 0 : i32
    %c0_i32_0 = arith.constant 0 : i32
    return %arg0, %c0_i32 : i32, i32
  }
}

module attributes {stable_mosaic.version = 11 : i64} {
  func.func @halfmax_kernel(%arg0: i32, %arg1: memref<14x896xbf16, #tpu.memory_space<vmem>>, %arg2: memref<14x448xbf16, #tpu.memory_space<vmem>>) attributes {dimension_semantics = [#tpu.dimension_semantics<parallel>], iteration_bounds = array<i64: 1>, scalar_prefetch = 0 : i64, scratch_operands = 0 : i64, tpu.core_type = #tpu.core_type<tc>, window_params = [{transform_indices = @transform_0, window_bounds = array<i64: 14, 896>}, {transform_indices = @transform_1, window_bounds = array<i64: 14, 448>}]} {
    %c0 = arith.constant 0 : index
    %c0_0 = arith.constant 0 : index
    %0 = vector.load %arg1[%c0, %c0_0] : memref<14x896xbf16, #tpu.memory_space<vmem>>, vector<14x896xbf16>
    %1 = vector.extract_strided_slice %0 {offsets = [0, 0], sizes = [14, 448], strides = [1, 1]} : vector<14x896xbf16> to vector<14x448xbf16>
    %2 = vector.extract_strided_slice %0 {offsets = [0, 448], sizes = [14, 448], strides = [1, 1]} : vector<14x896xbf16> to vector<14x448xbf16>
    %3 = arith.maximumf %1, %2 : vector<14x448xbf16>
    %c0_1 = arith.constant 0 : index
    %c0_2 = arith.constant 0 : index
    %4 = vector.load %arg2[%c0_1, %c0_2] : memref<14x448xbf16, #tpu.memory_space<vmem>>, vector<14x448xbf16>
    tpu.vector_store %arg2[%c0_1, %c0_2], %3 {strides = array<i32>} : memref<14x448xbf16, #tpu.memory_space<vmem>>, vector<14x448xbf16>,
    return
  }
  func.func @transform_0(%arg0: i32) -> (i32, i32) {
    %c0_i32 = arith.constant 0 : i32
    %c0_i32_0 = arith.constant 0 : i32
    return %arg0, %c0_i32 : i32, i32
  }
  func.func @transform_1(%arg0: i32) -> (i32, i32) {
    %c0_i32 = arith.constant 0 : i32
    %c0_i32_0 = arith.constant 0 : i32
    return %arg0, %c0_i32 : i32, i32
  }
}

module attributes {stable_mosaic.version = 11 : i64} {
  func.func @halfmax_kernel(%arg0: i32, %arg1: memref<98x64xbf16, #tpu.memory_space<vmem>>, %arg2: memref<98x32xbf16, #tpu.memory_space<vmem>>) attributes {dimension_semantics = [#tpu.dimension_semantics<parallel>], iteration_bounds = array<i64: 1>, scalar_prefetch = 0 : i64, scratch_operands = 0 : i64, tpu.core_type = #tpu.core_type<tc>, window_params = [{transform_indices = @transform_0, window_bounds = array<i64: 98, 64>}, {transform_indices = @transform_1, window_bounds = array<i64: 98, 32>}]} {
    %c0 = arith.constant 0 : index
    %c0_0 = arith.constant 0 : index
    %0 = vector.load %arg1[%c0, %c0_0] : memref<98x64xbf16, #tpu.memory_space<vmem>>, vector<98x64xbf16>
    %1 = vector.extract_strided_slice %0 {offsets = [0, 0], sizes = [98, 32], strides = [1, 1]} : vector<98x64xbf16> to vector<98x32xbf16>
    %2 = vector.extract_strided_slice %0 {offsets = [0, 32], sizes = [98, 32], strides = [1, 1]} : vector<98x64xbf16> to vector<98x32xbf16>
    %3 = arith.maximumf %1, %2 : vector<98x32xbf16>
    %c0_1 = arith.constant 0 : index
    %c0_2 = arith.constant 0 : index
    %4 = vector.load %arg2[%c0_1, %c0_2] : memref<98x32xbf16, #tpu.memory_space<vmem>>, vector<98x32xbf16>
    tpu.vector_store %arg2[%c0_1, %c0_2], %3 {strides = array<i32>} : memref<98x32xbf16, #tpu.memory_space<vmem>>, vector<98x32xbf16>,
    return
  }
  func.func @transform_0(%arg0: i32) -> (i32, i32) {
    %c0_i32 = arith.constant 0 : i32
    %c0_i32_0 = arith.constant 0 : i32
    return %arg0, %c0_i32 : i32, i32
  }
  func.func @transform_1(%arg0: i32) -> (i32, i32) {
    %c0_i32 = arith.constant 0 : i32
    %c0_i32_0 = arith.constant 0 : i32
    return %arg0, %c0_i32 : i32, i32
  }
}

module attributes {stable_mosaic.version = 11 : i64} {
  func.func @linear_kernel(%arg0: i32, %arg1: memref<2x1568xbf16, #tpu.memory_space<vmem>>, %arg2: memref<1568x10xbf16, #tpu.memory_space<vmem>>, %arg3: memref<1x10xf32, #tpu.memory_space<vmem>>, %arg4: memref<2x10xf32, #tpu.memory_space<vmem>>) attributes {dimension_semantics = [#tpu.dimension_semantics<parallel>], iteration_bounds = array<i64: 1>, scalar_prefetch = 0 : i64, scratch_operands = 0 : i64, tpu.core_type = #tpu.core_type<tc>, window_params = [{transform_indices = @transform_0, window_bounds = array<i64: 2, 1568>}, {pipeline_mode = #tpu.pipeline_mode<synchronous>, transform_indices = @transform_1, window_bounds = array<i64: 1568, 10>}, {pipeline_mode = #tpu.pipeline_mode<synchronous>, transform_indices = @transform_2, window_bounds = array<i64: 1, 10>}, {transform_indices = @transform_3, window_bounds = array<i64: 2, 10>}]} {
    %c0 = arith.constant 0 : index
    %c0_0 = arith.constant 0 : index
    %0 = vector.load %arg1[%c0, %c0_0] : memref<2x1568xbf16, #tpu.memory_space<vmem>>, vector<2x1568xbf16>
    %c0_1 = arith.constant 0 : index
    %c0_2 = arith.constant 0 : index
    %1 = vector.load %arg2[%c0_1, %c0_2] : memref<1568x10xbf16, #tpu.memory_space<vmem>>, vector<1568x10xbf16>
    %cst = arith.constant dense<0.000000e+00> : vector<2x10xf32>
    %2 = tpu.matmul %0, %1, %cst {dimension_numbers = #tpu.dot_dimension_numbers<[1], [0], [0], [1], [0, 0, 1, 1], [], []>} : vector<2x1568xbf16>, vector<1568x10xbf16>, vector<2x10xf32> -> vector<2x10xf32>
    %c0_3 = arith.constant 0 : index
    %c0_4 = arith.constant 0 : index
    %3 = vector.load %arg3[%c0_3, %c0_4] : memref<1x10xf32, #tpu.memory_space<vmem>>, vector<1x10xf32>
    %4 = vector.broadcast %3 : vector<1x10xf32> to vector<2x10xf32>
    %5 = arith.addf %2, %4 : vector<2x10xf32>
    %c0_5 = arith.constant 0 : index
    %c0_6 = arith.constant 0 : index
    %6 = vector.load %arg4[%c0_5, %c0_6] : memref<2x10xf32, #tpu.memory_space<vmem>>, vector<2x10xf32>
    tpu.vector_store %arg4[%c0_5, %c0_6], %5 {strides = array<i32>} : memref<2x10xf32, #tpu.memory_space<vmem>>, vector<2x10xf32>,
    return
  }
  func.func @transform_0(%arg0: i32) -> (i32, i32) {
    %c0_i32 = arith.constant 0 : i32
    %c0_i32_0 = arith.constant 0 : i32
    return %arg0, %c0_i32 : i32, i32
  }
  func.func @transform_1(%arg0: i32) -> (i32, i32) {
    %c0_i32 = arith.constant 0 : i32
    %c0_i32_0 = arith.constant 0 : i32
    %c0_i32_1 = arith.constant 0 : i32
    return %c0_i32, %c0_i32_0 : i32, i32
  }
  func.func @transform_2(%arg0: i32) -> (i32, i32) {
    %c0_i32 = arith.constant 0 : i32
    %c0_i32_0 = arith.constant 0 : i32
    %c0_i32_1 = arith.constant 0 : i32
    return %c0_i32, %c0_i32_0 : i32, i32
  }
  func.func @transform_3(%arg0: i32) -> (i32, i32) {
    %c0_i32 = arith.constant 0 : i32
    %c0_i32_0 = arith.constant 0 : i32
    return %arg0, %c0_i32 : i32, i32
  }
}

</mosaic_0001>

<bundles_post_ra>
// kernel: cnn_forward.8
= control target key start
LH: loop header
LB: loop body
LE: loop exit
PB: predicated region body
PF: predicated region fallthrough
CT: control target
= control target key end

     0   :  { %s125_s10 = smov 64   ;;  %vm72_vm0 = vcmask 1043456   ;;  %vm74_vm1 = vcmask 523264   ;;  %vm108_vm2 = vcmask 523268   ;;  %vm116_vm4 = vcmask 1041408   ;;  %s243_s0 = inlined_call_operand.vmem [shape: bf16[28,896], index: 0, kind: input, shape index: {}]   ;;  %s244_s1 = inlined_call_operand.vmem [shape: bf16[28,448], index: 1, kind: output, shape index: {}]  }
   0x1   :  { %v11_v0 = vld [vmem:[%s243_s0 + $0x18] sm:$0xf]  ;;  %v9_v1 = vld [vmem:[%s243_s0 + $0x8] sm:$0xff]  ;;  %v10_v3 = vld [vmem:[%s243_s0 + $0x10] sm:$0xff]  ;;  %vm117_vm5 = vcmask 521220  }
   0x2   :  { %40 = vrot.lane.b32.xlu1 %v11_v0, %s125_s10  ;;  %36 = vrot.lane.b32.xlu0 %v9_v1, %s125_s10  ;;  %v13_v2 = vld [vmem:[%s243_s0 + $0x24] sm:$0xff]  ;;  %v15_v4 = vld [vmem:[%s243_s0 + $0x34] sm:$0xf]  ;;  %vm186_vm3 = vmor %vm108_vm2, %vm72_vm0 }
   0x3   :  { %v14_v5 = vld [vmem:[%s243_s0 + $0x2c] sm:$0xff]  ;;  %v160_v7 = vld [vmem:[%s243_s0 + $0x40] sm:$0xff]  ;;  %v16_v43 = vld [vmem:[%s243_s0 + $0x38] sm:$0xff] }
   0x4   :  { %v18_v6 = vld [vmem:[%s243_s0 + $0x48] sm:$0xff]  ;;  %v166_v8 = vld [vmem:[%s243_s0 + $0x5c] sm:$0x33]  ;;  %v19_v9 = vld [vmem:[%s243_s0 + $0x50] sm:$0xf] }
   0x5   :  { %v23_v10 = vld [vmem:[%s243_s0 + $0x6c] sm:$0x3]  ;;  %v22_v11 = vld [vmem:[%s243_s0 + $0x64] sm:$0x33]  ;;  %v12_v32 = vld [vmem:[%s243_s0 + $0x1c] sm:$0xff] }
   0x6   :  { %42 = vrot.lane.b32.xlu1 %v13_v2, %s125_s10  ;;  %38 = vrot.lane.b32.xlu0 %v10_v3, %s125_s10  ;;  %v8_v19 = vld [vmem:[%s243_s0] sm:$0xff]  ;;  %v20_v58 = vld [vmem:[%s243_s0 + $0x54] sm:$0x33]  ;;  %vm118_vm6 = vmor %vm117_vm5, %vm116_vm4 }
   0xa   :  { %46 = vrot.lane.b32.xlu1 %v15_v4, %s125_s10  ;;  %44 = vrot.lane.b32.xlu0 %v14_v5, %s125_s10 }
   0xe   :  { %50 = vrot.lane.b32.xlu1 %v18_v6, %s125_s10  ;;  %48 = vrot.lane.b32.xlu0 %v160_v7, %s125_s10 }
  0x12   :  { %54 = vrot.lane.b32.xlu1 %v166_v8, %s125_s10  ;;  %52 = vrot.lane.b32.xlu0 %v19_v9, %s125_s10 }
  0x16   :  { %58 = vrot.lane.b32.xlu1 %v23_v10, %s125_s10  ;;  %56 = vrot.lane.b32.xlu0 %v22_v11, %s125_s10 }
  0x74   :  { %v41_v12 = vpop.permute.xlu1 %40  ;;  %v37_v13 = vpop.permute.xlu0 %36 }
  0x75   :  { %v62_v16 = vrot.slane %v41_v12, 4  ;;  %v60_v17 = vrot.slane %v37_v13, 4 }
  0x78   :  { %v43_v14 = vpop.permute.xlu1 %42  ;;  %v39_v15 = vpop.permute.xlu0 %38 }
  0x79   :  { %v61_v18 = vrot.slane %v39_v15, 4  ;;  %v63_v22 = vrot.slane %v43_v14, 4 }
  0x7b   :  { %v73_v20 = vsel %vm72_vm0, %v60_v17, %v61_v18  ;;  %v76_v21 = vsel %vm72_vm0, %v61_v18, %v62_v16 }
  0x7c   :  { %v75_v23 = vsel %vm74_vm1, %v73_v20, %v39_v15  ;;  %v77_v24 = vsel %vm74_vm1, %v76_v21, %v41_v12  ;;  %v47_v25 = vpop.permute.xlu1 %46  ;;  %v45_v26 = vpop.permute.xlu0 %44 }
  0x7d   :  { %v98_v28 = vmax.bf16 %v75_v23, %v8_v19  ;;  %v99_v29 = vmax.bf16 %v77_v24, %v9_v1  ;;  %v65_v30 = vrot.slane %v47_v25, 4  ;;  %v64_v31 = vrot.slane %v45_v26, 4 }
  0x7f   :  { %106 = vst [vmem:[%s244_s1] sm:$0xff] %v98_v28  ;;  %v78_v33 = vsel %vm72_vm0, %v63_v22, %v64_v31  ;;  %v80_v34 = vsel %vm72_vm0, %v64_v31, %v65_v30  ;;  %110 = vst.msk [vmem:[%s244_s1 + $0x8] sm:$0xff] %vm186_vm3, %v99_v29 }
  0x80   :  { %v79_v35 = vsel %vm74_vm1, %v78_v33, %v45_v26  ;;  %v81_v36 = vsel %vm74_vm1, %v80_v34, %v47_v25  ;;  %v51_v37 = vpop.permute.xlu1 %50  ;;  %v49_v38 = vpop.permute.xlu0 %48 }
  0x81   :  { %v100_v39 = vmax.bf16 %v79_v35, %v12_v32  ;;  %v101_v40 = vmax.bf16 %v81_v36, %v13_v2  ;;  %v67_v41 = vrot.slane %v51_v37, 4  ;;  %v66_v42 = vrot.slane %v49_v38, 4 }
  0x83   :  { %111 = vst [vmem:[%s244_s1 + $0x10] sm:$0xff] %v100_v39  ;;  %v82_v44 = vsel %vm72_vm0, %v66_v42, %v67_v41  ;;  %112 = vst.msk [vmem:[%s244_s1 + $0x18] sm:$0xff] %vm186_vm3, %v101_v40 }
  0x84   :  { %v83_v45 = vsel %vm74_vm1, %v82_v44, %v51_v37  ;;  %v55_v46 = vpop.permute.xlu1 %54  ;;  %v53_v47 = vpop.permute.xlu0 %52 }
  0x85   :  { %v102_v48 = vmax.bf16 %v83_v45, %v16_v43  ;;  %v68_v49 = vrot.slane %v53_v47, 4  ;;  %v69_v54 = vrot.slane %v55_v46, 4 }
  0x87   :  { %113 = vst [vmem:[%s244_s1 + $0x20] sm:$0xff] %v102_v48  ;;  %v84_v50 = vsel %vm72_vm0, %v67_v41, %v68_v49 }
  0x88   :  { %v85_v51 = vsel %vm74_vm1, %v84_v50, %v53_v47  ;;  %v59_v52 = vpop.permute.xlu1 %58  ;;  %v57_v53 = vpop.permute.xlu0 %56 }
  0x89   :  { %v103_v55 = vmax.bf16 %v85_v51, %v160_v7  ;;  %v71_v56 = vrot.slane %v59_v52, 4  ;;  %v70_v57 = vrot.slane %v57_v53, 4 }
  0x8b   :  { %114 = vst.msk [vmem:[%s244_s1 + $0x28] sm:$0xff] %vm186_vm3, %v103_v55  ;;  %v86_v59 = vsel %vm72_vm0, %v69_v54, %v70_v57  ;;  %v88_v60 = vsel %vm72_vm0, %v70_v57, %v71_v56 }
  0x8c   :  { %v87_v61 = vsel %vm74_vm1, %v86_v59, %v57_v53  ;;  %v89_v62 = vsel %vm74_vm1, %v88_v60, %v59_v52 }
  0x8d   :  { %v104_v63 = vmax.bf16 %v87_v61, %v20_v58  ;;  %v105_v0 = vmax.bf16 %v89_v62, %v166_v8 }
  0x8f   :  { %115 = vst [vmem:[%s244_s1 + $0x30] sm:$0x33] %v104_v63  ;;  %119 = vst.msk [vmem:[%s244_s1 + $0x38] sm:$0x33] %vm118_vm6, %v105_v0 }

// kernel: cnn_forward.7
= control target key start
LH: loop header
LB: loop body
LE: loop exit
PB: predicated region body
PF: predicated region fallthrough
CT: control target
= control target key end

     0   :  { %vm1014_vm0 = vcmask 1043456   ;;  %vm1015_vm1 = vcmask 1044480   ;;  %vm719_vm2 = vcmask 203776   ;;  %v4426_v1 = vmov 65535   ;;  %s6056_s1 = inlined_call_operand.vmem [shape: bf16[25,16], index: 1, kind: input, shape index: {}]   ;;  %s6057_s0 = inlined_call_operand.vmem [shape: bf16[1568,25], index: 0, kind: input, shape index: {}]   ;;  %s6058_s2 = inlined_call_operand.vmem [shape: f32[1,16], index: 2, kind: input, shape index: {}]   ;;  %s6059_s3 = inlined_call_operand.vmem [shape: f32[1,16], index: 3, kind: input, shape index: {}]   ;;  %s6060_s4 = inlined_call_operand.vmem [shape: bf16[1568,16], index: 4, kind: output, shape index: {}]  }
   0x1   :  { %v4322_v0 = vld [vmem:[%s6056_s1] sm:$0xff]   ;;  %v1016_v2 = vsel %vm1014_vm0, 4294967295, %v4426_v1  ;;  %v4323_v3 = vld [vmem:[%s6056_s1 + $0x8] sm:$0x1f]   ;;  %v4326_v7 = vld [vmem:[%s6057_s0 + $0x190] sm:$0xff]   ;;  %vm3224_vm3 = vcmask 125952  }
   0x2   :  { %4117 = vmatprep.subr.bf16.mxu0 %v4322_v0  ;;  %v1017_v4 = vsel %vm1015_vm1, %v1016_v2, 0  ;;  %4317 = vmatprep.subr.bf16.mxu1 %v4322_v0  ;;  %v4324_v5 = vld [vmem:[%s6057_s0] sm:$0xff]   ;;  %v4325_v8 = vld [vmem:[%s6057_s0 + $0x8] sm:$0xff]   ;;  %v4327_v9 = vld [vmem:[%s6057_s0 + $0x198] sm:$0xff]  }
   0x3   :  { %4118 = vmatpush3.bf16.msra.mxu0 %v4322_v0  ;;  %v1019_v6 = vand.u32 %v4323_v3, %v1017_v4  ;;  %4319 = vmatpush3.bf16.msra.mxu1 %v4322_v0  ;;  %v4328_v10 = vld [vmem:[%s6057_s0 + $0x10] sm:$0xff]   ;;  %v4330_v11 = vld [vmem:[%s6057_s0 + $0x1a0] sm:$0xff]   ;;  %v4329_v12 = vld [vmem:[%s6057_s0 + $0x18] sm:$0xff]  }
   0x4   :  { %4121 = vmatprep.mubr.msk.bf16.mxu0 %vm719_vm2, %v4324_v5  ;;  %4221 = vmatprep.mubr.msk.bf16.mxu1 %vm719_vm2, %v4326_v7  ;;  %v4331_v13 = vld [vmem:[%s6057_s0 + $0x1a8] sm:$0xff]   ;;  %v4332_v14 = vld [vmem:[%s6057_s0 + $0x20] sm:$0xff]   ;;  %v4334_v15 = vld [vmem:[%s6057_s0 + $0x1b0] sm:$0xff]  }
   0x5   :  { %4119 = vmatprep.subr.bf16.mxu0 %v1019_v6  ;;  %4318 = vmatprep.subr.bf16.mxu1 %v1019_v6  ;;  %v4333_v16 = vld [vmem:[%s6057_s0 + $0x28] sm:$0xff]   ;;  %v4335_v17 = vld [vmem:[%s6057_s0 + $0x1b8] sm:$0xff]   ;;  %v4336_v18 = vld [vmem:[%s6057_s0 + $0x30] sm:$0xff]  }
   0x6   :  { %v4338_v19 = vld [vmem:[%s6057_s0 + $0x1c0] sm:$0xff]   ;;  %v4337_v20 = vld [vmem:[%s6057_s0 + $0x38] sm:$0xff]   ;;  %v4339_v21 = vld [vmem:[%s6057_s0 + $0x1c8] sm:$0xff]  }
   0x7   :  { %4120 = vmatpush3.bf16.msra.mxu0 %v1019_v6  ;;  %4320 = vmatpush3.bf16.msra.mxu1 %v1019_v6  ;;  %v4340_v22 = vld [vmem:[%s6057_s0 + $0x40] sm:$0xff]   ;;  %v4342_v23 = vld [vmem:[%s6057_s0 + $0x1d0] sm:$0xff]   ;;  %v4341_v24 = vld [vmem:[%s6057_s0 + $0x48] sm:$0xff]  }
   0x8   :  { %v4343_v25 = vld [vmem:[%s6057_s0 + $0x1d8] sm:$0xff]   ;;  %v4344_v26 = vld [vmem:[%s6057_s0 + $0x50] sm:$0xff]   ;;  %v4346_v27 = vld [vmem:[%s6057_s0 + $0x1e0] sm:$0xff]  }
   0x9   :  { %v4345_v28 = vld [vmem:[%s6057_s0 + $0x58] sm:$0xff]   ;;  %v4347_v29 = vld [vmem:[%s6057_s0 + $0x1e8] sm:$0xff]   ;;  %v4348_v30 = vld [vmem:[%s6057_s0 + $0x60] sm:$0xff]  }
   0xa   :  { %4122 = vmatmul.mubr.msk.bf16.vlgmr.msra.gmra.mrb[0].mxu0 %vm719_vm2, %v4325_v8  ;;  %4222 = vmatmul.mubr.msk.bf16.vlgmr.msra.gmra.mrb[0].mxu1 %vm719_vm2, %v4327_v9  ;;  %v4350_v31 = vld [vmem:[%s6057_s0 + $0x1f0] sm:$0xff]   ;;  %v4349_v32 = vld [vmem:[%s6057_s0 + $0x68] sm:$0xff]   ;;  %v4351_v33 = vld [vmem:[%s6057_s0 + $0x1f8] sm:$0xff]  }
   0xb   :  { %4125 = vmatprep.mubr.msk.bf16.mxu0 %vm719_vm2, %v4328_v10  ;;  %4225 = vmatprep.mubr.msk.bf16.mxu1 %vm719_vm2, %v4330_v11  ;;  %v4352_v34 = vld [vmem:[%s6057_s0 + $0x70] sm:$0xff]   ;;  %v4354_v35 = vld [vmem:[%s6057_s0 + $0x200] sm:$0xff]   ;;  %v4353_v36 = vld [vmem:[%s6057_s0 + $0x78] sm:$0xff]  }
   0xc   :  { %v4355_v37 = vld [vmem:[%s6057_s0 + $0x208] sm:$0xff]   ;;  %v4356_v38 = vld [vmem:[%s6057_s0 + $0x80] sm:$0xff]   ;;  %v4358_v39 = vld [vmem:[%s6057_s0 + $0x210] sm:$0xff]  }
   0xd   :  { %v4357_v40 = vld [vmem:[%s6057_s0 + $0x88] sm:$0xff]   ;;  %v4359_v41 = vld [vmem:[%s6057_s0 + $0x218] sm:$0xff]   ;;  %v4360_v42 = vld [vmem:[%s6057_s0 + $0x90] sm:$0xff]  }
   0xe   :  { %v4362_v43 = vld [vmem:[%s6057_s0 + $0x220] sm:$0xff]   ;;  %v4361_v44 = vld [vmem:[%s6057_s0 + $0x98] sm:$0xff]   ;;  %v4363_v45 = vld [vmem:[%s6057_s0 + $0x228] sm:$0xff]  }
   0xf   :  { %v4364_v46 = vld [vmem:[%s6057_s0 + $0xa0] sm:$0xff]   ;;  %v4366_v47 = vld [vmem:[%s6057_s0 + $0x230] sm:$0xff]   ;;  %v4365_v48 = vld [vmem:[%s6057_s0 + $0xa8] sm:$0xff]  }
  0x10   :  { %v4367_v49 = vld [vmem:[%s6057_s0 + $0x238] sm:$0xff]   ;;  %v4368_v50 = vld [vmem:[%s6057_s0 + $0xb0] sm:$0xff]   ;;  %v4370_v51 = vld [vmem:[%s6057_s0 + $0x240] sm:$0xff]  }
  0x11   :  { %v4369_v52 = vld [vmem:[%s6057_s0 + $0xb8] sm:$0xff]   ;;  %v4371_v53 = vld [vmem:[%s6057_s0 + $0x248] sm:$0xff]   ;;  %v4372_v54 = vld [vmem:[%s6057_s0 + $0xc0] sm:$0xff]  }
  0x12   :  { %4126 = vmatmul.mubr.msk.bf16.gmra.mrb[4].mxu0 %vm719_vm2, %v4329_v12  ;;  %4226 = vmatmul.mubr.msk.bf16.gmra.mrb[4].mxu1 %vm719_vm2, %v4331_v13  ;;  %v4374_v55 = vld [vmem:[%s6057_s0 + $0x250] sm:$0xff]   ;;  %v4373_v56 = vld [vmem:[%s6057_s0 + $0xc8] sm:$0xff]   ;;  %v4375_v57 = vld [vmem:[%s6057_s0 + $0x258] sm:$0xff]  }
  0x13   :  { %4129 = vmatprep.mubr.msk.bf16.mxu0 %vm719_vm2, %v4332_v14  ;;  %4229 = vmatprep.mubr.msk.bf16.mxu1 %vm719_vm2, %v4334_v15  ;;  %v4376_v58 = vld [vmem:[%s6057_s0 + $0xd0] sm:$0xff]   ;;  %v4378_v59 = vld [vmem:[%s6057_s0 + $0x260] sm:$0xff]   ;;  %v4377_v60 = vld [vmem:[%s6057_s0 + $0xd8] sm:$0xff]  }
  0x14   :  { %v4379_v61 = vld [vmem:[%s6057_s0 + $0x268] sm:$0xff]   ;;  %v4380_v62 = vld [vmem:[%s6057_s0 + $0xe0] sm:$0xff]   ;;  %v4382_v63 = vld [vmem:[%s6057_s0 + $0x270] sm:$0xff]  }
  0x15   :  { %v4381_v0 = vld [vmem:[%s6057_s0 + $0xe8] sm:$0xff]   ;;  %v4383_v1 = vld [vmem:[%s6057_s0 + $0x278] sm:$0xff]   ;;  %v4384_v2 = vld [vmem:[%s6057_s0 + $0xf0] sm:$0xff]  }
  0x16   :  { %v4386_v3 = vld [vmem:[%s6057_s0 + $0x280] sm:$0xff]   ;;  %v4385_v4 = vld [vmem:[%s6057_s0 + $0xf8] sm:$0xff]   ;;  %v4387_v5 = vld [vmem:[%s6057_s0 + $0x288] sm:$0xff]  }
  0x17   :  { %v4388_v6 = vld [vmem:[%s6057_s0 + $0x100] sm:$0xff]   ;;  %v4390_v7 = vld [vmem:[%s6057_s0 + $0x290] sm:$0xff]   ;;  %v4389_v8 = vld [vmem:[%s6057_s0 + $0x108] sm:$0xff]  }
  0x18   :  { %v4391_v9 = vld [vmem:[%s6057_s0 + $0x298] sm:$0xff]   ;;  %v4392_v10 = vld [vmem:[%s6057_s0 + $0x110] sm:$0xff]   ;;  %v4394_v11 = vld [vmem:[%s6057_s0 + $0x2a0] sm:$0xff]  }
  0x19   :  { %v4393_v12 = vld [vmem:[%s6057_s0 + $0x118] sm:$0xff]   ;;  %v4395_v13 = vld [vmem:[%s6057_s0 + $0x2a8] sm:$0xff]   ;;  %v4396_v14 = vld [vmem:[%s6057_s0 + $0x120] sm:$0xff]  }
  0x1a   :  { %4130 = vmatmul.mubr.msk.bf16.gmra.mrb[8].mxu0 %vm719_vm2, %v4333_v16  ;;  %4230 = vmatmul.mubr.msk.bf16.gmra.mrb[8].mxu1 %vm719_vm2, %v4335_v17  ;;  %v4398_v15 = vld [vmem:[%s6057_s0 + $0x2b0] sm:$0xff]   ;;  %v4397_v16 = vld [vmem:[%s6057_s0 + $0x128] sm:$0xff]   ;;  %v4399_v17 = vld [vmem:[%s6057_s0 + $0x2b8] sm:$0xff]  }
  0x1b   :  { %4133 = vmatprep.mubr.msk.bf16.mxu0 %vm719_vm2, %v4336_v18  ;;  %4233 = vmatprep.mubr.msk.bf16.mxu1 %vm719_vm2, %v4338_v19  ;;  %v4400_v18 = vld [vmem:[%s6057_s0 + $0x130] sm:$0xff]   ;;  %v4402_v19 = vld [vmem:[%s6057_s0 + $0x2c0] sm:$0xff]  }
  0x22   :  { %4134 = vmatmul.mubr.msk.bf16.gmra.mrb[12].mxu0 %vm719_vm2, %v4337_v20  ;;  %4234 = vmatmul.mubr.msk.bf16.gmra.mrb[12].mxu1 %vm719_vm2, %v4339_v21  ;;  %v4401_v20 = vld [vmem:[%s6057_s0 + $0x138] sm:$0xff]   ;;  %v4403_v21 = vld [vmem:[%s6057_s0 + $0x2c8] sm:$0xff]  }
  0x23   :  { %4137 = vmatprep.mubr.msk.bf16.mxu0 %vm719_vm2, %v4340_v22  ;;  %4237 = vmatprep.mubr.msk.bf16.mxu1 %vm719_vm2, %v4342_v23  ;;  %v4404_v22 = vld [vmem:[%s6057_s0 + $0x140] sm:$0xff]   ;;  %v4406_v23 = vld [vmem:[%s6057_s0 + $0x2d0] sm:$0xff]  }
  0x2a   :  { %4138 = vmatmul.mubr.msk.bf16.gmra.mrb[16].mxu0 %vm719_vm2, %v4341_v24  ;;  %4238 = vmatmul.mubr.msk.bf16.gmra.mrb[16].mxu1 %vm719_vm2, %v4343_v25  ;;  %v4405_v24 = vld [vmem:[%s6057_s0 + $0x148] sm:$0xff]   ;;  %v4407_v25 = vld [vmem:[%s6057_s0 + $0x2d8] sm:$0xff]  }
  0x2b   :  { %4141 = vmatprep.mubr.msk.bf16.mxu0 %vm719_vm2, %v4344_v26  ;;  %4241 = vmatprep.mubr.msk.bf16.mxu1 %vm719_vm2, %v4346_v27  ;;  %v4408_v26 = vld [vmem:[%s6057_s0 + $0x150] sm:$0xff]   ;;  %v4410_v27 = vld [vmem:[%s6057_s0 + $0x2e0] sm:$0xff]  }
  0x32   :  { %4142 = vmatmul.mubr.msk.bf16.gmra.mrb[20].mxu0 %vm719_vm2, %v4345_v28  ;;  %4242 = vmatmul.mubr.msk.bf16.gmra.mrb[20].mxu1 %vm719_vm2, %v4347_v29  ;;  %v4409_v28 = vld [vmem:[%s6057_s0 + $0x158] sm:$0xff]   ;;  %v4411_v29 = vld [vmem:[%s6057_s0 + $0x2e8] sm:$0xff]  }
  0x33   :  { %4145 = vmatprep.mubr.msk.bf16.mxu0 %vm719_vm2, %v4348_v30  ;;  %4245 = vmatprep.mubr.msk.bf16.mxu1 %vm719_vm2, %v4350_v31  ;;  %v4412_v30 = vld [vmem:[%s6057_s0 + $0x160] sm:$0xff]   ;;  %v4414_v31 = vld [vmem:[%s6057_s0 + $0x2f0] sm:$0xff]  }
  0x3a   :  { %4146 = vmatmul.mubr.msk.bf16.gmra.mrb[24].mxu0 %vm719_vm2, %v4349_v32  ;;  %4246 = vmatmul.mubr.msk.bf16.gmra.mrb[24].mxu1 %vm719_vm2, %v4351_v33  ;;  %v4413_v32 = vld [vmem:[%s6057_s0 + $0x168] sm:$0xff]   ;;  %v4415_v33 = vld [vmem:[%s6057_s0 + $0x2f8] sm:$0xff]  }
  0x3b   :  { %4149 = vmatprep.mubr.msk.bf16.mxu0 %vm719_vm2, %v4352_v34  ;;  %4249 = vmatprep.mubr.msk.bf16.mxu1 %vm719_vm2, %v4354_v35  ;;  %v4416_v34 = vld [vmem:[%s6057_s0 + $0x170] sm:$0xff]   ;;  %v4418_v35 = vld [vmem:[%s6057_s0 + $0x300] sm:$0xff]  }
  0x42   :  { %4150 = vmatmul.mubr.msk.bf16.gmra.mrb[28].mxu0 %vm719_vm2, %v4353_v36  ;;  %4250 = vmatmul.mubr.msk.bf16.gmra.mrb[28].mxu1 %vm719_vm2, %v4355_v37  ;;  %v4417_v36 = vld [vmem:[%s6057_s0 + $0x178] sm:$0xff]   ;;  %v4419_v37 = vld [vmem:[%s6057_s0 + $0x308] sm:$0xff]  }
  0x43   :  { %4153 = vmatprep.mubr.msk.bf16.mxu0 %vm719_vm2, %v4356_v38  ;;  %4253 = vmatprep.mubr.msk.bf16.mxu1 %vm719_vm2, %v4358_v39  ;;  %v4420_v38 = vld [vmem:[%s6057_s0 + $0x180] sm:$0xff]   ;;  %v4421_v39 = vld [vmem:[%s6057_s0 + $0x188] sm:$0xff]  }
  0x4a   :  { %4154 = vmatmul.mubr.msk.bf16.gmra.mrb[32].mxu0 %vm719_vm2, %v4357_v40  ;;  %4254 = vmatmul.mubr.msk.bf16.gmra.mrb[32].mxu1 %vm719_vm2, %v4359_v41  ;;  %v4853_v40 = vld [vmem:[%s6058_s2] ss:$0 sm:$0xff] }
  0x4b   :  { %4157 = vmatprep.mubr.msk.bf16.mxu0 %vm719_vm2, %v4360_v42  ;;  %4257 = vmatprep.mubr.msk.bf16.mxu1 %vm719_vm2, %v4362_v43  ;;  %v4858_v42 = vld [vmem:[%s6059_s3] ss:$0 sm:$0xff] }
  0x52   :  { %4158 = vmatmul.mubr.msk.bf16.gmra.mrb[36].mxu0 %vm719_vm2, %v4361_v44  ;;  %4258 = vmatmul.mubr.msk.bf16.gmra.mrb[36].mxu1 %vm719_vm2, %v4363_v45 }
  0x53   :  { %4161 = vmatprep.mubr.msk.bf16.mxu0 %vm719_vm2, %v4364_v46  ;;  %4261 = vmatprep.mubr.msk.bf16.mxu1 %vm719_vm2, %v4366_v47 }
  0x5a   :  { %4162 = vmatmul.mubr.msk.bf16.gmra.mrb[40].mxu0 %vm719_vm2, %v4365_v48  ;;  %4262 = vmatmul.mubr.msk.bf16.gmra.mrb[40].mxu1 %vm719_vm2, %v4367_v49 }
  0x5b   :  { %4165 = vmatprep.mubr.msk.bf16.mxu0 %vm719_vm2, %v4368_v50  ;;  %4265 = vmatprep.mubr.msk.bf16.mxu1 %vm719_vm2, %v4370_v51 }
  0x62   :  { %4166 = vmatmul.mubr.msk.bf16.gmra.mrb[44].mxu0 %vm719_vm2, %v4369_v52  ;;  %4266 = vmatmul.mubr.msk.bf16.gmra.mrb[44].mxu1 %vm719_vm2, %v4371_v53 }
  0x63   :  { %4169 = vmatprep.mubr.msk.bf16.mxu0 %vm719_vm2, %v4372_v54  ;;  %4269 = vmatprep.mubr.msk.bf16.mxu1 %vm719_vm2, %v4374_v55 }
  0x6a   :  { %4170 = vmatmul.mubr.msk.bf16.gmra.mrb[48].mxu0 %vm719_vm2, %v4373_v56  ;;  %4270 = vmatmul.mubr.msk.bf16.gmra.mrb[48].mxu1 %vm719_vm2, %v4375_v57 }
  0x6b   :  { %4173 = vmatprep.mubr.msk.bf16.mxu0 %vm719_vm2, %v4376_v58  ;;  %4273 = vmatprep.mubr.msk.bf16.mxu1 %vm719_vm2, %v4378_v59 }
  0x72   :  { %4174 = vmatmul.mubr.msk.bf16.gmra.mrb[52].mxu0 %vm719_vm2, %v4377_v60  ;;  %4274 = vmatmul.mubr.msk.bf16.gmra.mrb[52].mxu1 %vm719_vm2, %v4379_v61 }
  0x73   :  { %4177 = vmatprep.mubr.msk.bf16.mxu0 %vm719_vm2, %v4380_v62  ;;  %4277 = vmatprep.mubr.msk.bf16.mxu1 %vm719_vm2, %v4382_v63 }
  0x7a   :  { %4178 = vmatmul.mubr.msk.bf16.gmra.mrb[56].mxu0 %vm719_vm2, %v4381_v0  ;;  %4278 = vmatmul.mubr.msk.bf16.gmra.mrb[56].mxu1 %vm719_vm2, %v4383_v1 }
  0x7b   :  { %4181 = vmatprep.mubr.msk.bf16.mxu0 %vm719_vm2, %v4384_v2  ;;  %4281 = vmatprep.mubr.msk.bf16.mxu1 %vm719_vm2, %v4386_v3 }
  0x82   :  { %4182 = vmatmul.mubr.msk.bf16.gmra.mrb[60].mxu0 %vm719_vm2, %v4385_v4  ;;  %4282 = vmatmul.mubr.msk.bf16.gmra.mrb[60].mxu1 %vm719_vm2, %v4387_v5 }
  0x83   :  { %4185 = vmatprep.mubr.msk.bf16.mxu0 %vm719_vm2, %v4388_v6  ;;  %4285 = vmatprep.mubr.msk.bf16.mxu1 %vm719_vm2, %v4390_v7 }
  0x8a   :  { %4186 = vmatmul.mubr.msk.bf16.gmra.mrb[64].mxu0 %vm719_vm2, %v4389_v8  ;;  %4286 = vmatmul.mubr.msk.bf16.gmra.mrb[64].mxu1 %vm719_vm2, %v4391_v9 }
  0x8b   :  { %4189 = vmatprep.mubr.msk.bf16.mxu0 %vm719_vm2, %v4392_v10  ;;  %4289 = vmatprep.mubr.msk.bf16.mxu1 %vm719_vm2, %v4394_v11 }
  0x92   :  { %4190 = vmatmul.mubr.msk.bf16.gmra.mrb[68].mxu0 %vm719_vm2, %v4393_v12  ;;  %4290 = vmatmul.mubr.msk.bf16.gmra.mrb[68].mxu1 %vm719_vm2, %v4395_v13 }
  0x93   :  { %4193 = vmatprep.mubr.msk.bf16.mxu0 %vm719_vm2, %v4396_v14  ;;  %4293 = vmatprep.mubr.msk.bf16.mxu1 %vm719_vm2, %v4398_v15 }
  0x9a   :  { %4194 = vmatmul.mubr.msk.bf16.gmra.mrb[72].mxu0 %vm719_vm2, %v4397_v16  ;;  %4294 = vmatmul.mubr.msk.bf16.gmra.mrb[72].mxu1 %vm719_vm2, %v4399_v17 }
  0x9b   :  { %4197 = vmatprep.mubr.msk.bf16.mxu0 %vm719_vm2, %v4400_v18  ;;  %4297 = vmatprep.mubr.msk.bf16.mxu1 %vm719_vm2, %v4402_v19 }
  0xa2   :  { %4198 = vmatmul.mubr.msk.bf16.gmra.mrb[76].mxu0 %vm719_vm2, %v4401_v20  ;;  %4298 = vmatmul.mubr.msk.bf16.gmra.mrb[76].mxu1 %vm719_vm2, %v4403_v21 }
  0xa3   :  { %4201 = vmatprep.mubr.msk.bf16.mxu0 %vm719_vm2, %v4404_v22  ;;  %4301 = vmatprep.mubr.msk.bf16.mxu1 %vm719_vm2, %v4406_v23 }
  0xaa   :  { %4202 = vmatmul.mubr.msk.bf16.gmra.mrb[80].mxu0 %vm719_vm2, %v4405_v24  ;;  %4302 = vmatmul.mubr.msk.bf16.gmra.mrb[80].mxu1 %vm719_vm2, %v4407_v25 }
  0xab   :  { %4205 = vmatprep.mubr.msk.bf16.mxu0 %vm719_vm2, %v4408_v26  ;;  %4305 = vmatprep.mubr.msk.bf16.mxu1 %vm719_vm2, %v4410_v27 }
  0xb2   :  { %4206 = vmatmul.mubr.msk.bf16.gmra.mrb[84].mxu0 %vm719_vm2, %v4409_v28  ;;  %4306 = vmatmul.mubr.msk.bf16.gmra.mrb[84].mxu1 %vm719_vm2, %v4411_v29 }
  0xb3   :  { %4209 = vmatprep.mubr.msk.bf16.mxu0 %vm719_vm2, %v4412_v30  ;;  %4309 = vmatprep.mubr.msk.bf16.mxu1 %vm719_vm2, %v4414_v31 }
  0xba   :  { %4210 = vmatmul.mubr.msk.bf16.gmra.mrb[88].mxu0 %vm719_vm2, %v4413_v32  ;;  %4310 = vmatmul.mubr.msk.bf16.gmra.mrb[88].mxu1 %vm719_vm2, %v4415_v33 }
  0xbb   :  { %4213 = vmatprep.mubr.msk.bf16.mxu0 %vm719_vm2, %v4416_v34  ;;  %4313 = vmatprep.mubr.msk.bf16.mxu1 %vm719_vm2, %v4418_v35 }
  0xc2   :  { %4214 = vmatmul.mubr.msk.bf16.gmra.mrb[92].mxu0 %vm719_vm2, %v4417_v36  ;;  %4314 = vmatmul.mubr.msk.bf16.gmra.mrb[92].mxu1 %vm719_vm2, %v4419_v37 }
  0xc3   :  { %4217 = vmatprep.mubr.msk.bf16.mxu0 %vm719_vm2, %v4420_v38 }
  0xca   :  { %4218 = vmatmul.mubr.msk.bf16.gmra.mrb[96].mxu0 %vm719_vm2, %v4421_v39 }
  0xdd   :  { %v4123_v41 = vpop.f32.mrb[0].mxu0  ;;  %v4223_v43 = vpop.f32.mrb[0].mxu1 }
  0xde   :  { %v1847_v44 = vmul.f32 %v4123_v41, %v4853_v40  ;;  %v1055_v45 = vpop.f32.mrb[1].mxu0  ;;  %v1947_v46 = vmul.f32 %v4223_v43, %v4853_v40  ;;  %v1455_v47 = vpop.f32.mrb[1].mxu1 }
  0xdf   :  { %v1845_v48 = vmul.f32 %v4853_v40, %v1055_v45  ;;  %v4124_v49 = vpop.f32.mrb[2].mxu0  ;;  %v1945_v50 = vmul.f32 %v4853_v40, %v1455_v47  ;;  %v4224_v51 = vpop.f32.mrb[2].mxu1 }
  0xe0   :  { %v2050_v52 = vadd.f32 %v4858_v42, %v1847_v44  ;;  %v1848_v53 = vmul.f32 %v4124_v49, %v4853_v40  ;;  %v1058_v54 = vpop.f32.mrb[3].mxu0  ;;  %v2150_v55 = vadd.f32 %v4858_v42, %v1947_v46  ;;  %v1948_v56 = vmul.f32 %v4224_v51, %v4853_v40  ;;  %v1458_v57 = vpop.f32.mrb[3].mxu1 }
  0xe1   :  { %v2048_v58 = vadd.f32 %v4858_v42, %v1845_v48  ;;  %v1846_v59 = vmul.f32 %v4853_v40, %v1058_v54  ;;  %v2148_v60 = vadd.f32 %v4858_v42, %v1945_v50  ;;  %v1946_v61 = vmul.f32 %v4853_v40, %v1458_v57 }
  0xe2   :  { %v2246_v62 = vmax.f32 %v2050_v52, 0.0  ;;  %v2051_v63 = vadd.f32 %v4858_v42, %v1848_v53  ;;  %v2346_v0 = vmax.f32 %v2150_v55, 0.0  ;;  %v2151_v1 = vadd.f32 %v4858_v42, %v1948_v56 }
  0xe3   :  { %v2244_v2 = vmax.f32 %v2048_v58, 0.0  ;;  %v2049_v3 = vadd.f32 %v4858_v42, %v1846_v59  ;;  %v2344_v4 = vmax.f32 %v2148_v60, 0.0  ;;  %v2149_v5 = vadd.f32 %v4858_v42, %v1946_v61 }
  0xe4   :  { %v3823_v6 = vpack.c.bf16 %v2246_v62, %v2246_v62  ;;  %v2247_v7 = vmax.f32 %v2051_v63, 0.0  ;;  %v3923_v8 = vpack.c.bf16 %v2346_v0, %v2346_v0  ;;  %v2347_v9 = vmax.f32 %v2151_v1, 0.0 }
  0xe5   :  { %v3821_v10 = vpack.c.bf16 %v2244_v2, %v2244_v2  ;;  %v2245_v11 = vmax.f32 %v2049_v3, 0.0  ;;  %v3921_v12 = vpack.c.bf16 %v2344_v4, %v2344_v4  ;;  %v4127_v13 = vpop.f32.mrb[4].mxu0  ;;  %v2345_v14 = vmax.f32 %v2149_v5, 0.0  ;;  %v4227_v15 = vpop.f32.mrb[4].mxu1 }
  0xe6   :  { %3227 = vst.msk [vmem:[%s6060_s4 + $0x8] sm:$0xf] %vm3224_vm3, %v3823_v6  ;;  %v3824_v16 = vpack.c.bf16 %v2247_v7, %v2247_v7  ;;  %3327 = vst.msk [vmem:[%s6060_s4 + $0x198] sm:$0xf] %vm3224_vm3, %v3923_v8  ;;  %v3924_v17 = vpack.c.bf16 %v2347_v9, %v2347_v9  ;;  %v1851_v18 = vmul.f32 %v4127_v13, %v4853_v40  ;;  %v1071_v19 = vpop.f32.mrb[5].mxu0  ;;  %v1471_v21 = vpop.f32.mrb[5].mxu1 }
  0xe7   :  { %v1951_v20 = vmul.f32 %v4227_v15, %v4853_v40  ;;  %3225 = vst.msk [vmem:[%s6060_s4] sm:$0xf] %vm3224_vm3, %v3821_v10  ;;  %v3822_v22 = vpack.c.bf16 %v2245_v11, %v2245_v11  ;;  %3325 = vst.msk [vmem:[%s6060_s4 + $0x190] sm:$0xf] %vm3224_vm3, %v3921_v12  ;;  %v3922_v23 = vpack.c.bf16 %v2345_v14, %v2345_v14  ;;  %v4128_v25 = vpop.f32.mrb[6].mxu0  ;;  %v4228_v27 = vpop.f32.mrb[6].mxu1 }
  0xe8   :  { %v1849_v24 = vmul.f32 %v4853_v40, %v1071_v19  ;;  %v1949_v26 = vmul.f32 %v4853_v40, %v1471_v21  ;;  %3228 = vst.msk [vmem:[%s6060_s4 + $0xc] sm:$0xf] %vm3224_vm3, %v3824_v16  ;;  %3328 = vst.msk [vmem:[%s6060_s4 + $0x19c] sm:$0xf] %vm3224_vm3, %v3924_v17  ;;  %v2054_v28 = vadd.f32 %v4858_v42, %v1851_v18  ;;  %v1074_v30 = vpop.f32.mrb[7].mxu0  ;;  %v1474_v33 = vpop.f32.mrb[7].mxu1 }
  0xe9   :  { %v1852_v29 = vmul.f32 %v4128_v25, %v4853_v40  ;;  %v2154_v31 = vadd.f32 %v4858_v42, %v1951_v20  ;;  %v1952_v32 = vmul.f32 %v4228_v27, %v4853_v40  ;;  %3226 = vst.msk [vmem:[%s6060_s4 + $0x4] sm:$0xf] %vm3224_vm3, %v3822_v22  ;;  %3326 = vst.msk [vmem:[%s6060_s4 + $0x194] sm:$0xf] %vm3224_vm3, %v3922_v23 }
  0xea   :  { %v2052_v34 = vadd.f32 %v4858_v42, %v1849_v24  ;;  %v1850_v35 = vmul.f32 %v4853_v40, %v1074_v30  ;;  %v2152_v36 = vadd.f32 %v4858_v42, %v1949_v26  ;;  %v1950_v37 = vmul.f32 %v4853_v40, %v1474_v33 }
  0xeb   :  { %v2250_v38 = vmax.f32 %v2054_v28, 0.0  ;;  %v2055_v39 = vadd.f32 %v4858_v42, %v1852_v29  ;;  %v2350_v41 = vmax.f32 %v2154_v31, 0.0  ;;  %v2155_v43 = vadd.f32 %v4858_v42, %v1952_v32 }
  0xec   :  { %v2248_v44 = vmax.f32 %v2052_v34, 0.0  ;;  %v2053_v45 = vadd.f32 %v4858_v42, %v1850_v35  ;;  %v2348_v46 = vmax.f32 %v2152_v36, 0.0  ;;  %v2153_v47 = vadd.f32 %v4858_v42, %v1950_v37 }
  0xed   :  { %v3827_v48 = vpack.c.bf16 %v2250_v38, %v2250_v38  ;;  %v2251_v49 = vmax.f32 %v2055_v39, 0.0  ;;  %v3927_v50 = vpack.c.bf16 %v2350_v41, %v2350_v41  ;;  %v2351_v51 = vmax.f32 %v2155_v43, 0.0  ;;  %v4131_v55 = vpop.f32.mrb[8].mxu0  ;;  %v4231_v57 = vpop.f32.mrb[8].mxu1 }
  0xee   :  { %v3825_v52 = vpack.c.bf16 %v2248_v44, %v2248_v44  ;;  %v2249_v53 = vmax.f32 %v2053_v45, 0.0  ;;  %v3925_v54 = vpack.c.bf16 %v2348_v46, %v2348_v46  ;;  %v2349_v56 = vmax.f32 %v2153_v47, 0.0  ;;  %v1087_v61 = vpop.f32.mrb[9].mxu0  ;;  %v1487_v63 = vpop.f32.mrb[9].mxu1 }
  0xef   :  { %3231 = vst.msk [vmem:[%s6060_s4 + $0x18] sm:$0xf] %vm3224_vm3, %v3827_v48  ;;  %v3828_v58 = vpack.c.bf16 %v2251_v49, %v2251_v49  ;;  %3331 = vst.msk [vmem:[%s6060_s4 + $0x1a8] sm:$0xf] %vm3224_vm3, %v3927_v50  ;;  %v3928_v59 = vpack.c.bf16 %v2351_v51, %v2351_v51  ;;  %v1855_v60 = vmul.f32 %v4131_v55, %v4853_v40  ;;  %v4132_v3 = vpop.f32.mrb[10].mxu0  ;;  %v4232_v5 = vpop.f32.mrb[10].mxu1 }
  0xf0   :  { %v1955_v62 = vmul.f32 %v4231_v57, %v4853_v40  ;;  %3229 = vst.msk [vmem:[%s6060_s4 + $0x10] sm:$0xf] %vm3224_vm3, %v3825_v52  ;;  %v3826_v0 = vpack.c.bf16 %v2249_v53, %v2249_v53  ;;  %3329 = vst.msk [vmem:[%s6060_s4 + $0x1a0] sm:$0xf] %vm3224_vm3, %v3925_v54  ;;  %v3926_v1 = vpack.c.bf16 %v2349_v56, %v2349_v56  ;;  %v1090_v8 = vpop.f32.mrb[11].mxu0  ;;  %v1490_v11 = vpop.f32.mrb[11].mxu1 }
  0xf1   :  { %v1853_v2 = vmul.f32 %v4853_v40, %v1087_v61  ;;  %v1953_v4 = vmul.f32 %v4853_v40, %v1487_v63  ;;  %3232 = vst.msk [vmem:[%s6060_s4 + $0x1c] sm:$0xf] %vm3224_vm3, %v3828_v58  ;;  %3332 = vst.msk [vmem:[%s6060_s4 + $0x1ac] sm:$0xf] %vm3224_vm3, %v3928_v59  ;;  %v2058_v6 = vadd.f32 %v4858_v42, %v1855_v60 }
  0xf2   :  { %v1856_v7 = vmul.f32 %v4132_v3, %v4853_v40  ;;  %v2158_v9 = vadd.f32 %v4858_v42, %v1955_v62  ;;  %v1956_v10 = vmul.f32 %v4232_v5, %v4853_v40  ;;  %3230 = vst.msk [vmem:[%s6060_s4 + $0x14] sm:$0xf] %vm3224_vm3, %v3826_v0  ;;  %3330 = vst.msk [vmem:[%s6060_s4 + $0x1a4] sm:$0xf] %vm3224_vm3, %v3926_v1 }
  0xf3   :  { %v2056_v12 = vadd.f32 %v4858_v42, %v1853_v2  ;;  %v1854_v13 = vmul.f32 %v4853_v40, %v1090_v8  ;;  %v2156_v14 = vadd.f32 %v4858_v42, %v1953_v4  ;;  %v1954_v15 = vmul.f32 %v4853_v40, %v1490_v11 }
  0xf4   :  { %v2254_v16 = vmax.f32 %v2058_v6, 0.0  ;;  %v2059_v17 = vadd.f32 %v4858_v42, %v1856_v7  ;;  %v2354_v18 = vmax.f32 %v2158_v9, 0.0  ;;  %v2159_v19 = vadd.f32 %v4858_v42, %v1956_v10 }
  0xf5   :  { %v2252_v20 = vmax.f32 %v2056_v12, 0.0  ;;  %v2057_v21 = vadd.f32 %v4858_v42, %v1854_v13  ;;  %v2352_v22 = vmax.f32 %v2156_v14, 0.0  ;;  %v2157_v23 = vadd.f32 %v4858_v42, %v1954_v15  ;;  %v4135_v31 = vpop.f32.mrb[12].mxu0  ;;  %v4235_v33 = vpop.f32.mrb[12].mxu1 }
  0xf6   :  { %v3831_v24 = vpack.c.bf16 %v2254_v16, %v2254_v16  ;;  %v2255_v25 = vmax.f32 %v2059_v17, 0.0  ;;  %v3931_v26 = vpack.c.bf16 %v2354_v18, %v2354_v18  ;;  %v2355_v27 = vmax.f32 %v2159_v19, 0.0  ;;  %v1103_v37 = vpop.f32.mrb[13].mxu0  ;;  %v1503_v39 = vpop.f32.mrb[13].mxu1 }
  0xf7   :  { %v3829_v28 = vpack.c.bf16 %v2252_v20, %v2252_v20  ;;  %v2253_v29 = vmax.f32 %v2057_v21, 0.0  ;;  %v3929_v30 = vpack.c.bf16 %v2352_v22, %v2352_v22  ;;  %v2353_v32 = vmax.f32 %v2157_v23, 0.0  ;;  %v4136_v45 = vpop.f32.mrb[14].mxu0  ;;  %v4236_v47 = vpop.f32.mrb[14].mxu1 }
  0xf8   :  { %3235 = vst.msk [vmem:[%s6060_s4 + $0x28] sm:$0xf] %vm3224_vm3, %v3831_v24  ;;  %v3832_v34 = vpack.c.bf16 %v2255_v25, %v2255_v25  ;;  %3335 = vst.msk [vmem:[%s6060_s4 + $0x1b8] sm:$0xf] %vm3224_vm3, %v3931_v26  ;;  %v3932_v35 = vpack.c.bf16 %v2355_v27, %v2355_v27  ;;  %v1859_v36 = vmul.f32 %v4135_v31, %v4853_v40  ;;  %v1106_v50 = vpop.f32.mrb[15].mxu0  ;;  %v1506_v53 = vpop.f32.mrb[15].mxu1 }
  0xf9   :  { %v1959_v38 = vmul.f32 %v4235_v33, %v4853_v40  ;;  %3233 = vst.msk [vmem:[%s6060_s4 + $0x20] sm:$0xf] %vm3224_vm3, %v3829_v28  ;;  %v3830_v41 = vpack.c.bf16 %v2253_v29, %v2253_v29  ;;  %3333 = vst.msk [vmem:[%s6060_s4 + $0x1b0] sm:$0xf] %vm3224_vm3, %v3929_v30  ;;  %v3930_v43 = vpack.c.bf16 %v2353_v32, %v2353_v32 }
  0xfa   :  { %v1857_v44 = vmul.f32 %v4853_v40, %v1103_v37  ;;  %v1957_v46 = vmul.f32 %v4853_v40, %v1503_v39  ;;  %3236 = vst.msk [vmem:[%s6060_s4 + $0x2c] sm:$0xf] %vm3224_vm3, %v3832_v34  ;;  %3336 = vst.msk [vmem:[%s6060_s4 + $0x1bc] sm:$0xf] %vm3224_vm3, %v3932_v35  ;;  %v2062_v48 = vadd.f32 %v4858_v42, %v1859_v36 }
  0xfb   :  { %v1860_v49 = vmul.f32 %v4136_v45, %v4853_v40  ;;  %v2162_v51 = vadd.f32 %v4858_v42, %v1959_v38  ;;  %v1960_v52 = vmul.f32 %v4236_v47, %v4853_v40  ;;  %3234 = vst.msk [vmem:[%s6060_s4 + $0x24] sm:$0xf] %vm3224_vm3, %v3830_v41  ;;  %3334 = vst.msk [vmem:[%s6060_s4 + $0x1b4] sm:$0xf] %vm3224_vm3, %v3930_v43 }
  0xfc   :  { %v2060_v54 = vadd.f32 %v4858_v42, %v1857_v44  ;;  %v1858_v55 = vmul.f32 %v4853_v40, %v1106_v50  ;;  %v2160_v56 = vadd.f32 %v4858_v42, %v1957_v46  ;;  %v1958_v57 = vmul.f32 %v4853_v40, %v1506_v53 }
  0xfd   :  { %v2258_v58 = vmax.f32 %v2062_v48, 0.0  ;;  %v2063_v59 = vadd.f32 %v4858_v42, %v1860_v49  ;;  %v2358_v60 = vmax.f32 %v2162_v51, 0.0  ;;  %v2163_v61 = vadd.f32 %v4858_v42, %v1960_v52  ;;  %v4139_v9 = vpop.f32.mrb[16].mxu0  ;;  %v4239_v11 = vpop.f32.mrb[16].mxu1 }
  0xfe   :  { %v2256_v62 = vmax.f32 %v2060_v54, 0.0  ;;  %v2061_v63 = vadd.f32 %v4858_v42, %v1858_v55  ;;  %v2356_v0 = vmax.f32 %v2160_v56, 0.0  ;;  %v2161_v1 = vadd.f32 %v4858_v42, %v1958_v57  ;;  %v1119_v15 = vpop.f32.mrb[17].mxu0  ;;  %v1519_v17 = vpop.f32.mrb[17].mxu1 }
  0xff   :  { %v3835_v2 = vpack.c.bf16 %v2258_v58, %v2258_v58  ;;  %v2259_v3 = vmax.f32 %v2063_v59, 0.0  ;;  %v3935_v4 = vpack.c.bf16 %v2358_v60, %v2358_v60  ;;  %v2359_v5 = vmax.f32 %v2163_v61, 0.0  ;;  %v4140_v21 = vpop.f32.mrb[18].mxu0  ;;  %v4240_v23 = vpop.f32.mrb[18].mxu1 }
 0x100   :  { %v3833_v6 = vpack.c.bf16 %v2256_v62, %v2256_v62  ;;  %v2257_v7 = vmax.f32 %v2061_v63, 0.0  ;;  %v3933_v8 = vpack.c.bf16 %v2356_v0, %v2356_v0  ;;  %v2357_v10 = vmax.f32 %v2161_v1, 0.0  ;;  %v1122_v26 = vpop.f32.mrb[19].mxu0  ;;  %v1522_v29 = vpop.f32.mrb[19].mxu1 }
 0x101   :  { %3239 = vst.msk [vmem:[%s6060_s4 + $0x38] sm:$0xf] %vm3224_vm3, %v3835_v2  ;;  %v3836_v12 = vpack.c.bf16 %v2259_v3, %v2259_v3  ;;  %3339 = vst.msk [vmem:[%s6060_s4 + $0x1c8] sm:$0xf] %vm3224_vm3, %v3935_v4  ;;  %v3936_v13 = vpack.c.bf16 %v2359_v5, %v2359_v5  ;;  %v1863_v14 = vmul.f32 %v4139_v9, %v4853_v40 }
 0x102   :  { %v1963_v16 = vmul.f32 %v4239_v11, %v4853_v40  ;;  %3237 = vst.msk [vmem:[%s6060_s4 + $0x30] sm:$0xf] %vm3224_vm3, %v3833_v6  ;;  %v3834_v18 = vpack.c.bf16 %v2257_v7, %v2257_v7  ;;  %3337 = vst.msk [vmem:[%s6060_s4 + $0x1c0] sm:$0xf] %vm3224_vm3, %v3933_v8  ;;  %v3934_v19 = vpack.c.bf16 %v2357_v10, %v2357_v10 }
 0x103   :  { %v1861_v20 = vmul.f32 %v4853_v40, %v1119_v15  ;;  %v1961_v22 = vmul.f32 %v4853_v40, %v1519_v17  ;;  %3240 = vst.msk [vmem:[%s6060_s4 + $0x3c] sm:$0xf] %vm3224_vm3, %v3836_v12  ;;  %3340 = vst.msk [vmem:[%s6060_s4 + $0x1cc] sm:$0xf] %vm3224_vm3, %v3936_v13  ;;  %v2066_v24 = vadd.f32 %v4858_v42, %v1863_v14 }
 0x104   :  { %v1864_v25 = vmul.f32 %v4140_v21, %v4853_v40  ;;  %v2166_v27 = vadd.f32 %v4858_v42, %v1963_v16  ;;  %v1964_v28 = vmul.f32 %v4240_v23, %v4853_v40  ;;  %3238 = vst.msk [vmem:[%s6060_s4 + $0x34] sm:$0xf] %vm3224_vm3, %v3834_v18  ;;  %3338 = vst.msk [vmem:[%s6060_s4 + $0x1c4] sm:$0xf] %vm3224_vm3, %v3934_v19 }
 0x105   :  { %v2064_v30 = vadd.f32 %v4858_v42, %v1861_v20  ;;  %v1862_v31 = vmul.f32 %v4853_v40, %v1122_v26  ;;  %v2164_v32 = vadd.f32 %v4858_v42, %v1961_v22  ;;  %v1962_v33 = vmul.f32 %v4853_v40, %v1522_v29  ;;  %v4143_v51 = vpop.f32.mrb[20].mxu0  ;;  %v4243_v53 = vpop.f32.mrb[20].mxu1 }
 0x106   :  { %v2262_v34 = vmax.f32 %v2066_v24, 0.0  ;;  %v2067_v35 = vadd.f32 %v4858_v42, %v1864_v25  ;;  %v2362_v36 = vmax.f32 %v2166_v27, 0.0  ;;  %v2167_v37 = vadd.f32 %v4858_v42, %v1964_v28  ;;  %v1135_v57 = vpop.f32.mrb[21].mxu0  ;;  %v1535_v59 = vpop.f32.mrb[21].mxu1 }
 0x107   :  { %v2260_v38 = vmax.f32 %v2064_v30, 0.0  ;;  %v2065_v39 = vadd.f32 %v4858_v42, %v1862_v31  ;;  %v2360_v41 = vmax.f32 %v2164_v32, 0.0  ;;  %v2165_v43 = vadd.f32 %v4858_v42, %v1962_v33  ;;  %v4144_v63 = vpop.f32.mrb[22].mxu0  ;;  %v4244_v1 = vpop.f32.mrb[22].mxu1 }
 0x108   :  { %v3839_v44 = vpack.c.bf16 %v2262_v34, %v2262_v34  ;;  %v2263_v45 = vmax.f32 %v2067_v35, 0.0  ;;  %v3939_v46 = vpack.c.bf16 %v2362_v36, %v2362_v36  ;;  %v2363_v47 = vmax.f32 %v2167_v37, 0.0  ;;  %v1138_v4 = vpop.f32.mrb[23].mxu0  ;;  %v1538_v7 = vpop.f32.mrb[23].mxu1 }
 0x109   :  { %v3837_v48 = vpack.c.bf16 %v2260_v38, %v2260_v38  ;;  %v2261_v49 = vmax.f32 %v2065_v39, 0.0  ;;  %v3937_v50 = vpack.c.bf16 %v2360_v41, %v2360_v41  ;;  %v2361_v52 = vmax.f32 %v2165_v43, 0.0 }
 0x10a   :  { %3243 = vst.msk [vmem:[%s6060_s4 + $0x48] sm:$0xf] %vm3224_vm3, %v3839_v44  ;;  %v3840_v54 = vpack.c.bf16 %v2263_v45, %v2263_v45  ;;  %3343 = vst.msk [vmem:[%s6060_s4 + $0x1d8] sm:$0xf] %vm3224_vm3, %v3939_v46  ;;  %v3940_v55 = vpack.c.bf16 %v2363_v47, %v2363_v47  ;;  %v1867_v56 = vmul.f32 %v4143_v51, %v4853_v40 }
 0x10b   :  { %v1967_v58 = vmul.f32 %v4243_v53, %v4853_v40  ;;  %3241 = vst.msk [vmem:[%s6060_s4 + $0x40] sm:$0xf] %vm3224_vm3, %v3837_v48  ;;  %v3838_v60 = vpack.c.bf16 %v2261_v49, %v2261_v49  ;;  %3341 = vst.msk [vmem:[%s6060_s4 + $0x1d0] sm:$0xf] %vm3224_vm3, %v3937_v50  ;;  %v3938_v61 = vpack.c.bf16 %v2361_v52, %v2361_v52 }
 0x10c   :  { %v1865_v62 = vmul.f32 %v4853_v40, %v1135_v57  ;;  %v1965_v0 = vmul.f32 %v4853_v40, %v1535_v59  ;;  %3244 = vst.msk [vmem:[%s6060_s4 + $0x4c] sm:$0xf] %vm3224_vm3, %v3840_v54  ;;  %3344 = vst.msk [vmem:[%s6060_s4 + $0x1dc] sm:$0xf] %vm3224_vm3, %v3940_v55  ;;  %v2070_v2 = vadd.f32 %v4858_v42, %v1867_v56 }
 0x10d   :  { %v1868_v3 = vmul.f32 %v4144_v63, %v4853_v40  ;;  %v2170_v5 = vadd.f32 %v4858_v42, %v1967_v58  ;;  %v1968_v6 = vmul.f32 %v4244_v1, %v4853_v40  ;;  %3242 = vst.msk [vmem:[%s6060_s4 + $0x44] sm:$0xf] %vm3224_vm3, %v3838_v60  ;;  %3342 = vst.msk [vmem:[%s6060_s4 + $0x1d4] sm:$0xf] %vm3224_vm3, %v3938_v61  ;;  %v4147_v27 = vpop.f32.mrb[24].mxu0  ;;  %v4247_v29 = vpop.f32.mrb[24].mxu1 }
 0x10e   :  { %v2068_v8 = vadd.f32 %v4858_v42, %v1865_v62  ;;  %v1866_v9 = vmul.f32 %v4853_v40, %v1138_v4  ;;  %v2168_v10 = vadd.f32 %v4858_v42, %v1965_v0  ;;  %v1966_v11 = vmul.f32 %v4853_v40, %v1538_v7  ;;  %v1151_v33 = vpop.f32.mrb[25].mxu0  ;;  %v1551_v35 = vpop.f32.mrb[25].mxu1 }
 0x10f   :  { %v2266_v12 = vmax.f32 %v2070_v2, 0.0  ;;  %v2071_v13 = vadd.f32 %v4858_v42, %v1868_v3  ;;  %v2366_v14 = vmax.f32 %v2170_v5, 0.0  ;;  %v2171_v15 = vadd.f32 %v4858_v42, %v1968_v6  ;;  %v4148_v39 = vpop.f32.mrb[26].mxu0  ;;  %v4248_v43 = vpop.f32.mrb[26].mxu1 }
 0x110   :  { %v2264_v16 = vmax.f32 %v2068_v8, 0.0  ;;  %v2069_v17 = vadd.f32 %v4858_v42, %v1866_v9  ;;  %v2364_v18 = vmax.f32 %v2168_v10, 0.0  ;;  %v2169_v19 = vadd.f32 %v4858_v42, %v1966_v11  ;;  %v1154_v46 = vpop.f32.mrb[27].mxu0  ;;  %v1554_v49 = vpop.f32.mrb[27].mxu1 }
 0x111   :  { %v3843_v20 = vpack.c.bf16 %v2266_v12, %v2266_v12  ;;  %v2267_v21 = vmax.f32 %v2071_v13, 0.0  ;;  %v3943_v22 = vpack.c.bf16 %v2366_v14, %v2366_v14  ;;  %v2367_v23 = vmax.f32 %v2171_v15, 0.0 }
 0x112   :  { %v3841_v24 = vpack.c.bf16 %v2264_v16, %v2264_v16  ;;  %v2265_v25 = vmax.f32 %v2069_v17, 0.0  ;;  %v3941_v26 = vpack.c.bf16 %v2364_v18, %v2364_v18  ;;  %v2365_v28 = vmax.f32 %v2169_v19, 0.0 }
 0x113   :  { %3247 = vst.msk [vmem:[%s6060_s4 + $0x58] sm:$0xf] %vm3224_vm3, %v3843_v20  ;;  %v3844_v30 = vpack.c.bf16 %v2267_v21, %v2267_v21  ;;  %3347 = vst.msk [vmem:[%s6060_s4 + $0x1e8] sm:$0xf] %vm3224_vm3, %v3943_v22  ;;  %v3944_v31 = vpack.c.bf16 %v2367_v23, %v2367_v23  ;;  %v1871_v32 = vmul.f32 %v4147_v27, %v4853_v40 }
 0x114   :  { %v1971_v34 = vmul.f32 %v4247_v29, %v4853_v40  ;;  %3245 = vst.msk [vmem:[%s6060_s4 + $0x50] sm:$0xf] %vm3224_vm3, %v3841_v24  ;;  %v3842_v36 = vpack.c.bf16 %v2265_v25, %v2265_v25  ;;  %3345 = vst.msk [vmem:[%s6060_s4 + $0x1e0] sm:$0xf] %vm3224_vm3, %v3941_v26  ;;  %v3942_v37 = vpack.c.bf16 %v2365_v28, %v2365_v28 }
 0x115   :  { %v1869_v38 = vmul.f32 %v4853_v40, %v1151_v33  ;;  %v1969_v41 = vmul.f32 %v4853_v40, %v1551_v35  ;;  %3248 = vst.msk [vmem:[%s6060_s4 + $0x5c] sm:$0xf] %vm3224_vm3, %v3844_v30  ;;  %3348 = vst.msk [vmem:[%s6060_s4 + $0x1ec] sm:$0xf] %vm3224_vm3, %v3944_v31  ;;  %v2074_v44 = vadd.f32 %v4858_v42, %v1871_v32  ;;  %v4151_v5 = vpop.f32.mrb[28].mxu0  ;;  %v4251_v7 = vpop.f32.mrb[28].mxu1 }
 0x116   :  { %v1872_v45 = vmul.f32 %v4148_v39, %v4853_v40  ;;  %v2174_v47 = vadd.f32 %v4858_v42, %v1971_v34  ;;  %v1972_v48 = vmul.f32 %v4248_v43, %v4853_v40  ;;  %3246 = vst.msk [vmem:[%s6060_s4 + $0x54] sm:$0xf] %vm3224_vm3, %v3842_v36  ;;  %3346 = vst.msk [vmem:[%s6060_s4 + $0x1e4] sm:$0xf] %vm3224_vm3, %v3942_v37  ;;  %v1167_v11 = vpop.f32.mrb[29].mxu0  ;;  %v1567_v13 = vpop.f32.mrb[29].mxu1 }
 0x117   :  { %v2072_v50 = vadd.f32 %v4858_v42, %v1869_v38  ;;  %v1870_v51 = vmul.f32 %v4853_v40, %v1154_v46  ;;  %v2172_v52 = vadd.f32 %v4858_v42, %v1969_v41  ;;  %v1970_v53 = vmul.f32 %v4853_v40, %v1554_v49  ;;  %v4152_v17 = vpop.f32.mrb[30].mxu0  ;;  %v4252_v19 = vpop.f32.mrb[30].mxu1 }
 0x118   :  { %v2270_v54 = vmax.f32 %v2074_v44, 0.0  ;;  %v2075_v55 = vadd.f32 %v4858_v42, %v1872_v45  ;;  %v2370_v56 = vmax.f32 %v2174_v47, 0.0  ;;  %v2175_v57 = vadd.f32 %v4858_v42, %v1972_v48  ;;  %v1170_v22 = vpop.f32.mrb[31].mxu0  ;;  %v1570_v25 = vpop.f32.mrb[31].mxu1 }
 0x119   :  { %v2268_v58 = vmax.f32 %v2072_v50, 0.0  ;;  %v2073_v59 = vadd.f32 %v4858_v42, %v1870_v51  ;;  %v2368_v60 = vmax.f32 %v2172_v52, 0.0  ;;  %v2173_v61 = vadd.f32 %v4858_v42, %v1970_v53 }
 0x11a   :  { %v3847_v62 = vpack.c.bf16 %v2270_v54, %v2270_v54  ;;  %v2271_v63 = vmax.f32 %v2075_v55, 0.0  ;;  %v3947_v0 = vpack.c.bf16 %v2370_v56, %v2370_v56  ;;  %v2371_v1 = vmax.f32 %v2175_v57, 0.0 }
 0x11b   :  { %v3845_v2 = vpack.c.bf16 %v2268_v58, %v2268_v58  ;;  %v2269_v3 = vmax.f32 %v2073_v59, 0.0  ;;  %v3945_v4 = vpack.c.bf16 %v2368_v60, %v2368_v60  ;;  %v2369_v6 = vmax.f32 %v2173_v61, 0.0 }
 0x11c   :  { %3251 = vst.msk [vmem:[%s6060_s4 + $0x68] sm:$0xf] %vm3224_vm3, %v3847_v62  ;;  %v3848_v8 = vpack.c.bf16 %v2271_v63, %v2271_v63  ;;  %3351 = vst.msk [vmem:[%s6060_s4 + $0x1f8] sm:$0xf] %vm3224_vm3, %v3947_v0  ;;  %v3948_v9 = vpack.c.bf16 %v2371_v1, %v2371_v1  ;;  %v1875_v10 = vmul.f32 %v4151_v5, %v4853_v40 }
 0x11d   :  { %v1975_v12 = vmul.f32 %v4251_v7, %v4853_v40  ;;  %3249 = vst.msk [vmem:[%s6060_s4 + $0x60] sm:$0xf] %vm3224_vm3, %v3845_v2  ;;  %v3846_v14 = vpack.c.bf16 %v2269_v3, %v2269_v3  ;;  %3349 = vst.msk [vmem:[%s6060_s4 + $0x1f0] sm:$0xf] %vm3224_vm3, %v3945_v4  ;;  %v3946_v15 = vpack.c.bf16 %v2369_v6, %v2369_v6  ;;  %v4155_v47 = vpop.f32.mrb[32].mxu0  ;;  %v4255_v49 = vpop.f32.mrb[32].mxu1 }
 0x11e   :  { %v1873_v16 = vmul.f32 %v4853_v40, %v1167_v11  ;;  %v1973_v18 = vmul.f32 %v4853_v40, %v1567_v13  ;;  %3252 = vst.msk [vmem:[%s6060_s4 + $0x6c] sm:$0xf] %vm3224_vm3, %v3848_v8  ;;  %3352 = vst.msk [vmem:[%s6060_s4 + $0x1fc] sm:$0xf] %vm3224_vm3, %v3948_v9  ;;  %v2078_v20 = vadd.f32 %v4858_v42, %v1875_v10  ;;  %v1183_v53 = vpop.f32.mrb[33].mxu0  ;;  %v1583_v55 = vpop.f32.mrb[33].mxu1 }
 0x11f   :  { %v1876_v21 = vmul.f32 %v4152_v17, %v4853_v40  ;;  %v2178_v23 = vadd.f32 %v4858_v42, %v1975_v12  ;;  %v1976_v24 = vmul.f32 %v4252_v19, %v4853_v40  ;;  %3250 = vst.msk [vmem:[%s6060_s4 + $0x64] sm:$0xf] %vm3224_vm3, %v3846_v14  ;;  %3350 = vst.msk [vmem:[%s6060_s4 + $0x1f4] sm:$0xf] %vm3224_vm3, %v3946_v15  ;;  %v4156_v59 = vpop.f32.mrb[34].mxu0  ;;  %v4256_v61 = vpop.f32.mrb[34].mxu1 }
 0x120   :  { %v2076_v26 = vadd.f32 %v4858_v42, %v1873_v16  ;;  %v1874_v27 = vmul.f32 %v4853_v40, %v1170_v22  ;;  %v2176_v28 = vadd.f32 %v4858_v42, %v1973_v18  ;;  %v1974_v29 = vmul.f32 %v4853_v40, %v1570_v25  ;;  %v1186_v0 = vpop.f32.mrb[35].mxu0  ;;  %v1586_v3 = vpop.f32.mrb[35].mxu1 }
 0x121   :  { %v2274_v30 = vmax.f32 %v2078_v20, 0.0  ;;  %v2079_v31 = vadd.f32 %v4858_v42, %v1876_v21  ;;  %v2374_v32 = vmax.f32 %v2178_v23, 0.0  ;;  %v2179_v33 = vadd.f32 %v4858_v42, %v1976_v24 }
 0x122   :  { %v2272_v34 = vmax.f32 %v2076_v26, 0.0  ;;  %v2077_v35 = vadd.f32 %v4858_v42, %v1874_v27  ;;  %v2372_v36 = vmax.f32 %v2176_v28, 0.0  ;;  %v2177_v37 = vadd.f32 %v4858_v42, %v1974_v29 }
 0x123   :  { %v3851_v38 = vpack.c.bf16 %v2274_v30, %v2274_v30  ;;  %v2275_v39 = vmax.f32 %v2079_v31, 0.0  ;;  %v3951_v41 = vpack.c.bf16 %v2374_v32, %v2374_v32  ;;  %v2375_v43 = vmax.f32 %v2179_v33, 0.0 }
 0x124   :  { %v3849_v44 = vpack.c.bf16 %v2272_v34, %v2272_v34  ;;  %v2273_v45 = vmax.f32 %v2077_v35, 0.0  ;;  %v3949_v46 = vpack.c.bf16 %v2372_v36, %v2372_v36  ;;  %v2373_v48 = vmax.f32 %v2177_v37, 0.0 }
 0x125   :  { %3255 = vst.msk [vmem:[%s6060_s4 + $0x78] sm:$0xf] %vm3224_vm3, %v3851_v38  ;;  %v3852_v50 = vpack.c.bf16 %v2275_v39, %v2275_v39  ;;  %3355 = vst.msk [vmem:[%s6060_s4 + $0x208] sm:$0xf] %vm3224_vm3, %v3951_v41  ;;  %v3952_v51 = vpack.c.bf16 %v2375_v43, %v2375_v43  ;;  %v1879_v52 = vmul.f32 %v4155_v47, %v4853_v40  ;;  %v4159_v23 = vpop.f32.mrb[36].mxu0  ;;  %v4259_v25 = vpop.f32.mrb[36].mxu1 }
 0x126   :  { %v1979_v54 = vmul.f32 %v4255_v49, %v4853_v40  ;;  %3253 = vst.msk [vmem:[%s6060_s4 + $0x70] sm:$0xf] %vm3224_vm3, %v3849_v44  ;;  %v3850_v56 = vpack.c.bf16 %v2273_v45, %v2273_v45  ;;  %3353 = vst.msk [vmem:[%s6060_s4 + $0x200] sm:$0xf] %vm3224_vm3, %v3949_v46  ;;  %v3950_v57 = vpack.c.bf16 %v2373_v48, %v2373_v48  ;;  %v1199_v29 = vpop.f32.mrb[37].mxu0  ;;  %v1599_v31 = vpop.f32.mrb[37].mxu1 }
 0x127   :  { %v1877_v58 = vmul.f32 %v4853_v40, %v1183_v53  ;;  %v1977_v60 = vmul.f32 %v4853_v40, %v1583_v55  ;;  %3256 = vst.msk [vmem:[%s6060_s4 + $0x7c] sm:$0xf] %vm3224_vm3, %v3852_v50  ;;  %3356 = vst.msk [vmem:[%s6060_s4 + $0x20c] sm:$0xf] %vm3224_vm3, %v3952_v51  ;;  %v2082_v62 = vadd.f32 %v4858_v42, %v1879_v52  ;;  %v4160_v35 = vpop.f32.mrb[38].mxu0  ;;  %v4260_v37 = vpop.f32.mrb[38].mxu1 }
 0x128   :  { %v1880_v63 = vmul.f32 %v4156_v59, %v4853_v40  ;;  %v2182_v1 = vadd.f32 %v4858_v42, %v1979_v54  ;;  %v1980_v2 = vmul.f32 %v4256_v61, %v4853_v40  ;;  %3254 = vst.msk [vmem:[%s6060_s4 + $0x74] sm:$0xf] %vm3224_vm3, %v3850_v56  ;;  %3354 = vst.msk [vmem:[%s6060_s4 + $0x204] sm:$0xf] %vm3224_vm3, %v3950_v57  ;;  %v1202_v41 = vpop.f32.mrb[39].mxu0  ;;  %v1602_v45 = vpop.f32.mrb[39].mxu1 }
 0x129   :  { %v2080_v4 = vadd.f32 %v4858_v42, %v1877_v58  ;;  %v1878_v5 = vmul.f32 %v4853_v40, %v1186_v0  ;;  %v2180_v6 = vadd.f32 %v4858_v42, %v1977_v60  ;;  %v1978_v7 = vmul.f32 %v4853_v40, %v1586_v3 }
 0x12a   :  { %v2278_v8 = vmax.f32 %v2082_v62, 0.0  ;;  %v2083_v9 = vadd.f32 %v4858_v42, %v1880_v63  ;;  %v2378_v10 = vmax.f32 %v2182_v1, 0.0  ;;  %v2183_v11 = vadd.f32 %v4858_v42, %v1980_v2 }
 0x12b   :  { %v2276_v12 = vmax.f32 %v2080_v4, 0.0  ;;  %v2081_v13 = vadd.f32 %v4858_v42, %v1878_v5  ;;  %v2376_v14 = vmax.f32 %v2180_v6, 0.0  ;;  %v2181_v15 = vadd.f32 %v4858_v42, %v1978_v7 }
 0x12c   :  { %v3855_v16 = vpack.c.bf16 %v2278_v8, %v2278_v8  ;;  %v2279_v17 = vmax.f32 %v2083_v9, 0.0  ;;  %v3955_v18 = vpack.c.bf16 %v2378_v10, %v2378_v10  ;;  %v2379_v19 = vmax.f32 %v2183_v11, 0.0 }
 0x12d   :  { %v3853_v20 = vpack.c.bf16 %v2276_v12, %v2276_v12  ;;  %v2277_v21 = vmax.f32 %v2081_v13, 0.0  ;;  %v3953_v22 = vpack.c.bf16 %v2376_v14, %v2376_v14  ;;  %v2377_v24 = vmax.f32 %v2181_v15, 0.0  ;;  %v4163_v1 = vpop.f32.mrb[40].mxu0  ;;  %v4263_v3 = vpop.f32.mrb[40].mxu1 }
 0x12e   :  { %3259 = vst.msk [vmem:[%s6060_s4 + $0x88] sm:$0xf] %vm3224_vm3, %v3855_v16  ;;  %v3856_v26 = vpack.c.bf16 %v2279_v17, %v2279_v17  ;;  %3359 = vst.msk [vmem:[%s6060_s4 + $0x218] sm:$0xf] %vm3224_vm3, %v3955_v18  ;;  %v3956_v27 = vpack.c.bf16 %v2379_v19, %v2379_v19  ;;  %v1883_v28 = vmul.f32 %v4159_v23, %v4853_v40  ;;  %v1215_v7 = vpop.f32.mrb[41].mxu0  ;;  %v1615_v9 = vpop.f32.mrb[41].mxu1 }
 0x12f   :  { %v1983_v30 = vmul.f32 %v4259_v25, %v4853_v40  ;;  %3257 = vst.msk [vmem:[%s6060_s4 + $0x80] sm:$0xf] %vm3224_vm3, %v3853_v20  ;;  %v3854_v32 = vpack.c.bf16 %v2277_v21, %v2277_v21  ;;  %3357 = vst.msk [vmem:[%s6060_s4 + $0x210] sm:$0xf] %vm3224_vm3, %v3953_v22  ;;  %v3954_v33 = vpack.c.bf16 %v2377_v24, %v2377_v24  ;;  %v4164_v13 = vpop.f32.mrb[42].mxu0  ;;  %v4264_v15 = vpop.f32.mrb[42].mxu1 }
 0x130   :  { %v1881_v34 = vmul.f32 %v4853_v40, %v1199_v29  ;;  %v1981_v36 = vmul.f32 %v4853_v40, %v1599_v31  ;;  %3260 = vst.msk [vmem:[%s6060_s4 + $0x8c] sm:$0xf] %vm3224_vm3, %v3856_v26  ;;  %3360 = vst.msk [vmem:[%s6060_s4 + $0x21c] sm:$0xf] %vm3224_vm3, %v3956_v27  ;;  %v2086_v38 = vadd.f32 %v4858_v42, %v1883_v28  ;;  %v1218_v18 = vpop.f32.mrb[43].mxu0  ;;  %v1618_v21 = vpop.f32.mrb[43].mxu1 }
 0x131   :  { %v1884_v39 = vmul.f32 %v4160_v35, %v4853_v40  ;;  %v2186_v43 = vadd.f32 %v4858_v42, %v1983_v30  ;;  %v1984_v44 = vmul.f32 %v4260_v37, %v4853_v40  ;;  %3258 = vst.msk [vmem:[%s6060_s4 + $0x84] sm:$0xf] %vm3224_vm3, %v3854_v32  ;;  %3358 = vst.msk [vmem:[%s6060_s4 + $0x214] sm:$0xf] %vm3224_vm3, %v3954_v33 }
 0x132   :  { %v2084_v46 = vadd.f32 %v4858_v42, %v1881_v34  ;;  %v1882_v47 = vmul.f32 %v4853_v40, %v1202_v41  ;;  %v2184_v48 = vadd.f32 %v4858_v42, %v1981_v36  ;;  %v1982_v49 = vmul.f32 %v4853_v40, %v1602_v45 }
 0x133   :  { %v2282_v50 = vmax.f32 %v2086_v38, 0.0  ;;  %v2087_v51 = vadd.f32 %v4858_v42, %v1884_v39  ;;  %v2382_v52 = vmax.f32 %v2186_v43, 0.0  ;;  %v2187_v53 = vadd.f32 %v4858_v42, %v1984_v44 }
 0x134   :  { %v2280_v54 = vmax.f32 %v2084_v46, 0.0  ;;  %v2085_v55 = vadd.f32 %v4858_v42, %v1882_v47  ;;  %v2380_v56 = vmax.f32 %v2184_v48, 0.0  ;;  %v2185_v57 = vadd.f32 %v4858_v42, %v1982_v49  ;;  %v5367_v46 = vld [vmem:[%s6058_s2] ss:$0 sm:$0xff] }
 0x135   :  { %v3859_v58 = vpack.c.bf16 %v2282_v50, %v2282_v50  ;;  %v2283_v59 = vmax.f32 %v2087_v51, 0.0  ;;  %v3959_v60 = vpack.c.bf16 %v2382_v52, %v2382_v52  ;;  %v2383_v61 = vmax.f32 %v2187_v53, 0.0  ;;  %v4267_v44 = vpop.f32.mrb[44].mxu1 }
 0x136   :  { %v3857_v62 = vpack.c.bf16 %v2280_v54, %v2280_v54  ;;  %v2281_v63 = vmax.f32 %v2085_v55, 0.0  ;;  %v3957_v0 = vpack.c.bf16 %v2380_v56, %v2380_v56  ;;  %v2381_v2 = vmax.f32 %v2185_v57, 0.0  ;;  %v1631_v50 = vpop.f32.mrb[45].mxu1  ;;  %v5392_v57 = vld [vmem:[%s6059_s3] ss:$0 sm:$0xff] }
 0x137   :  { %3263 = vst.msk [vmem:[%s6060_s4 + $0x98] sm:$0xf] %vm3224_vm3, %v3859_v58  ;;  %v3860_v4 = vpack.c.bf16 %v2283_v59, %v2283_v59  ;;  %3363 = vst.msk [vmem:[%s6060_s4 + $0x228] sm:$0xf] %vm3224_vm3, %v3959_v60  ;;  %v3960_v5 = vpack.c.bf16 %v2383_v61, %v2383_v61  ;;  %v1887_v6 = vmul.f32 %v4163_v1, %v4853_v40  ;;  %v4268_v56 = vpop.f32.mrb[46].mxu1 }
 0x138   :  { %v1987_v8 = vmul.f32 %v4263_v3, %v4853_v40  ;;  %3261 = vst.msk [vmem:[%s6060_s4 + $0x90] sm:$0xf] %vm3224_vm3, %v3857_v62  ;;  %v3858_v10 = vpack.c.bf16 %v2281_v63, %v2281_v63  ;;  %3361 = vst.msk [vmem:[%s6060_s4 + $0x220] sm:$0xf] %vm3224_vm3, %v3957_v0  ;;  %v3958_v11 = vpack.c.bf16 %v2381_v2, %v2381_v2  ;;  %v1634_v63 = vpop.f32.mrb[47].mxu1 }
 0x139   :  { %v1885_v12 = vmul.f32 %v4853_v40, %v1215_v7  ;;  %v1985_v14 = vmul.f32 %v4853_v40, %v1615_v9  ;;  %3264 = vst.msk [vmem:[%s6060_s4 + $0x9c] sm:$0xf] %vm3224_vm3, %v3860_v4  ;;  %3364 = vst.msk [vmem:[%s6060_s4 + $0x22c] sm:$0xf] %vm3224_vm3, %v3960_v5  ;;  %v2090_v16 = vadd.f32 %v4858_v42, %v1887_v6 }
 0x13a   :  { %v1888_v17 = vmul.f32 %v4164_v13, %v4853_v40  ;;  %v2190_v19 = vadd.f32 %v4858_v42, %v1987_v8  ;;  %v1988_v20 = vmul.f32 %v4264_v15, %v4853_v40  ;;  %3262 = vst.msk [vmem:[%s6060_s4 + $0x94] sm:$0xf] %vm3224_vm3, %v3858_v10  ;;  %3362 = vst.msk [vmem:[%s6060_s4 + $0x224] sm:$0xf] %vm3224_vm3, %v3958_v11 }
 0x13b   :  { %v2088_v22 = vadd.f32 %v4858_v42, %v1885_v12  ;;  %v1886_v23 = vmul.f32 %v4853_v40, %v1218_v18  ;;  %v2188_v24 = vadd.f32 %v4858_v42, %v1985_v14  ;;  %v1986_v25 = vmul.f32 %v4853_v40, %v1618_v21  ;;  %v4167_v40 = vpop.f32.mrb[44].mxu0 }
 0x13c   :  { %v2286_v26 = vmax.f32 %v2090_v16, 0.0  ;;  %v2091_v27 = vadd.f32 %v4858_v42, %v1888_v17  ;;  %v2386_v28 = vmax.f32 %v2190_v19, 0.0  ;;  %v2191_v29 = vadd.f32 %v4858_v42, %v1988_v20  ;;  %v1231_v48 = vpop.f32.mrb[45].mxu0 }
 0x13d   :  { %v2284_v30 = vmax.f32 %v2088_v22, 0.0  ;;  %v2089_v31 = vadd.f32 %v4858_v42, %v1886_v23  ;;  %v2384_v32 = vmax.f32 %v2188_v24, 0.0  ;;  %v2189_v33 = vadd.f32 %v4858_v42, %v1986_v25  ;;  %v4168_v54 = vpop.f32.mrb[46].mxu0  ;;  %v4271_v21 = vpop.f32.mrb[48].mxu1 }
 0x13e   :  { %v3863_v34 = vpack.c.bf16 %v2286_v26, %v2286_v26  ;;  %v2287_v35 = vmax.f32 %v2091_v27, 0.0  ;;  %v3963_v36 = vpack.c.bf16 %v2386_v28, %v2386_v28  ;;  %v2387_v37 = vmax.f32 %v2191_v29, 0.0  ;;  %v1234_v60 = vpop.f32.mrb[47].mxu0  ;;  %v1647_v27 = vpop.f32.mrb[49].mxu1 }
 0x13f   :  { %v3861_v38 = vpack.c.bf16 %v2284_v30, %v2284_v30  ;;  %v2285_v39 = vmax.f32 %v2089_v31, 0.0  ;;  %v3961_v41 = vpack.c.bf16 %v2384_v32, %v2384_v32  ;;  %v2385_v43 = vmax.f32 %v2189_v33, 0.0  ;;  %v4171_v19 = vpop.f32.mrb[48].mxu0  ;;  %v4272_v33 = vpop.f32.mrb[50].mxu1 }
 0x140   :  { %3267 = vst.msk [vmem:[%s6060_s4 + $0xa8] sm:$0xf] %vm3224_vm3, %v3863_v34  ;;  %v3864_v45 = vpack.c.bf16 %v2287_v35, %v2287_v35  ;;  %3367 = vst.msk [vmem:[%s6060_s4 + $0x238] sm:$0xf] %vm3224_vm3, %v3963_v36  ;;  %v3964_v42 = vpack.c.bf16 %v2387_v37, %v2387_v37  ;;  %v1891_v47 = vmul.f32 %v5367_v46, %v4167_v40  ;;  %v1247_v25 = vpop.f32.mrb[49].mxu0 }
 0x141   :  { %v1991_v49 = vmul.f32 %v5367_v46, %v4267_v44  ;;  %3265 = vst.msk [vmem:[%s6060_s4 + $0xa0] sm:$0xf] %vm3224_vm3, %v3861_v38  ;;  %v3862_v51 = vpack.c.bf16 %v2285_v39, %v2285_v39  ;;  %3365 = vst.msk [vmem:[%s6060_s4 + $0x230] sm:$0xf] %vm3224_vm3, %v3961_v41  ;;  %v3962_v52 = vpack.c.bf16 %v2385_v43, %v2385_v43  ;;  %v4172_v31 = vpop.f32.mrb[50].mxu0  ;;  %v1650_v39 = vpop.f32.mrb[51].mxu1 }
 0x142   :  { %v1889_v53 = vmul.f32 %v5367_v46, %v1231_v48  ;;  %v1989_v55 = vmul.f32 %v5367_v46, %v1631_v50  ;;  %3268 = vst.msk [vmem:[%s6060_s4 + $0xac] sm:$0xf] %vm3224_vm3, %v3864_v45  ;;  %3368 = vst.msk [vmem:[%s6060_s4 + $0x23c] sm:$0xf] %vm3224_vm3, %v3964_v42  ;;  %v2094_v58 = vadd.f32 %v5392_v57, %v1891_v47  ;;  %v1250_v36 = vpop.f32.mrb[51].mxu0 }
 0x143   :  { %v1892_v59 = vmul.f32 %v5367_v46, %v4168_v54  ;;  %v2194_v61 = vadd.f32 %v5392_v57, %v1991_v49  ;;  %v1992_v62 = vmul.f32 %v5367_v46, %v4268_v56  ;;  %3266 = vst.msk [vmem:[%s6060_s4 + $0xa4] sm:$0xf] %vm3224_vm3, %v3862_v51  ;;  %3366 = vst.msk [vmem:[%s6060_s4 + $0x234] sm:$0xf] %vm3224_vm3, %v3962_v52 }
 0x144   :  { %v2092_v0 = vadd.f32 %v5392_v57, %v1889_v53  ;;  %v1890_v1 = vmul.f32 %v5367_v46, %v1234_v60  ;;  %v2192_v2 = vadd.f32 %v5392_v57, %v1989_v55  ;;  %v1990_v3 = vmul.f32 %v5367_v46, %v1634_v63 }
 0x145   :  { %v2290_v4 = vmax.f32 %v2094_v58, 0.0  ;;  %v2095_v5 = vadd.f32 %v5392_v57, %v1892_v59  ;;  %v2390_v6 = vmax.f32 %v2194_v61, 0.0  ;;  %v2195_v7 = vadd.f32 %v5392_v57, %v1992_v62  ;;  %v4175_v61 = vpop.f32.mrb[52].mxu0  ;;  %v4275_v63 = vpop.f32.mrb[52].mxu1 }
 0x146   :  { %v2288_v8 = vmax.f32 %v2092_v0, 0.0  ;;  %v2093_v9 = vadd.f32 %v5392_v57, %v1890_v1  ;;  %v2388_v10 = vmax.f32 %v2192_v2, 0.0  ;;  %v2193_v11 = vadd.f32 %v5392_v57, %v1990_v3  ;;  %v1263_v3 = vpop.f32.mrb[53].mxu0 }
 0x147   :  { %v3867_v12 = vpack.c.bf16 %v2290_v4, %v2290_v4  ;;  %v2291_v13 = vmax.f32 %v2095_v5, 0.0  ;;  %v3967_v14 = vpack.c.bf16 %v2390_v6, %v2390_v6  ;;  %v2391_v15 = vmax.f32 %v2195_v7, 0.0  ;;  %v1663_v5 = vpop.f32.mrb[53].mxu1 }
 0x148   :  { %v3865_v16 = vpack.c.bf16 %v2288_v8, %v2288_v8  ;;  %v2289_v17 = vmax.f32 %v2093_v9, 0.0  ;;  %v3965_v18 = vpack.c.bf16 %v2388_v10, %v2388_v10  ;;  %v2389_v20 = vmax.f32 %v2193_v11, 0.0  ;;  %v4176_v9 = vpop.f32.mrb[54].mxu0  ;;  %v4276_v11 = vpop.f32.mrb[54].mxu1 }
 0x149   :  { %3271 = vst.msk [vmem:[%s6060_s4 + $0xb8] sm:$0xf] %vm3224_vm3, %v3867_v12  ;;  %v3868_v22 = vpack.c.bf16 %v2291_v13, %v2291_v13  ;;  %3371 = vst.msk [vmem:[%s6060_s4 + $0x248] sm:$0xf] %vm3224_vm3, %v3967_v14  ;;  %v3968_v23 = vpack.c.bf16 %v2391_v15, %v2391_v15  ;;  %v1895_v24 = vmul.f32 %v5367_v46, %v4171_v19  ;;  %v1266_v14 = vpop.f32.mrb[55].mxu0 }
 0x14a   :  { %v1995_v26 = vmul.f32 %v5367_v46, %v4271_v21  ;;  %3269 = vst.msk [vmem:[%s6060_s4 + $0xb0] sm:$0xf] %vm3224_vm3, %v3865_v16  ;;  %v3866_v28 = vpack.c.bf16 %v2289_v17, %v2289_v17  ;;  %3369 = vst.msk [vmem:[%s6060_s4 + $0x240] sm:$0xf] %vm3224_vm3, %v3965_v18  ;;  %v3966_v29 = vpack.c.bf16 %v2389_v20, %v2389_v20  ;;  %v1666_v17 = vpop.f32.mrb[55].mxu1 }
 0x14b   :  { %v1893_v30 = vmul.f32 %v5367_v46, %v1247_v25  ;;  %v1993_v32 = vmul.f32 %v5367_v46, %v1647_v27  ;;  %3272 = vst.msk [vmem:[%s6060_s4 + $0xbc] sm:$0xf] %vm3224_vm3, %v3868_v22  ;;  %3372 = vst.msk [vmem:[%s6060_s4 + $0x24c] sm:$0xf] %vm3224_vm3, %v3968_v23  ;;  %v2098_v34 = vadd.f32 %v5392_v57, %v1895_v24 }
 0x14c   :  { %v1896_v35 = vmul.f32 %v5367_v46, %v4172_v31  ;;  %v2198_v37 = vadd.f32 %v5392_v57, %v1995_v26  ;;  %v1996_v38 = vmul.f32 %v5367_v46, %v4272_v33  ;;  %3270 = vst.msk [vmem:[%s6060_s4 + $0xb4] sm:$0xf] %vm3224_vm3, %v3866_v28  ;;  %3370 = vst.msk [vmem:[%s6060_s4 + $0x244] sm:$0xf] %vm3224_vm3, %v3966_v29 }
 0x14d   :  { %v2096_v41 = vadd.f32 %v5392_v57, %v1893_v30  ;;  %v1894_v40 = vmul.f32 %v5367_v46, %v1250_v36  ;;  %v2196_v43 = vadd.f32 %v5392_v57, %v1993_v32  ;;  %v1994_v44 = vmul.f32 %v5367_v46, %v1650_v39  ;;  %v4279_v39 = vpop.f32.mrb[56].mxu1 }
 0x14e   :  { %v2294_v45 = vmax.f32 %v2098_v34, 0.0  ;;  %v2099_v42 = vadd.f32 %v5392_v57, %v1896_v35  ;;  %v2394_v47 = vmax.f32 %v2198_v37, 0.0  ;;  %v2199_v48 = vadd.f32 %v5392_v57, %v1996_v38  ;;  %v4179_v37 = vpop.f32.mrb[56].mxu0 }
 0x14f   :  { %v2292_v49 = vmax.f32 %v2096_v41, 0.0  ;;  %v2097_v50 = vadd.f32 %v5392_v57, %v1894_v40  ;;  %v2392_v51 = vmax.f32 %v2196_v43, 0.0  ;;  %v2197_v52 = vadd.f32 %v5392_v57, %v1994_v44  ;;  %v1279_v44 = vpop.f32.mrb[57].mxu0 }
 0x150   :  { %v3871_v53 = vpack.c.bf16 %v2294_v45, %v2294_v45  ;;  %v2295_v54 = vmax.f32 %v2099_v42, 0.0  ;;  %v3971_v55 = vpack.c.bf16 %v2394_v47, %v2394_v47  ;;  %v2395_v56 = vmax.f32 %v2199_v48, 0.0  ;;  %v1679_v42 = vpop.f32.mrb[57].mxu1 }
 0x151   :  { %v3869_v58 = vpack.c.bf16 %v2292_v49, %v2292_v49  ;;  %v2293_v59 = vmax.f32 %v2097_v50, 0.0  ;;  %v3969_v60 = vpack.c.bf16 %v2392_v51, %v2392_v51  ;;  %v2393_v62 = vmax.f32 %v2197_v52, 0.0  ;;  %v4180_v50 = vpop.f32.mrb[58].mxu0  ;;  %v4280_v52 = vpop.f32.mrb[58].mxu1 }
 0x152   :  { %3275 = vst.msk [vmem:[%s6060_s4 + $0xc8] sm:$0xf] %vm3224_vm3, %v3871_v53  ;;  %v3872_v0 = vpack.c.bf16 %v2295_v54, %v2295_v54  ;;  %3375 = vst.msk [vmem:[%s6060_s4 + $0x258] sm:$0xf] %vm3224_vm3, %v3971_v55  ;;  %v3972_v1 = vpack.c.bf16 %v2395_v56, %v2395_v56  ;;  %v1899_v2 = vmul.f32 %v5367_v46, %v4175_v61  ;;  %v1282_v55 = vpop.f32.mrb[59].mxu0 }
 0x153   :  { %v1999_v4 = vmul.f32 %v5367_v46, %v4275_v63  ;;  %3273 = vst.msk [vmem:[%s6060_s4 + $0xc0] sm:$0xf] %vm3224_vm3, %v3869_v58  ;;  %v3870_v6 = vpack.c.bf16 %v2293_v59, %v2293_v59  ;;  %3373 = vst.msk [vmem:[%s6060_s4 + $0x250] sm:$0xf] %vm3224_vm3, %v3969_v60  ;;  %v3970_v7 = vpack.c.bf16 %v2393_v62, %v2393_v62  ;;  %v1682_v59 = vpop.f32.mrb[59].mxu1 }
 0x154   :  { %v1897_v8 = vmul.f32 %v5367_v46, %v1263_v3  ;;  %v1997_v10 = vmul.f32 %v5367_v46, %v1663_v5  ;;  %3276 = vst.msk [vmem:[%s6060_s4 + $0xcc] sm:$0xf] %vm3224_vm3, %v3872_v0  ;;  %3376 = vst.msk [vmem:[%s6060_s4 + $0x25c] sm:$0xf] %vm3224_vm3, %v3972_v1  ;;  %v2102_v12 = vadd.f32 %v5392_v57, %v1899_v2 }
 0x155   :  { %v1900_v13 = vmul.f32 %v5367_v46, %v4176_v9  ;;  %v2202_v15 = vadd.f32 %v5392_v57, %v1999_v4  ;;  %v2000_v16 = vmul.f32 %v5367_v46, %v4276_v11  ;;  %3274 = vst.msk [vmem:[%s6060_s4 + $0xc4] sm:$0xf] %vm3224_vm3, %v3870_v6  ;;  %3374 = vst.msk [vmem:[%s6060_s4 + $0x254] sm:$0xf] %vm3224_vm3, %v3970_v7 }
 0x156   :  { %v2100_v18 = vadd.f32 %v5392_v57, %v1897_v8  ;;  %v1898_v19 = vmul.f32 %v5367_v46, %v1266_v14  ;;  %v2200_v20 = vadd.f32 %v5392_v57, %v1997_v10  ;;  %v1998_v21 = vmul.f32 %v5367_v46, %v1666_v17  ;;  %v4283_v17 = vpop.f32.mrb[60].mxu1 }
 0x157   :  { %v2298_v22 = vmax.f32 %v2102_v12, 0.0  ;;  %v2103_v23 = vadd.f32 %v5392_v57, %v1900_v13  ;;  %v2398_v24 = vmax.f32 %v2202_v15, 0.0  ;;  %v2203_v25 = vadd.f32 %v5392_v57, %v2000_v16  ;;  %v4183_v15 = vpop.f32.mrb[60].mxu0 }
 0x158   :  { %v2296_v26 = vmax.f32 %v2100_v18, 0.0  ;;  %v2101_v27 = vadd.f32 %v5392_v57, %v1898_v19  ;;  %v2396_v28 = vmax.f32 %v2200_v20, 0.0  ;;  %v2201_v29 = vadd.f32 %v5392_v57, %v1998_v21  ;;  %v1295_v21 = vpop.f32.mrb[61].mxu0 }
 0x159   :  { %v3875_v30 = vpack.c.bf16 %v2298_v22, %v2298_v22  ;;  %v2299_v31 = vmax.f32 %v2103_v23, 0.0  ;;  %v3975_v32 = vpack.c.bf16 %v2398_v24, %v2398_v24  ;;  %v2399_v33 = vmax.f32 %v2203_v25, 0.0  ;;  %v1695_v23 = vpop.f32.mrb[61].mxu1 }
 0x15a   :  { %v3873_v34 = vpack.c.bf16 %v2296_v26, %v2296_v26  ;;  %v2297_v35 = vmax.f32 %v2101_v27, 0.0  ;;  %v3973_v36 = vpack.c.bf16 %v2396_v28, %v2396_v28  ;;  %v2397_v38 = vmax.f32 %v2201_v29, 0.0  ;;  %v4184_v27 = vpop.f32.mrb[62].mxu0  ;;  %v4284_v29 = vpop.f32.mrb[62].mxu1 }
 0x15b   :  { %3279 = vst.msk [vmem:[%s6060_s4 + $0xd8] sm:$0xf] %vm3224_vm3, %v3875_v30  ;;  %v3876_v41 = vpack.c.bf16 %v2299_v31, %v2299_v31  ;;  %3379 = vst.msk [vmem:[%s6060_s4 + $0x268] sm:$0xf] %vm3224_vm3, %v3975_v32  ;;  %v3976_v40 = vpack.c.bf16 %v2399_v33, %v2399_v33  ;;  %v1903_v43 = vmul.f32 %v5367_v46, %v4179_v37  ;;  %v1298_v32 = vpop.f32.mrb[63].mxu0 }
 0x15c   :  { %v2003_v45 = vmul.f32 %v5367_v46, %v4279_v39  ;;  %3277 = vst.msk [vmem:[%s6060_s4 + $0xd0] sm:$0xf] %vm3224_vm3, %v3873_v34  ;;  %v3874_v47 = vpack.c.bf16 %v2297_v35, %v2297_v35  ;;  %3377 = vst.msk [vmem:[%s6060_s4 + $0x260] sm:$0xf] %vm3224_vm3, %v3973_v36  ;;  %v3974_v48 = vpack.c.bf16 %v2397_v38, %v2397_v38  ;;  %v1698_v35 = vpop.f32.mrb[63].mxu1 }
 0x15d   :  { %v1901_v49 = vmul.f32 %v5367_v46, %v1279_v44  ;;  %v2001_v51 = vmul.f32 %v5367_v46, %v1679_v42  ;;  %3280 = vst.msk [vmem:[%s6060_s4 + $0xdc] sm:$0xf] %vm3224_vm3, %v3876_v41  ;;  %3380 = vst.msk [vmem:[%s6060_s4 + $0x26c] sm:$0xf] %vm3224_vm3, %v3976_v40  ;;  %v2106_v53 = vadd.f32 %v5392_v57, %v1903_v43 }
 0x15e   :  { %v1904_v54 = vmul.f32 %v5367_v46, %v4180_v50  ;;  %v2206_v56 = vadd.f32 %v5392_v57, %v2003_v45  ;;  %v2004_v58 = vmul.f32 %v5367_v46, %v4280_v52  ;;  %3278 = vst.msk [vmem:[%s6060_s4 + $0xd4] sm:$0xf] %vm3224_vm3, %v3874_v47  ;;  %3378 = vst.msk [vmem:[%s6060_s4 + $0x264] sm:$0xf] %vm3224_vm3, %v3974_v48 }
 0x15f   :  { %v2104_v60 = vadd.f32 %v5392_v57, %v1901_v49  ;;  %v1902_v61 = vmul.f32 %v5367_v46, %v1282_v55  ;;  %v2204_v62 = vadd.f32 %v5392_v57, %v2001_v51  ;;  %v2002_v63 = vmul.f32 %v5367_v46, %v1682_v59  ;;  %v4287_v59 = vpop.f32.mrb[64].mxu1 }
 0x160   :  { %v2302_v0 = vmax.f32 %v2106_v53, 0.0  ;;  %v2107_v1 = vadd.f32 %v5392_v57, %v1904_v54  ;;  %v2402_v2 = vmax.f32 %v2206_v56, 0.0  ;;  %v2207_v3 = vadd.f32 %v5392_v57, %v2004_v58  ;;  %v4187_v56 = vpop.f32.mrb[64].mxu0 }
 0x161   :  { %v2300_v4 = vmax.f32 %v2104_v60, 0.0  ;;  %v2105_v5 = vadd.f32 %v5392_v57, %v1902_v61  ;;  %v2400_v6 = vmax.f32 %v2204_v62, 0.0  ;;  %v2205_v7 = vadd.f32 %v5392_v57, %v2002_v63  ;;  %v1311_v63 = vpop.f32.mrb[65].mxu0 }
 0x162   :  { %v3879_v8 = vpack.c.bf16 %v2302_v0, %v2302_v0  ;;  %v2303_v9 = vmax.f32 %v2107_v1, 0.0  ;;  %v3979_v10 = vpack.c.bf16 %v2402_v2, %v2402_v2  ;;  %v2403_v11 = vmax.f32 %v2207_v3, 0.0  ;;  %v1711_v1 = vpop.f32.mrb[65].mxu1 }
 0x163   :  { %v3877_v12 = vpack.c.bf16 %v2300_v4, %v2300_v4  ;;  %v2301_v13 = vmax.f32 %v2105_v5, 0.0  ;;  %v3977_v14 = vpack.c.bf16 %v2400_v6, %v2400_v6  ;;  %v2401_v16 = vmax.f32 %v2205_v7, 0.0  ;;  %v4188_v5 = vpop.f32.mrb[66].mxu0  ;;  %v4288_v7 = vpop.f32.mrb[66].mxu1 }
 0x164   :  { %3283 = vst.msk [vmem:[%s6060_s4 + $0xe8] sm:$0xf] %vm3224_vm3, %v3879_v8  ;;  %v3880_v18 = vpack.c.bf16 %v2303_v9, %v2303_v9  ;;  %3383 = vst.msk [vmem:[%s6060_s4 + $0x278] sm:$0xf] %vm3224_vm3, %v3979_v10  ;;  %v3980_v19 = vpack.c.bf16 %v2403_v11, %v2403_v11  ;;  %v1907_v20 = vmul.f32 %v5367_v46, %v4183_v15  ;;  %v1314_v10 = vpop.f32.mrb[67].mxu0 }
 0x165   :  { %v2007_v22 = vmul.f32 %v5367_v46, %v4283_v17  ;;  %3281 = vst.msk [vmem:[%s6060_s4 + $0xe0] sm:$0xf] %vm3224_vm3, %v3877_v12  ;;  %v3878_v24 = vpack.c.bf16 %v2301_v13, %v2301_v13  ;;  %3381 = vst.msk [vmem:[%s6060_s4 + $0x270] sm:$0xf] %vm3224_vm3, %v3977_v14  ;;  %v3978_v25 = vpack.c.bf16 %v2401_v16, %v2401_v16  ;;  %v1714_v13 = vpop.f32.mrb[67].mxu1 }
 0x166   :  { %v1905_v26 = vmul.f32 %v5367_v46, %v1295_v21  ;;  %v2005_v28 = vmul.f32 %v5367_v46, %v1695_v23  ;;  %3284 = vst.msk [vmem:[%s6060_s4 + $0xec] sm:$0xf] %vm3224_vm3, %v3880_v18  ;;  %3384 = vst.msk [vmem:[%s6060_s4 + $0x27c] sm:$0xf] %vm3224_vm3, %v3980_v19  ;;  %v2110_v30 = vadd.f32 %v5392_v57, %v1907_v20 }
 0x167   :  { %v1908_v31 = vmul.f32 %v5367_v46, %v4184_v27  ;;  %v2210_v33 = vadd.f32 %v5392_v57, %v2007_v22  ;;  %v2008_v34 = vmul.f32 %v5367_v46, %v4284_v29  ;;  %3282 = vst.msk [vmem:[%s6060_s4 + $0xe4] sm:$0xf] %vm3224_vm3, %v3878_v24  ;;  %3382 = vst.msk [vmem:[%s6060_s4 + $0x274] sm:$0xf] %vm3224_vm3, %v3978_v25 }
 0x168   :  { %v2108_v36 = vadd.f32 %v5392_v57, %v1905_v26  ;;  %v1906_v37 = vmul.f32 %v5367_v46, %v1298_v32  ;;  %v2208_v38 = vadd.f32 %v5392_v57, %v2005_v28  ;;  %v2006_v39 = vmul.f32 %v5367_v46, %v1698_v35  ;;  %v4291_v35 = vpop.f32.mrb[68].mxu1 }
 0x169   :  { %v2306_v41 = vmax.f32 %v2110_v30, 0.0  ;;  %v2111_v40 = vadd.f32 %v5392_v57, %v1908_v31  ;;  %v2406_v43 = vmax.f32 %v2210_v33, 0.0  ;;  %v2211_v44 = vadd.f32 %v5392_v57, %v2008_v34  ;;  %v4191_v33 = vpop.f32.mrb[68].mxu0 }
 0x16a   :  { %v2304_v45 = vmax.f32 %v2108_v36, 0.0  ;;  %v2109_v42 = vadd.f32 %v5392_v57, %v1906_v37  ;;  %v2404_v47 = vmax.f32 %v2208_v38, 0.0  ;;  %v2209_v48 = vadd.f32 %v5392_v57, %v2006_v39  ;;  %v1327_v39 = vpop.f32.mrb[69].mxu0 }
 0x16b   :  { %v3883_v49 = vpack.c.bf16 %v2306_v41, %v2306_v41  ;;  %v2307_v50 = vmax.f32 %v2111_v40, 0.0  ;;  %v3983_v51 = vpack.c.bf16 %v2406_v43, %v2406_v43  ;;  %v2407_v52 = vmax.f32 %v2211_v44, 0.0  ;;  %v1727_v40 = vpop.f32.mrb[69].mxu1 }
 0x16c   :  { %v3881_v53 = vpack.c.bf16 %v2304_v45, %v2304_v45  ;;  %v2305_v54 = vmax.f32 %v2109_v42, 0.0  ;;  %v3981_v55 = vpack.c.bf16 %v2404_v47, %v2404_v47  ;;  %v2405_v58 = vmax.f32 %v2209_v48, 0.0  ;;  %v4192_v42 = vpop.f32.mrb[70].mxu0  ;;  %v4292_v48 = vpop.f32.mrb[70].mxu1 }
 0x16d   :  { %3287 = vst.msk [vmem:[%s6060_s4 + $0xf8] sm:$0xf] %vm3224_vm3, %v3883_v49  ;;  %v3884_v60 = vpack.c.bf16 %v2307_v50, %v2307_v50  ;;  %3387 = vst.msk [vmem:[%s6060_s4 + $0x288] sm:$0xf] %vm3224_vm3, %v3983_v51  ;;  %v3984_v61 = vpack.c.bf16 %v2407_v52, %v2407_v52  ;;  %v1911_v62 = vmul.f32 %v5367_v46, %v4187_v56  ;;  %v1330_v51 = vpop.f32.mrb[71].mxu0 }
 0x16e   :  { %v2011_v0 = vmul.f32 %v5367_v46, %v4287_v59  ;;  %3285 = vst.msk [vmem:[%s6060_s4 + $0xf0] sm:$0xf] %vm3224_vm3, %v3881_v53  ;;  %v3882_v2 = vpack.c.bf16 %v2305_v54, %v2305_v54  ;;  %3385 = vst.msk [vmem:[%s6060_s4 + $0x280] sm:$0xf] %vm3224_vm3, %v3981_v55  ;;  %v3982_v3 = vpack.c.bf16 %v2405_v58, %v2405_v58  ;;  %v1730_v54 = vpop.f32.mrb[71].mxu1 }
 0x16f   :  { %v1909_v4 = vmul.f32 %v5367_v46, %v1311_v63  ;;  %v2009_v6 = vmul.f32 %v5367_v46, %v1711_v1  ;;  %3288 = vst.msk [vmem:[%s6060_s4 + $0xfc] sm:$0xf] %vm3224_vm3, %v3884_v60  ;;  %3388 = vst.msk [vmem:[%s6060_s4 + $0x28c] sm:$0xf] %vm3224_vm3, %v3984_v61  ;;  %v2114_v8 = vadd.f32 %v5392_v57, %v1911_v62 }
 0x170   :  { %v1912_v9 = vmul.f32 %v5367_v46, %v4188_v5  ;;  %v2214_v11 = vadd.f32 %v5392_v57, %v2011_v0  ;;  %v2012_v12 = vmul.f32 %v5367_v46, %v4288_v7  ;;  %3286 = vst.msk [vmem:[%s6060_s4 + $0xf4] sm:$0xf] %vm3224_vm3, %v3882_v2  ;;  %3386 = vst.msk [vmem:[%s6060_s4 + $0x284] sm:$0xf] %vm3224_vm3, %v3982_v3 }
 0x171   :  { %v2112_v14 = vadd.f32 %v5392_v57, %v1909_v4  ;;  %v1910_v15 = vmul.f32 %v5367_v46, %v1314_v10  ;;  %v2212_v16 = vadd.f32 %v5392_v57, %v2009_v6  ;;  %v2010_v17 = vmul.f32 %v5367_v46, %v1714_v13  ;;  %v4295_v13 = vpop.f32.mrb[72].mxu1 }
 0x172   :  { %v2310_v18 = vmax.f32 %v2114_v8, 0.0  ;;  %v2115_v19 = vadd.f32 %v5392_v57, %v1912_v9  ;;  %v2410_v20 = vmax.f32 %v2214_v11, 0.0  ;;  %v2215_v21 = vadd.f32 %v5392_v57, %v2012_v12  ;;  %v4195_v11 = vpop.f32.mrb[72].mxu0 }
 0x173   :  { %v2308_v22 = vmax.f32 %v2112_v14, 0.0  ;;  %v2113_v23 = vadd.f32 %v5392_v57, %v1910_v15  ;;  %v2408_v24 = vmax.f32 %v2212_v16, 0.0  ;;  %v2213_v25 = vadd.f32 %v5392_v57, %v2010_v17  ;;  %v1343_v17 = vpop.f32.mrb[73].mxu0 }
 0x174   :  { %v3887_v26 = vpack.c.bf16 %v2310_v18, %v2310_v18  ;;  %v2311_v27 = vmax.f32 %v2115_v19, 0.0  ;;  %v3987_v28 = vpack.c.bf16 %v2410_v20, %v2410_v20  ;;  %v2411_v29 = vmax.f32 %v2215_v21, 0.0  ;;  %v1743_v19 = vpop.f32.mrb[73].mxu1 }
 0x175   :  { %v3885_v30 = vpack.c.bf16 %v2308_v22, %v2308_v22  ;;  %v2309_v31 = vmax.f32 %v2113_v23, 0.0  ;;  %v3985_v32 = vpack.c.bf16 %v2408_v24, %v2408_v24  ;;  %v2409_v34 = vmax.f32 %v2213_v25, 0.0  ;;  %v4196_v23 = vpop.f32.mrb[74].mxu0  ;;  %v4296_v25 = vpop.f32.mrb[74].mxu1 }
 0x176   :  { %3291 = vst.msk [vmem:[%s6060_s4 + $0x108] sm:$0xf] %vm3224_vm3, %v3887_v26  ;;  %v3888_v36 = vpack.c.bf16 %v2311_v27, %v2311_v27  ;;  %3391 = vst.msk [vmem:[%s6060_s4 + $0x298] sm:$0xf] %vm3224_vm3, %v3987_v28  ;;  %v3988_v37 = vpack.c.bf16 %v2411_v29, %v2411_v29  ;;  %v1915_v38 = vmul.f32 %v5367_v46, %v4191_v33  ;;  %v1346_v28 = vpop.f32.mrb[75].mxu0 }
 0x177   :  { %v2015_v41 = vmul.f32 %v5367_v46, %v4291_v35  ;;  %3289 = vst.msk [vmem:[%s6060_s4 + $0x100] sm:$0xf] %vm3224_vm3, %v3885_v30  ;;  %v3886_v43 = vpack.c.bf16 %v2309_v31, %v2309_v31  ;;  %3389 = vst.msk [vmem:[%s6060_s4 + $0x290] sm:$0xf] %vm3224_vm3, %v3985_v32  ;;  %v3986_v44 = vpack.c.bf16 %v2409_v34, %v2409_v34  ;;  %v1746_v31 = vpop.f32.mrb[75].mxu1 }
 0x178   :  { %v1913_v45 = vmul.f32 %v5367_v46, %v1327_v39  ;;  %v2013_v47 = vmul.f32 %v5367_v46, %v1727_v40  ;;  %3292 = vst.msk [vmem:[%s6060_s4 + $0x10c] sm:$0xf] %vm3224_vm3, %v3888_v36  ;;  %3392 = vst.msk [vmem:[%s6060_s4 + $0x29c] sm:$0xf] %vm3224_vm3, %v3988_v37  ;;  %v2118_v49 = vadd.f32 %v5392_v57, %v1915_v38 }
 0x179   :  { %v1916_v50 = vmul.f32 %v5367_v46, %v4192_v42  ;;  %v2218_v52 = vadd.f32 %v5392_v57, %v2015_v41  ;;  %v2016_v53 = vmul.f32 %v5367_v46, %v4292_v48  ;;  %3290 = vst.msk [vmem:[%s6060_s4 + $0x104] sm:$0xf] %vm3224_vm3, %v3886_v43  ;;  %3390 = vst.msk [vmem:[%s6060_s4 + $0x294] sm:$0xf] %vm3224_vm3, %v3986_v44 }
 0x17a   :  { %v2116_v55 = vadd.f32 %v5392_v57, %v1913_v45  ;;  %v1914_v56 = vmul.f32 %v5367_v46, %v1330_v51  ;;  %v2216_v58 = vadd.f32 %v5392_v57, %v2013_v47  ;;  %v2014_v59 = vmul.f32 %v5367_v46, %v1730_v54  ;;  %v4299_v54 = vpop.f32.mrb[76].mxu1 }
 0x17b   :  { %v2314_v60 = vmax.f32 %v2118_v49, 0.0  ;;  %v2119_v61 = vadd.f32 %v5392_v57, %v1916_v50  ;;  %v2414_v62 = vmax.f32 %v2218_v52, 0.0  ;;  %v2219_v63 = vadd.f32 %v5392_v57, %v2016_v53  ;;  %v4199_v52 = vpop.f32.mrb[76].mxu0 }
 0x17c   :  { %v2312_v0 = vmax.f32 %v2116_v55, 0.0  ;;  %v2117_v1 = vadd.f32 %v5392_v57, %v1914_v56  ;;  %v2412_v2 = vmax.f32 %v2216_v58, 0.0  ;;  %v2217_v3 = vadd.f32 %v5392_v57, %v2014_v59  ;;  %v1359_v59 = vpop.f32.mrb[77].mxu0 }
 0x17d   :  { %v3891_v4 = vpack.c.bf16 %v2314_v60, %v2314_v60  ;;  %v2315_v5 = vmax.f32 %v2119_v61, 0.0  ;;  %v3991_v6 = vpack.c.bf16 %v2414_v62, %v2414_v62  ;;  %v2415_v7 = vmax.f32 %v2219_v63, 0.0  ;;  %v1759_v61 = vpop.f32.mrb[77].mxu1 }
 0x17e   :  { %v3889_v8 = vpack.c.bf16 %v2312_v0, %v2312_v0  ;;  %v2313_v9 = vmax.f32 %v2117_v1, 0.0  ;;  %v3989_v10 = vpack.c.bf16 %v2412_v2, %v2412_v2  ;;  %v2413_v12 = vmax.f32 %v2217_v3, 0.0  ;;  %v4200_v1 = vpop.f32.mrb[78].mxu0  ;;  %v4300_v3 = vpop.f32.mrb[78].mxu1 }
 0x17f   :  { %3295 = vst.msk [vmem:[%s6060_s4 + $0x118] sm:$0xf] %vm3224_vm3, %v3891_v4  ;;  %v3892_v14 = vpack.c.bf16 %v2315_v5, %v2315_v5  ;;  %3395 = vst.msk [vmem:[%s6060_s4 + $0x2a8] sm:$0xf] %vm3224_vm3, %v3991_v6  ;;  %v3992_v15 = vpack.c.bf16 %v2415_v7, %v2415_v7  ;;  %v1919_v16 = vmul.f32 %v5367_v46, %v4195_v11  ;;  %v1362_v6 = vpop.f32.mrb[79].mxu0 }
 0x180   :  { %v2019_v18 = vmul.f32 %v5367_v46, %v4295_v13  ;;  %3293 = vst.msk [vmem:[%s6060_s4 + $0x110] sm:$0xf] %vm3224_vm3, %v3889_v8  ;;  %v3890_v20 = vpack.c.bf16 %v2313_v9, %v2313_v9  ;;  %3393 = vst.msk [vmem:[%s6060_s4 + $0x2a0] sm:$0xf] %vm3224_vm3, %v3989_v10  ;;  %v3990_v21 = vpack.c.bf16 %v2413_v12, %v2413_v12  ;;  %v1762_v9 = vpop.f32.mrb[79].mxu1 }
 0x181   :  { %v1917_v22 = vmul.f32 %v5367_v46, %v1343_v17  ;;  %v2017_v24 = vmul.f32 %v5367_v46, %v1743_v19  ;;  %3296 = vst.msk [vmem:[%s6060_s4 + $0x11c] sm:$0xf] %vm3224_vm3, %v3892_v14  ;;  %3396 = vst.msk [vmem:[%s6060_s4 + $0x2ac] sm:$0xf] %vm3224_vm3, %v3992_v15  ;;  %v2122_v26 = vadd.f32 %v5392_v57, %v1919_v16 }
 0x182   :  { %v1920_v27 = vmul.f32 %v5367_v46, %v4196_v23  ;;  %v2222_v29 = vadd.f32 %v5392_v57, %v2019_v18  ;;  %v2020_v30 = vmul.f32 %v5367_v46, %v4296_v25  ;;  %3294 = vst.msk [vmem:[%s6060_s4 + $0x114] sm:$0xf] %vm3224_vm3, %v3890_v20  ;;  %3394 = vst.msk [vmem:[%s6060_s4 + $0x2a4] sm:$0xf] %vm3224_vm3, %v3990_v21 }
 0x183   :  { %v2120_v32 = vadd.f32 %v5392_v57, %v1917_v22  ;;  %v1918_v33 = vmul.f32 %v5367_v46, %v1346_v28  ;;  %v2220_v34 = vadd.f32 %v5392_v57, %v2017_v24  ;;  %v2018_v35 = vmul.f32 %v5367_v46, %v1746_v31  ;;  %v4303_v31 = vpop.f32.mrb[80].mxu1 }
 0x184   :  { %v2318_v36 = vmax.f32 %v2122_v26, 0.0  ;;  %v2123_v37 = vadd.f32 %v5392_v57, %v1920_v27  ;;  %v2418_v38 = vmax.f32 %v2222_v29, 0.0  ;;  %v2223_v39 = vadd.f32 %v5392_v57, %v2020_v30  ;;  %v4203_v29 = vpop.f32.mrb[80].mxu0 }
 0x185   :  { %v2316_v41 = vmax.f32 %v2120_v32, 0.0  ;;  %v2121_v40 = vadd.f32 %v5392_v57, %v1918_v33  ;;  %v2416_v43 = vmax.f32 %v2220_v34, 0.0  ;;  %v2221_v44 = vadd.f32 %v5392_v57, %v2018_v35  ;;  %v1375_v35 = vpop.f32.mrb[81].mxu0 }
 0x186   :  { %v3895_v45 = vpack.c.bf16 %v2318_v36, %v2318_v36  ;;  %v2319_v42 = vmax.f32 %v2123_v37, 0.0  ;;  %v3995_v47 = vpack.c.bf16 %v2418_v38, %v2418_v38  ;;  %v2419_v48 = vmax.f32 %v2223_v39, 0.0  ;;  %v1775_v37 = vpop.f32.mrb[81].mxu1 }
 0x187   :  { %v3893_v49 = vpack.c.bf16 %v2316_v41, %v2316_v41  ;;  %v2317_v50 = vmax.f32 %v2121_v40, 0.0  ;;  %v3993_v51 = vpack.c.bf16 %v2416_v43, %v2416_v43  ;;  %v2417_v53 = vmax.f32 %v2221_v44, 0.0  ;;  %v4204_v40 = vpop.f32.mrb[82].mxu0  ;;  %v4304_v44 = vpop.f32.mrb[82].mxu1 }
 0x188   :  { %3299 = vst.msk [vmem:[%s6060_s4 + $0x128] sm:$0xf] %vm3224_vm3, %v3895_v45  ;;  %v3896_v55 = vpack.c.bf16 %v2319_v42, %v2319_v42  ;;  %3399 = vst.msk [vmem:[%s6060_s4 + $0x2b8] sm:$0xf] %vm3224_vm3, %v3995_v47  ;;  %v3996_v56 = vpack.c.bf16 %v2419_v48, %v2419_v48  ;;  %v1923_v58 = vmul.f32 %v5367_v46, %v4199_v52  ;;  %v1378_v47 = vpop.f32.mrb[83].mxu0 }
 0x189   :  { %v2023_v60 = vmul.f32 %v5367_v46, %v4299_v54  ;;  %3297 = vst.msk [vmem:[%s6060_s4 + $0x120] sm:$0xf] %vm3224_vm3, %v3893_v49  ;;  %v3894_v62 = vpack.c.bf16 %v2317_v50, %v2317_v50  ;;  %3397 = vst.msk [vmem:[%s6060_s4 + $0x2b0] sm:$0xf] %vm3224_vm3, %v3993_v51  ;;  %v3994_v63 = vpack.c.bf16 %v2417_v53, %v2417_v53  ;;  %v1778_v50 = vpop.f32.mrb[83].mxu1 }
 0x18a   :  { %v1921_v0 = vmul.f32 %v5367_v46, %v1359_v59  ;;  %v2021_v2 = vmul.f32 %v5367_v46, %v1759_v61  ;;  %3300 = vst.msk [vmem:[%s6060_s4 + $0x12c] sm:$0xf] %vm3224_vm3, %v3896_v55  ;;  %3400 = vst.msk [vmem:[%s6060_s4 + $0x2bc] sm:$0xf] %vm3224_vm3, %v3996_v56  ;;  %v2126_v4 = vadd.f32 %v5392_v57, %v1923_v58 }
 0x18b   :  { %v1924_v5 = vmul.f32 %v5367_v46, %v4200_v1  ;;  %v2226_v7 = vadd.f32 %v5392_v57, %v2023_v60  ;;  %v2024_v8 = vmul.f32 %v5367_v46, %v4300_v3  ;;  %3298 = vst.msk [vmem:[%s6060_s4 + $0x124] sm:$0xf] %vm3224_vm3, %v3894_v62  ;;  %3398 = vst.msk [vmem:[%s6060_s4 + $0x2b4] sm:$0xf] %vm3224_vm3, %v3994_v63 }
 0x18c   :  { %v2124_v10 = vadd.f32 %v5392_v57, %v1921_v0  ;;  %v1922_v11 = vmul.f32 %v5367_v46, %v1362_v6  ;;  %v2224_v12 = vadd.f32 %v5392_v57, %v2021_v2  ;;  %v2022_v13 = vmul.f32 %v5367_v46, %v1762_v9  ;;  %v4307_v9 = vpop.f32.mrb[84].mxu1 }
 0x18d   :  { %v2322_v14 = vmax.f32 %v2126_v4, 0.0  ;;  %v2127_v15 = vadd.f32 %v5392_v57, %v1924_v5  ;;  %v2422_v16 = vmax.f32 %v2226_v7, 0.0  ;;  %v2227_v17 = vadd.f32 %v5392_v57, %v2024_v8  ;;  %v4207_v7 = vpop.f32.mrb[84].mxu0 }
 0x18e   :  { %v2320_v18 = vmax.f32 %v2124_v10, 0.0  ;;  %v2125_v19 = vadd.f32 %v5392_v57, %v1922_v11  ;;  %v2420_v20 = vmax.f32 %v2224_v12, 0.0  ;;  %v2225_v21 = vadd.f32 %v5392_v57, %v2022_v13  ;;  %v1391_v13 = vpop.f32.mrb[85].mxu0 }
 0x18f   :  { %v3899_v22 = vpack.c.bf16 %v2322_v14, %v2322_v14  ;;  %v2323_v23 = vmax.f32 %v2127_v15, 0.0  ;;  %v3999_v24 = vpack.c.bf16 %v2422_v16, %v2422_v16  ;;  %v2423_v25 = vmax.f32 %v2227_v17, 0.0  ;;  %v1791_v15 = vpop.f32.mrb[85].mxu1 }
 0x190   :  { %v3897_v26 = vpack.c.bf16 %v2320_v18, %v2320_v18  ;;  %v2321_v27 = vmax.f32 %v2125_v19, 0.0  ;;  %v3997_v28 = vpack.c.bf16 %v2420_v20, %v2420_v20  ;;  %v2421_v30 = vmax.f32 %v2225_v21, 0.0  ;;  %v4208_v19 = vpop.f32.mrb[86].mxu0  ;;  %v4308_v21 = vpop.f32.mrb[86].mxu1 }
 0x191   :  { %3303 = vst.msk [vmem:[%s6060_s4 + $0x138] sm:$0xf] %vm3224_vm3, %v3899_v22  ;;  %v3900_v32 = vpack.c.bf16 %v2323_v23, %v2323_v23  ;;  %3403 = vst.msk [vmem:[%s6060_s4 + $0x2c8] sm:$0xf] %vm3224_vm3, %v3999_v24  ;;  %v4000_v33 = vpack.c.bf16 %v2423_v25, %v2423_v25  ;;  %v1927_v34 = vmul.f32 %v5367_v46, %v4203_v29  ;;  %v1394_v24 = vpop.f32.mrb[87].mxu0 }
 0x192   :  { %v2027_v36 = vmul.f32 %v5367_v46, %v4303_v31  ;;  %3301 = vst.msk [vmem:[%s6060_s4 + $0x130] sm:$0xf] %vm3224_vm3, %v3897_v26  ;;  %v3898_v38 = vpack.c.bf16 %v2321_v27, %v2321_v27  ;;  %3401 = vst.msk [vmem:[%s6060_s4 + $0x2c0] sm:$0xf] %vm3224_vm3, %v3997_v28  ;;  %v3998_v39 = vpack.c.bf16 %v2421_v30, %v2421_v30  ;;  %v1794_v27 = vpop.f32.mrb[87].mxu1 }
 0x193   :  { %v1925_v41 = vmul.f32 %v5367_v46, %v1375_v35  ;;  %v2025_v43 = vmul.f32 %v5367_v46, %v1775_v37  ;;  %3304 = vst.msk [vmem:[%s6060_s4 + $0x13c] sm:$0xf] %vm3224_vm3, %v3900_v32  ;;  %3404 = vst.msk [vmem:[%s6060_s4 + $0x2cc] sm:$0xf] %vm3224_vm3, %v4000_v33  ;;  %v2130_v45 = vadd.f32 %v5392_v57, %v1927_v34 }
 0x194   :  { %v1928_v42 = vmul.f32 %v5367_v46, %v4204_v40  ;;  %v2230_v48 = vadd.f32 %v5392_v57, %v2027_v36  ;;  %v2028_v49 = vmul.f32 %v5367_v46, %v4304_v44  ;;  %3302 = vst.msk [vmem:[%s6060_s4 + $0x134] sm:$0xf] %vm3224_vm3, %v3898_v38  ;;  %3402 = vst.msk [vmem:[%s6060_s4 + $0x2c4] sm:$0xf] %vm3224_vm3, %v3998_v39 }
 0x195   :  { %v2128_v51 = vadd.f32 %v5392_v57, %v1925_v41  ;;  %v1926_v52 = vmul.f32 %v5367_v46, %v1378_v47  ;;  %v2228_v53 = vadd.f32 %v5392_v57, %v2025_v43  ;;  %v2026_v54 = vmul.f32 %v5367_v46, %v1778_v50 }
 0x196   :  { %v2326_v55 = vmax.f32 %v2130_v45, 0.0  ;;  %v2131_v56 = vadd.f32 %v5392_v57, %v1928_v42  ;;  %v2426_v58 = vmax.f32 %v2230_v48, 0.0  ;;  %v2231_v59 = vadd.f32 %v5392_v57, %v2028_v49  ;;  %v4311_v49 = vpop.f32.mrb[88].mxu1 }
 0x197   :  { %v2324_v60 = vmax.f32 %v2128_v51, 0.0  ;;  %v2129_v61 = vadd.f32 %v5392_v57, %v1926_v52  ;;  %v2424_v62 = vmax.f32 %v2228_v53, 0.0  ;;  %v2229_v63 = vadd.f32 %v5392_v57, %v2026_v54  ;;  %v5905_v51 = vld [vmem:[%s6058_s2] ss:$0 sm:$0xff] }
 0x198   :  { %v3903_v0 = vpack.c.bf16 %v2326_v55, %v2326_v55  ;;  %v2327_v1 = vmax.f32 %v2131_v56, 0.0  ;;  %v4003_v2 = vpack.c.bf16 %v2426_v58, %v2426_v58  ;;  %v2427_v3 = vmax.f32 %v2231_v59, 0.0  ;;  %v1807_v55 = vpop.f32.mrb[89].mxu1 }
 0x199   :  { %v3901_v4 = vpack.c.bf16 %v2324_v60, %v2324_v60  ;;  %v2325_v5 = vmax.f32 %v2129_v61, 0.0  ;;  %v4001_v6 = vpack.c.bf16 %v2424_v62, %v2424_v62  ;;  %v2425_v8 = vmax.f32 %v2229_v63, 0.0  ;;  %v4312_v62 = vpop.f32.mrb[90].mxu1  ;;  %v5930_v63 = vld [vmem:[%s6059_s3] ss:$0 sm:$0xff] }
 0x19a   :  { %3307 = vst.msk [vmem:[%s6060_s4 + $0x148] sm:$0xf] %vm3224_vm3, %v3903_v0  ;;  %v3904_v10 = vpack.c.bf16 %v2327_v1, %v2327_v1  ;;  %3407 = vst.msk [vmem:[%s6060_s4 + $0x2d8] sm:$0xf] %vm3224_vm3, %v4003_v2  ;;  %v4004_v11 = vpack.c.bf16 %v2427_v3, %v2427_v3  ;;  %v1931_v12 = vmul.f32 %v5367_v46, %v4207_v7 }
 0x19b   :  { %v2031_v14 = vmul.f32 %v5367_v46, %v4307_v9  ;;  %3305 = vst.msk [vmem:[%s6060_s4 + $0x140] sm:$0xf] %vm3224_vm3, %v3901_v4  ;;  %v3902_v16 = vpack.c.bf16 %v2325_v5, %v2325_v5  ;;  %3405 = vst.msk [vmem:[%s6060_s4 + $0x2d0] sm:$0xf] %vm3224_vm3, %v4001_v6  ;;  %v4002_v17 = vpack.c.bf16 %v2425_v8, %v2425_v8  ;;  %v1810_v5 = vpop.f32.mrb[91].mxu1 }
 0x19c   :  { %v1929_v18 = vmul.f32 %v5367_v46, %v1391_v13  ;;  %v2029_v20 = vmul.f32 %v5367_v46, %v1791_v15  ;;  %3308 = vst.msk [vmem:[%s6060_s4 + $0x14c] sm:$0xf] %vm3224_vm3, %v3904_v10  ;;  %3408 = vst.msk [vmem:[%s6060_s4 + $0x2dc] sm:$0xf] %vm3224_vm3, %v4004_v11  ;;  %v2134_v22 = vadd.f32 %v5392_v57, %v1931_v12 }
 0x19d   :  { %v1932_v23 = vmul.f32 %v5367_v46, %v4208_v19  ;;  %v2234_v25 = vadd.f32 %v5392_v57, %v2031_v14  ;;  %v2032_v26 = vmul.f32 %v5367_v46, %v4308_v21  ;;  %3306 = vst.msk [vmem:[%s6060_s4 + $0x144] sm:$0xf] %vm3224_vm3, %v3902_v16  ;;  %3406 = vst.msk [vmem:[%s6060_s4 + $0x2d4] sm:$0xf] %vm3224_vm3, %v4002_v17 }
 0x19e   :  { %v2132_v28 = vadd.f32 %v5392_v57, %v1929_v18  ;;  %v1930_v29 = vmul.f32 %v5367_v46, %v1394_v24  ;;  %v2232_v30 = vadd.f32 %v5392_v57, %v2029_v20  ;;  %v2030_v31 = vmul.f32 %v5367_v46, %v1794_v27  ;;  %v4211_v46 = vpop.f32.mrb[88].mxu0  ;;  %v4315_v27 = vpop.f32.mrb[92].mxu1 }
 0x19f   :  { %v2330_v32 = vmax.f32 %v2134_v22, 0.0  ;;  %v2135_v33 = vadd.f32 %v5392_v57, %v1932_v23  ;;  %v2430_v34 = vmax.f32 %v2234_v25, 0.0  ;;  %v2235_v35 = vadd.f32 %v5392_v57, %v2032_v26  ;;  %v1407_v53 = vpop.f32.mrb[89].mxu0 }
 0x1a0   :  { %v2328_v36 = vmax.f32 %v2132_v28, 0.0  ;;  %v2133_v37 = vadd.f32 %v5392_v57, %v1930_v29  ;;  %v2428_v38 = vmax.f32 %v2232_v30, 0.0  ;;  %v2233_v39 = vadd.f32 %v5392_v57, %v2030_v31  ;;  %v4212_v60 = vpop.f32.mrb[90].mxu0 }
 0x1a1   :  { %v3907_v41 = vpack.c.bf16 %v2330_v32, %v2330_v32  ;;  %v2331_v40 = vmax.f32 %v2135_v33, 0.0  ;;  %v4007_v43 = vpack.c.bf16 %v2430_v34, %v2430_v34  ;;  %v2431_v44 = vmax.f32 %v2235_v35, 0.0  ;;  %v1410_v2 = vpop.f32.mrb[91].mxu0  ;;  %v1823_v33 = vpop.f32.mrb[93].mxu1 }
 0x1a2   :  { %v3905_v45 = vpack.c.bf16 %v2328_v36, %v2328_v36  ;;  %v2329_v42 = vmax.f32 %v2133_v37, 0.0  ;;  %v4005_v47 = vpack.c.bf16 %v2428_v38, %v2428_v38  ;;  %v2429_v48 = vmax.f32 %v2233_v39, 0.0  ;;  %v4215_v25 = vpop.f32.mrb[92].mxu0  ;;  %v4316_v39 = vpop.f32.mrb[94].mxu1 }
 0x1a3   :  { %3311 = vst.msk [vmem:[%s6060_s4 + $0x158] sm:$0xf] %vm3224_vm3, %v3907_v41  ;;  %v3908_v50 = vpack.c.bf16 %v2331_v40, %v2331_v40  ;;  %3411 = vst.msk [vmem:[%s6060_s4 + $0x2e8] sm:$0xf] %vm3224_vm3, %v4007_v43  ;;  %v4008_v57 = vpack.c.bf16 %v2431_v44, %v2431_v44  ;;  %v1935_v52 = vmul.f32 %v5905_v51, %v4211_v46  ;;  %v1423_v31 = vpop.f32.mrb[93].mxu0 }
 0x1a4   :  { %v2035_v54 = vmul.f32 %v5905_v51, %v4311_v49  ;;  %3309 = vst.msk [vmem:[%s6060_s4 + $0x150] sm:$0xf] %vm3224_vm3, %v3905_v45  ;;  %v3906_v56 = vpack.c.bf16 %v2329_v42, %v2329_v42  ;;  %3409 = vst.msk [vmem:[%s6060_s4 + $0x2e0] sm:$0xf] %vm3224_vm3, %v4005_v47  ;;  %v4006_v58 = vpack.c.bf16 %v2429_v48, %v2429_v48  ;;  %v4216_v37 = vpop.f32.mrb[94].mxu0  ;;  %v1826_v42 = vpop.f32.mrb[95].mxu1 }
 0x1a5   :  { %v1933_v59 = vmul.f32 %v5905_v51, %v1407_v53  ;;  %v2033_v61 = vmul.f32 %v5905_v51, %v1807_v55  ;;  %3312 = vst.msk [vmem:[%s6060_s4 + $0x15c] sm:$0xf] %vm3224_vm3, %v3908_v50  ;;  %3412 = vst.msk [vmem:[%s6060_s4 + $0x2ec] sm:$0xf] %vm3224_vm3, %v4008_v57  ;;  %v2138_v0 = vadd.f32 %v5930_v63, %v1935_v52  ;;  %v1426_v43 = vpop.f32.mrb[95].mxu0 }
 0x1a6   :  { %v1936_v1 = vmul.f32 %v5905_v51, %v4212_v60  ;;  %v2238_v3 = vadd.f32 %v5930_v63, %v2035_v54  ;;  %v2036_v4 = vmul.f32 %v5905_v51, %v4312_v62  ;;  %3310 = vst.msk [vmem:[%s6060_s4 + $0x154] sm:$0xf] %vm3224_vm3, %v3906_v56  ;;  %3410 = vst.msk [vmem:[%s6060_s4 + $0x2e4] sm:$0xf] %vm3224_vm3, %v4006_v58 }
 0x1a7   :  { %v2136_v6 = vadd.f32 %v5930_v63, %v1933_v59  ;;  %v1934_v7 = vmul.f32 %v5905_v51, %v1410_v2  ;;  %v2236_v8 = vadd.f32 %v5930_v63, %v2033_v61  ;;  %v2034_v9 = vmul.f32 %v5905_v51, %v1810_v5 }
 0x1a8   :  { %v2334_v10 = vmax.f32 %v2138_v0, 0.0  ;;  %v2139_v11 = vadd.f32 %v5930_v63, %v1936_v1  ;;  %v2434_v12 = vmax.f32 %v2238_v3, 0.0  ;;  %v2239_v13 = vadd.f32 %v5930_v63, %v2036_v4  ;;  %v4219_v3 = vpop.f32.mrb[96].mxu0 }
 0x1a9   :  { %v2332_v14 = vmax.f32 %v2136_v6, 0.0  ;;  %v2137_v15 = vadd.f32 %v5930_v63, %v1934_v7  ;;  %v2432_v16 = vmax.f32 %v2236_v8, 0.0  ;;  %v2237_v17 = vadd.f32 %v5930_v63, %v2034_v9  ;;  %v1439_v8 = vpop.f32.mrb[97].mxu0 }
 0x1aa   :  { %v3911_v18 = vpack.c.bf16 %v2334_v10, %v2334_v10  ;;  %v2335_v19 = vmax.f32 %v2139_v11, 0.0  ;;  %v4011_v20 = vpack.c.bf16 %v2434_v12, %v2434_v12  ;;  %v2435_v21 = vmax.f32 %v2239_v13, 0.0  ;;  %v4220_v12 = vpop.f32.mrb[98].mxu0 }
 0x1ab   :  { %v3909_v22 = vpack.c.bf16 %v2332_v14, %v2332_v14  ;;  %v2333_v23 = vmax.f32 %v2137_v15, 0.0  ;;  %v4009_v24 = vpack.c.bf16 %v2432_v16, %v2432_v16  ;;  %v2433_v26 = vmax.f32 %v2237_v17, 0.0  ;;  %v1442_v15 = vpop.f32.mrb[99].mxu0 }
 0x1ac   :  { %3315 = vst.msk [vmem:[%s6060_s4 + $0x168] sm:$0xf] %vm3224_vm3, %v3911_v18  ;;  %v3912_v28 = vpack.c.bf16 %v2335_v19, %v2335_v19  ;;  %3415 = vst.msk [vmem:[%s6060_s4 + $0x2f8] sm:$0xf] %vm3224_vm3, %v4011_v20  ;;  %v4012_v29 = vpack.c.bf16 %v2435_v21, %v2435_v21  ;;  %v1939_v30 = vmul.f32 %v5905_v51, %v4215_v25 }
 0x1ad   :  { %v2039_v32 = vmul.f32 %v5905_v51, %v4315_v27  ;;  %3313 = vst.msk [vmem:[%s6060_s4 + $0x160] sm:$0xf] %vm3224_vm3, %v3909_v22  ;;  %v3910_v34 = vpack.c.bf16 %v2333_v23, %v2333_v23  ;;  %3413 = vst.msk [vmem:[%s6060_s4 + $0x2f0] sm:$0xf] %vm3224_vm3, %v4009_v24  ;;  %v4010_v35 = vpack.c.bf16 %v2433_v26, %v2433_v26 }
 0x1ae   :  { %v1937_v36 = vmul.f32 %v5905_v51, %v1423_v31  ;;  %v2037_v38 = vmul.f32 %v5905_v51, %v1823_v33  ;;  %3316 = vst.msk [vmem:[%s6060_s4 + $0x16c] sm:$0xf] %vm3224_vm3, %v3912_v28  ;;  %3416 = vst.msk [vmem:[%s6060_s4 + $0x2fc] sm:$0xf] %vm3224_vm3, %v4012_v29  ;;  %v2142_v41 = vadd.f32 %v5930_v63, %v1939_v30 }
 0x1af   :  { %v1940_v40 = vmul.f32 %v5905_v51, %v4216_v37  ;;  %v2242_v44 = vadd.f32 %v5930_v63, %v2039_v32  ;;  %v2040_v45 = vmul.f32 %v5905_v51, %v4316_v39  ;;  %3314 = vst.msk [vmem:[%s6060_s4 + $0x164] sm:$0xf] %vm3224_vm3, %v3910_v34  ;;  %3414 = vst.msk [vmem:[%s6060_s4 + $0x2f4] sm:$0xf] %vm3224_vm3, %v4010_v35 }
 0x1b0   :  { %v2140_v47 = vadd.f32 %v5930_v63, %v1937_v36  ;;  %v1938_v46 = vmul.f32 %v5905_v51, %v1426_v43  ;;  %v2240_v48 = vadd.f32 %v5930_v63, %v2037_v38  ;;  %v2038_v49 = vmul.f32 %v5905_v51, %v1826_v42 }
 0x1b1   :  { %v2338_v50 = vmax.f32 %v2142_v41, 0.0  ;;  %v2143_v57 = vadd.f32 %v5930_v63, %v1940_v40  ;;  %v2438_v52 = vmax.f32 %v2242_v44, 0.0  ;;  %v2243_v53 = vadd.f32 %v5930_v63, %v2040_v45 }
 0x1b2   :  { %v2336_v54 = vmax.f32 %v2140_v47, 0.0  ;;  %v2141_v55 = vadd.f32 %v5930_v63, %v1938_v46  ;;  %v2436_v56 = vmax.f32 %v2240_v48, 0.0  ;;  %v2241_v58 = vadd.f32 %v5930_v63, %v2038_v49 }
 0x1b3   :  { %v3915_v59 = vpack.c.bf16 %v2338_v50, %v2338_v50  ;;  %v2339_v60 = vmax.f32 %v2143_v57, 0.0  ;;  %v4015_v61 = vpack.c.bf16 %v2438_v52, %v2438_v52  ;;  %v2439_v62 = vmax.f32 %v2243_v53, 0.0 }
 0x1b4   :  { %v3913_v0 = vpack.c.bf16 %v2336_v54, %v2336_v54  ;;  %v2337_v1 = vmax.f32 %v2141_v55, 0.0  ;;  %v4013_v2 = vpack.c.bf16 %v2436_v56, %v2436_v56  ;;  %v2437_v4 = vmax.f32 %v2241_v58, 0.0 }
 0x1b5   :  { %3319 = vst.msk [vmem:[%s6060_s4 + $0x178] sm:$0xf] %vm3224_vm3, %v3915_v59  ;;  %v3916_v5 = vpack.c.bf16 %v2339_v60, %v2339_v60  ;;  %3419 = vst.msk [vmem:[%s6060_s4 + $0x308] sm:$0xf] %vm3224_vm3, %v4015_v61  ;;  %v4016_v6 = vpack.c.bf16 %v2439_v62, %v2439_v62  ;;  %v1943_v7 = vmul.f32 %v5905_v51, %v4219_v3 }
 0x1b6   :  { %3317 = vst.msk [vmem:[%s6060_s4 + $0x170] sm:$0xf] %vm3224_vm3, %v3913_v0  ;;  %v3914_v9 = vpack.c.bf16 %v2337_v1, %v2337_v1  ;;  %3417 = vst.msk [vmem:[%s6060_s4 + $0x300] sm:$0xf] %vm3224_vm3, %v4013_v2  ;;  %v4014_v10 = vpack.c.bf16 %v2437_v4, %v2437_v4  ;;  %v1941_v11 = vmul.f32 %v5905_v51, %v1439_v8 }
 0x1b7   :  { %3320 = vst.msk [vmem:[%s6060_s4 + $0x17c] sm:$0xf] %vm3224_vm3, %v3916_v5  ;;  %3420 = vst.msk [vmem:[%s6060_s4 + $0x30c] sm:$0xf] %vm3224_vm3, %v4016_v6  ;;  %v2146_v13 = vadd.f32 %v5930_v63, %v1943_v7  ;;  %v1944_v14 = vmul.f32 %v5905_v51, %v4220_v12  ;;  %v1942_v17 = vmul.f32 %v5905_v51, %v1442_v15 }
 0x1b8   :  { %3318 = vst.msk [vmem:[%s6060_s4 + $0x174] sm:$0xf] %vm3224_vm3, %v3914_v9  ;;  %3418 = vst.msk [vmem:[%s6060_s4 + $0x304] sm:$0xf] %vm3224_vm3, %v4014_v10  ;;  %v2144_v16 = vadd.f32 %v5930_v63, %v1941_v11 }
 0x1b9   :  { %v2342_v18 = vmax.f32 %v2146_v13, 0.0  ;;  %v2147_v19 = vadd.f32 %v5930_v63, %v1944_v14  ;;  %v2145_v21 = vadd.f32 %v5930_v63, %v1942_v17 }
 0x1ba   :  { %v2340_v20 = vmax.f32 %v2144_v16, 0.0 }
 0x1bb   :  { %v3919_v22 = vpack.c.bf16 %v2342_v18, %v2342_v18  ;;  %v2343_v23 = vmax.f32 %v2147_v19, 0.0  ;;  %v2341_v25 = vmax.f32 %v2145_v21, 0.0 }
 0x1bc   :  { %v3917_v24 = vpack.c.bf16 %v2340_v20, %v2340_v20 }
 0x1bd   :  { %3323 = vst.msk [vmem:[%s6060_s4 + $0x188] sm:$0xf] %vm3224_vm3, %v3919_v22  ;;  %v3920_v26 = vpack.c.bf16 %v2343_v23, %v2343_v23  ;;  %v3918_v51 = vpack.c.bf16 %v2341_v25, %v2341_v25 }
 0x1be   :  { %3321 = vst.msk [vmem:[%s6060_s4 + $0x180] sm:$0xf] %vm3224_vm3, %v3917_v24 }
 0x1bf   :  { %3324 = vst.msk [vmem:[%s6060_s4 + $0x18c] sm:$0xf] %vm3224_vm3, %v3920_v26  ;;  %3322 = vst.msk [vmem:[%s6060_s4 + $0x184] sm:$0xf] %vm3224_vm3, %v3918_v51 }

// kernel: cnn_forward.9
= control target key start
LH: loop header
LB: loop body
LE: loop exit
PB: predicated region body
PF: predicated region fallthrough
CT: control target
= control target key end

     0   :  { %s357_s10 = smov 112   ;;  %vm302_vm0 = vcmask 125952   ;;  %s956_s0 = inlined_call_operand.vmem [shape: bf16[392,32], index: 0, kind: input, shape index: {}]   ;;  %s957_s1 = inlined_call_operand.vmem [shape: bf16[392,16], index: 1, kind: output, shape index: {}]  }
   0x1   :  { %v371_v0 = vld [vmem:[%s956_s0] sm:$0xf]  ;;  %v376_v1 = vld [vmem:[%s956_s0 + $0x8] sm:$0xf]  ;;  %v385_v2 = vld [vmem:[%s956_s0 + $0x4] sm:$0xf] }
   0x2   :  { %106 = vrot.lane.b32.xlu0 %v371_v0, %s357_s10  ;;  %110 = vrot.lane.b32.xlu1 %v376_v1, %s357_s10  ;;  %v390_v3 = vld [vmem:[%s956_s0 + $0xc] sm:$0xf]  ;;  %v399_v4 = vld [vmem:[%s956_s0 + $0x10] sm:$0xf] }
   0x3   :  { %v404_v5 = vld [vmem:[%s956_s0 + $0x14] sm:$0xf]  ;;  %v413_v6 = vld [vmem:[%s956_s0 + $0x18] sm:$0xf]  ;;  %v418_v7 = vld [vmem:[%s956_s0 + $0x1c] sm:$0xf] }
   0x4   :  { %v427_v8 = vld [vmem:[%s956_s0 + $0x20] sm:$0xf]  ;;  %v432_v9 = vld [vmem:[%s956_s0 + $0x24] sm:$0xf]  ;;  %v441_v10 = vld [vmem:[%s956_s0 + $0x28] sm:$0xf] }
   0x5   :  { %v446_v11 = vld [vmem:[%s956_s0 + $0x2c] sm:$0xf]  ;;  %v455_v12 = vld [vmem:[%s956_s0 + $0x30] sm:$0xf]  ;;  %v460_v13 = vld [vmem:[%s956_s0 + $0x34] sm:$0xf] }
   0x6   :  { %108 = vrot.lane.b32.xlu0 %v385_v2, %s357_s10  ;;  %112 = vrot.lane.b32.xlu1 %v390_v3, %s357_s10  ;;  %v469_v14 = vld [vmem:[%s956_s0 + $0x38] sm:$0xf]  ;;  %v474_v15 = vld [vmem:[%s956_s0 + $0x3c] sm:$0xf] }
   0x7   :  { %v483_v16 = vld [vmem:[%s956_s0 + $0x40] sm:$0xf]  ;;  %v488_v17 = vld [vmem:[%s956_s0 + $0x44] sm:$0xf]  ;;  %v497_v18 = vld [vmem:[%s956_s0 + $0x48] sm:$0xf] }
   0x8   :  { %v502_v19 = vld [vmem:[%s956_s0 + $0x4c] sm:$0xf]  ;;  %v511_v20 = vld [vmem:[%s956_s0 + $0x50] sm:$0xf]  ;;  %v516_v21 = vld [vmem:[%s956_s0 + $0x54] sm:$0xf] }
   0x9   :  { %v525_v22 = vld [vmem:[%s956_s0 + $0x58] sm:$0xf]  ;;  %v530_v23 = vld [vmem:[%s956_s0 + $0x5c] sm:$0xf]  ;;  %v539_v24 = vld [vmem:[%s956_s0 + $0x60] sm:$0xf] }
   0xa   :  { %114 = vrot.lane.b32.xlu0 %v399_v4, %s357_s10  ;;  %116 = vrot.lane.b32.xlu1 %v404_v5, %s357_s10  ;;  %v544_v25 = vld [vmem:[%s956_s0 + $0x64] sm:$0xf]  ;;  %v553_v26 = vld [vmem:[%s956_s0 + $0x68] sm:$0xf] }
   0xb   :  { %v558_v27 = vld [vmem:[%s956_s0 + $0x6c] sm:$0xf]  ;;  %v567_v28 = vld [vmem:[%s956_s0 + $0x70] sm:$0xf]  ;;  %v572_v29 = vld [vmem:[%s956_s0 + $0x74] sm:$0xf] }
   0xc   :  { %v581_v30 = vld [vmem:[%s956_s0 + $0x78] sm:$0xf]  ;;  %v586_v31 = vld [vmem:[%s956_s0 + $0x7c] sm:$0xf]  ;;  %v595_v32 = vld [vmem:[%s956_s0 + $0x80] sm:$0xf] }
   0xd   :  { %v600_v33 = vld [vmem:[%s956_s0 + $0x84] sm:$0xf]  ;;  %v609_v34 = vld [vmem:[%s956_s0 + $0x88] sm:$0xf]  ;;  %v614_v35 = vld [vmem:[%s956_s0 + $0x8c] sm:$0xf] }
   0xe   :  { %118 = vrot.lane.b32.xlu0 %v413_v6, %s357_s10  ;;  %120 = vrot.lane.b32.xlu1 %v418_v7, %s357_s10  ;;  %v623_v36 = vld [vmem:[%s956_s0 + $0x90] sm:$0xf]  ;;  %v628_v37 = vld [vmem:[%s956_s0 + $0x94] sm:$0xf] }
   0xf   :  { %v637_v38 = vld [vmem:[%s956_s0 + $0x98] sm:$0xf]  ;;  %v642_v39 = vld [vmem:[%s956_s0 + $0x9c] sm:$0xf]  ;;  %v651_v40 = vld [vmem:[%s956_s0 + $0xa0] sm:$0xf] }
  0x10   :  { %v656_v41 = vld [vmem:[%s956_s0 + $0xa4] sm:$0xf]  ;;  %v665_v42 = vld [vmem:[%s956_s0 + $0xa8] sm:$0xf]  ;;  %v670_v43 = vld [vmem:[%s956_s0 + $0xac] sm:$0xf] }
  0x11   :  { %v679_v44 = vld [vmem:[%s956_s0 + $0xb0] sm:$0xf]  ;;  %v684_v45 = vld [vmem:[%s956_s0 + $0xb4] sm:$0xf]  ;;  %v693_v46 = vld [vmem:[%s956_s0 + $0xb8] sm:$0xf] }
  0x12   :  { %122 = vrot.lane.b32.xlu0 %v427_v8, %s357_s10  ;;  %124 = vrot.lane.b32.xlu1 %v432_v9, %s357_s10  ;;  %v698_v47 = vld [vmem:[%s956_s0 + $0xbc] sm:$0xf]  ;;  %v707_v48 = vld [vmem:[%s956_s0 + $0xc0] sm:$0xf] }
  0x16   :  { %126 = vrot.lane.b32.xlu0 %v441_v10, %s357_s10  ;;  %128 = vrot.lane.b32.xlu1 %v446_v11, %s357_s10 }
  0x1a   :  { %130 = vrot.lane.b32.xlu0 %v455_v12, %s357_s10  ;;  %132 = vrot.lane.b32.xlu1 %v460_v13, %s357_s10 }
  0x1e   :  { %134 = vrot.lane.b32.xlu0 %v469_v14, %s357_s10  ;;  %136 = vrot.lane.b32.xlu1 %v474_v15, %s357_s10 }
  0x22   :  { %138 = vrot.lane.b32.xlu0 %v483_v16, %s357_s10  ;;  %140 = vrot.lane.b32.xlu1 %v488_v17, %s357_s10 }
  0x26   :  { %142 = vrot.lane.b32.xlu0 %v497_v18, %s357_s10  ;;  %144 = vrot.lane.b32.xlu1 %v502_v19, %s357_s10 }
  0x2a   :  { %146 = vrot.lane.b32.xlu0 %v511_v20, %s357_s10  ;;  %148 = vrot.lane.b32.xlu1 %v516_v21, %s357_s10 }
  0x2e   :  { %150 = vrot.lane.b32.xlu0 %v525_v22, %s357_s10  ;;  %152 = vrot.lane.b32.xlu1 %v530_v23, %s357_s10 }
  0x32   :  { %154 = vrot.lane.b32.xlu0 %v539_v24, %s357_s10  ;;  %156 = vrot.lane.b32.xlu1 %v544_v25, %s357_s10 }
  0x36   :  { %158 = vrot.lane.b32.xlu0 %v553_v26, %s357_s10  ;;  %160 = vrot.lane.b32.xlu1 %v558_v27, %s357_s10 }
  0x3a   :  { %162 = vrot.lane.b32.xlu0 %v567_v28, %s357_s10  ;;  %164 = vrot.lane.b32.xlu1 %v572_v29, %s357_s10 }
  0x3e   :  { %166 = vrot.lane.b32.xlu0 %v581_v30, %s357_s10  ;;  %168 = vrot.lane.b32.xlu1 %v586_v31, %s357_s10 }
  0x42   :  { %170 = vrot.lane.b32.xlu0 %v595_v32, %s357_s10  ;;  %172 = vrot.lane.b32.xlu1 %v600_v33, %s357_s10 }
  0x46   :  { %174 = vrot.lane.b32.xlu0 %v609_v34, %s357_s10  ;;  %176 = vrot.lane.b32.xlu1 %v614_v35, %s357_s10 }
  0x4a   :  { %178 = vrot.lane.b32.xlu0 %v623_v36, %s357_s10  ;;  %180 = vrot.lane.b32.xlu1 %v628_v37, %s357_s10 }
  0x4e   :  { %182 = vrot.lane.b32.xlu0 %v637_v38, %s357_s10  ;;  %184 = vrot.lane.b32.xlu1 %v642_v39, %s357_s10 }
  0x52   :  { %186 = vrot.lane.b32.xlu0 %v651_v40, %s357_s10  ;;  %188 = vrot.lane.b32.xlu1 %v656_v41, %s357_s10 }
  0x56   :  { %190 = vrot.lane.b32.xlu0 %v665_v42, %s357_s10  ;;  %192 = vrot.lane.b32.xlu1 %v670_v43, %s357_s10 }
  0x5a   :  { %194 = vrot.lane.b32.xlu0 %v679_v44, %s357_s10  ;;  %196 = vrot.lane.b32.xlu1 %v684_v45, %s357_s10 }
  0x5e   :  { %198 = vrot.lane.b32.xlu0 %v693_v46, %s357_s10  ;;  %200 = vrot.lane.b32.xlu1 %v698_v47, %s357_s10 }
  0x62   :  { %202 = vrot.lane.b32.xlu0 %v707_v48, %s357_s10 }
  0x74   :  { %v107_v49 = vpop.permute.xlu0 %106  ;;  %v111_v50 = vpop.permute.xlu1 %110 }
  0x75   :  { %v253_v51 = vmax.bf16 %v107_v49, %v371_v0  ;;  %v255_v52 = vmax.bf16 %v111_v50, %v376_v1 }
  0x77   :  { %303 = vst.msk [vmem:[%s957_s1] sm:$0xf] %vm302_vm0, %v253_v51  ;;  %305 = vst.msk [vmem:[%s957_s1 + $0x8] sm:$0xf] %vm302_vm0, %v255_v52 }
  0x78   :  { %v109_v53 = vpop.permute.xlu0 %108  ;;  %v113_v54 = vpop.permute.xlu1 %112 }
  0x79   :  { %v254_v55 = vmax.bf16 %v109_v53, %v385_v2  ;;  %v256_v56 = vmax.bf16 %v113_v54, %v390_v3 }
  0x7b   :  { %304 = vst.msk [vmem:[%s957_s1 + $0x4] sm:$0xf] %vm302_vm0, %v254_v55  ;;  %306 = vst.msk [vmem:[%s957_s1 + $0xc] sm:$0xf] %vm302_vm0, %v256_v56 }
  0x7c   :  { %v115_v57 = vpop.permute.xlu0 %114  ;;  %v117_v58 = vpop.permute.xlu1 %116 }
  0x7d   :  { %v257_v59 = vmax.bf16 %v115_v57, %v399_v4  ;;  %v258_v60 = vmax.bf16 %v117_v58, %v404_v5 }
  0x7f   :  { %307 = vst.msk [vmem:[%s957_s1 + $0x10] sm:$0xf] %vm302_vm0, %v257_v59  ;;  %308 = vst.msk [vmem:[%s957_s1 + $0x14] sm:$0xf] %vm302_vm0, %v258_v60 }
  0x80   :  { %v119_v61 = vpop.permute.xlu0 %118  ;;  %v121_v62 = vpop.permute.xlu1 %120 }
  0x81   :  { %v259_v63 = vmax.bf16 %v119_v61, %v413_v6  ;;  %v260_v0 = vmax.bf16 %v121_v62, %v418_v7 }
  0x83   :  { %309 = vst.msk [vmem:[%s957_s1 + $0x18] sm:$0xf] %vm302_vm0, %v259_v63  ;;  %310 = vst.msk [vmem:[%s957_s1 + $0x1c] sm:$0xf] %vm302_vm0, %v260_v0 }
  0x84   :  { %v123_v1 = vpop.permute.xlu0 %122  ;;  %v125_v2 = vpop.permute.xlu1 %124 }
  0x85   :  { %v261_v3 = vmax.bf16 %v123_v1, %v427_v8  ;;  %v262_v4 = vmax.bf16 %v125_v2, %v432_v9 }
  0x87   :  { %311 = vst.msk [vmem:[%s957_s1 + $0x20] sm:$0xf] %vm302_vm0, %v261_v3  ;;  %312 = vst.msk [vmem:[%s957_s1 + $0x24] sm:$0xf] %vm302_vm0, %v262_v4 }
  0x88   :  { %v127_v5 = vpop.permute.xlu0 %126  ;;  %v129_v6 = vpop.permute.xlu1 %128 }
  0x89   :  { %v263_v7 = vmax.bf16 %v127_v5, %v441_v10  ;;  %v264_v49 = vmax.bf16 %v129_v6, %v446_v11 }
  0x8b   :  { %313 = vst.msk [vmem:[%s957_s1 + $0x28] sm:$0xf] %vm302_vm0, %v263_v7  ;;  %314 = vst.msk [vmem:[%s957_s1 + $0x2c] sm:$0xf] %vm302_vm0, %v264_v49 }
  0x8c   :  { %v131_v8 = vpop.permute.xlu0 %130  ;;  %v133_v9 = vpop.permute.xlu1 %132 }
  0x8d   :  { %v265_v50 = vmax.bf16 %v131_v8, %v455_v12  ;;  %v266_v51 = vmax.bf16 %v133_v9, %v460_v13 }
  0x8f   :  { %315 = vst.msk [vmem:[%s957_s1 + $0x30] sm:$0xf] %vm302_vm0, %v265_v50  ;;  %316 = vst.msk [vmem:[%s957_s1 + $0x34] sm:$0xf] %vm302_vm0, %v266_v51 }
  0x90   :  { %v135_v10 = vpop.permute.xlu0 %134  ;;  %v137_v11 = vpop.permute.xlu1 %136 }
  0x91   :  { %v267_v52 = vmax.bf16 %v135_v10, %v469_v14  ;;  %v268_v53 = vmax.bf16 %v137_v11, %v474_v15 }
  0x93   :  { %317 = vst.msk [vmem:[%s957_s1 + $0x38] sm:$0xf] %vm302_vm0, %v267_v52  ;;  %318 = vst.msk [vmem:[%s957_s1 + $0x3c] sm:$0xf] %vm302_vm0, %v268_v53 }
  0x94   :  { %v139_v12 = vpop.permute.xlu0 %138  ;;  %v141_v13 = vpop.permute.xlu1 %140 }
  0x95   :  { %v269_v54 = vmax.bf16 %v139_v12, %v483_v16  ;;  %v270_v55 = vmax.bf16 %v141_v13, %v488_v17 }
  0x97   :  { %319 = vst.msk [vmem:[%s957_s1 + $0x40] sm:$0xf] %vm302_vm0, %v269_v54  ;;  %320 = vst.msk [vmem:[%s957_s1 + $0x44] sm:$0xf] %vm302_vm0, %v270_v55 }
  0x98   :  { %v143_v14 = vpop.permute.xlu0 %142  ;;  %v145_v15 = vpop.permute.xlu1 %144 }
  0x99   :  { %v271_v56 = vmax.bf16 %v143_v14, %v497_v18  ;;  %v272_v57 = vmax.bf16 %v145_v15, %v502_v19 }
  0x9b   :  { %321 = vst.msk [vmem:[%s957_s1 + $0x48] sm:$0xf] %vm302_vm0, %v271_v56  ;;  %322 = vst.msk [vmem:[%s957_s1 + $0x4c] sm:$0xf] %vm302_vm0, %v272_v57 }
  0x9c   :  { %v147_v16 = vpop.permute.xlu0 %146  ;;  %v149_v17 = vpop.permute.xlu1 %148 }
  0x9d   :  { %v273_v58 = vmax.bf16 %v147_v16, %v511_v20  ;;  %v274_v59 = vmax.bf16 %v149_v17, %v516_v21 }
  0x9f   :  { %323 = vst.msk [vmem:[%s957_s1 + $0x50] sm:$0xf] %vm302_vm0, %v273_v58  ;;  %324 = vst.msk [vmem:[%s957_s1 + $0x54] sm:$0xf] %vm302_vm0, %v274_v59 }
  0xa0   :  { %v151_v18 = vpop.permute.xlu0 %150  ;;  %v153_v19 = vpop.permute.xlu1 %152 }
  0xa1   :  { %v275_v60 = vmax.bf16 %v151_v18, %v525_v22  ;;  %v276_v61 = vmax.bf16 %v153_v19, %v530_v23 }
  0xa3   :  { %325 = vst.msk [vmem:[%s957_s1 + $0x58] sm:$0xf] %vm302_vm0, %v275_v60  ;;  %326 = vst.msk [vmem:[%s957_s1 + $0x5c] sm:$0xf] %vm302_vm0, %v276_v61 }
  0xa4   :  { %v155_v20 = vpop.permute.xlu0 %154  ;;  %v157_v21 = vpop.permute.xlu1 %156 }
  0xa5   :  { %v277_v62 = vmax.bf16 %v155_v20, %v539_v24  ;;  %v278_v63 = vmax.bf16 %v157_v21, %v544_v25 }
  0xa7   :  { %327 = vst.msk [vmem:[%s957_s1 + $0x60] sm:$0xf] %vm302_vm0, %v277_v62  ;;  %328 = vst.msk [vmem:[%s957_s1 + $0x64] sm:$0xf] %vm302_vm0, %v278_v63 }
  0xa8   :  { %v159_v22 = vpop.permute.xlu0 %158  ;;  %v161_v23 = vpop.permute.xlu1 %160 }
  0xa9   :  { %v279_v0 = vmax.bf16 %v159_v22, %v553_v26  ;;  %v280_v1 = vmax.bf16 %v161_v23, %v558_v27 }
  0xab   :  { %329 = vst.msk [vmem:[%s957_s1 + $0x68] sm:$0xf] %vm302_vm0, %v279_v0  ;;  %330 = vst.msk [vmem:[%s957_s1 + $0x6c] sm:$0xf] %vm302_vm0, %v280_v1 }
  0xac   :  { %v163_v24 = vpop.permute.xlu0 %162  ;;  %v165_v25 = vpop.permute.xlu1 %164 }
  0xad   :  { %v281_v2 = vmax.bf16 %v163_v24, %v567_v28  ;;  %v282_v3 = vmax.bf16 %v165_v25, %v572_v29 }
  0xaf   :  { %331 = vst.msk [vmem:[%s957_s1 + $0x70] sm:$0xf] %vm302_vm0, %v281_v2  ;;  %332 = vst.msk [vmem:[%s957_s1 + $0x74] sm:$0xf] %vm302_vm0, %v282_v3 }
  0xb0   :  { %v167_v26 = vpop.permute.xlu0 %166  ;;  %v169_v27 = vpop.permute.xlu1 %168 }
  0xb1   :  { %v283_v4 = vmax.bf16 %v167_v26, %v581_v30  ;;  %v284_v5 = vmax.bf16 %v169_v27, %v586_v31 }
  0xb3   :  { %333 = vst.msk [vmem:[%s957_s1 + $0x78] sm:$0xf] %vm302_vm0, %v283_v4  ;;  %334 = vst.msk [vmem:[%s957_s1 + $0x7c] sm:$0xf] %vm302_vm0, %v284_v5 }
  0xb4   :  { %v171_v28 = vpop.permute.xlu0 %170  ;;  %v173_v29 = vpop.permute.xlu1 %172 }
  0xb5   :  { %v285_v6 = vmax.bf16 %v171_v28, %v595_v32  ;;  %v286_v7 = vmax.bf16 %v173_v29, %v600_v33 }
  0xb7   :  { %335 = vst.msk [vmem:[%s957_s1 + $0x80] sm:$0xf] %vm302_vm0, %v285_v6  ;;  %336 = vst.msk [vmem:[%s957_s1 + $0x84] sm:$0xf] %vm302_vm0, %v286_v7 }
  0xb8   :  { %v175_v30 = vpop.permute.xlu0 %174  ;;  %v177_v31 = vpop.permute.xlu1 %176 }
  0xb9   :  { %v287_v49 = vmax.bf16 %v175_v30, %v609_v34  ;;  %v288_v8 = vmax.bf16 %v177_v31, %v614_v35 }
  0xbb   :  { %337 = vst.msk [vmem:[%s957_s1 + $0x88] sm:$0xf] %vm302_vm0, %v287_v49  ;;  %338 = vst.msk [vmem:[%s957_s1 + $0x8c] sm:$0xf] %vm302_vm0, %v288_v8 }
  0xbc   :  { %v179_v32 = vpop.permute.xlu0 %178  ;;  %v181_v33 = vpop.permute.xlu1 %180 }
  0xbd   :  { %v289_v9 = vmax.bf16 %v179_v32, %v623_v36  ;;  %v290_v50 = vmax.bf16 %v181_v33, %v628_v37 }
  0xbf   :  { %339 = vst.msk [vmem:[%s957_s1 + $0x90] sm:$0xf] %vm302_vm0, %v289_v9  ;;  %340 = vst.msk [vmem:[%s957_s1 + $0x94] sm:$0xf] %vm302_vm0, %v290_v50 }
  0xc0   :  { %v183_v34 = vpop.permute.xlu0 %182  ;;  %v185_v35 = vpop.permute.xlu1 %184 }
  0xc1   :  { %v291_v51 = vmax.bf16 %v183_v34, %v637_v38  ;;  %v292_v10 = vmax.bf16 %v185_v35, %v642_v39 }
  0xc3   :  { %341 = vst.msk [vmem:[%s957_s1 + $0x98] sm:$0xf] %vm302_vm0, %v291_v51  ;;  %342 = vst.msk [vmem:[%s957_s1 + $0x9c] sm:$0xf] %vm302_vm0, %v292_v10 }
  0xc4   :  { %v187_v36 = vpop.permute.xlu0 %186  ;;  %v189_v37 = vpop.permute.xlu1 %188 }
  0xc5   :  { %v293_v11 = vmax.bf16 %v187_v36, %v651_v40  ;;  %v294_v52 = vmax.bf16 %v189_v37, %v656_v41 }
  0xc7   :  { %343 = vst.msk [vmem:[%s957_s1 + $0xa0] sm:$0xf] %vm302_vm0, %v293_v11  ;;  %344 = vst.msk [vmem:[%s957_s1 + $0xa4] sm:$0xf] %vm302_vm0, %v294_v52 }
  0xc8   :  { %v191_v38 = vpop.permute.xlu0 %190  ;;  %v193_v39 = vpop.permute.xlu1 %192 }
  0xc9   :  { %v295_v53 = vmax.bf16 %v191_v38, %v665_v42  ;;  %v296_v12 = vmax.bf16 %v193_v39, %v670_v43 }
  0xcb   :  { %345 = vst.msk [vmem:[%s957_s1 + $0xa8] sm:$0xf] %vm302_vm0, %v295_v53  ;;  %346 = vst.msk [vmem:[%s957_s1 + $0xac] sm:$0xf] %vm302_vm0, %v296_v12 }
  0xcc   :  { %v195_v40 = vpop.permute.xlu0 %194  ;;  %v197_v41 = vpop.permute.xlu1 %196 }
  0xcd   :  { %v297_v13 = vmax.bf16 %v195_v40, %v679_v44  ;;  %v298_v54 = vmax.bf16 %v197_v41, %v684_v45 }
  0xcf   :  { %347 = vst.msk [vmem:[%s957_s1 + $0xb0] sm:$0xf] %vm302_vm0, %v297_v13  ;;  %348 = vst.msk [vmem:[%s957_s1 + $0xb4] sm:$0xf] %vm302_vm0, %v298_v54 }
  0xd0   :  { %v199_v42 = vpop.permute.xlu0 %198  ;;  %v201_v43 = vpop.permute.xlu1 %200 }
  0xd1   :  { %v299_v55 = vmax.bf16 %v199_v42, %v693_v46  ;;  %v300_v14 = vmax.bf16 %v201_v43, %v698_v47 }
  0xd3   :  { %349 = vst.msk [vmem:[%s957_s1 + $0xb8] sm:$0xf] %vm302_vm0, %v299_v55  ;;  %350 = vst.msk [vmem:[%s957_s1 + $0xbc] sm:$0xf] %vm302_vm0, %v300_v14 }
  0xd4   :  { %v203_v44 = vpop.permute.xlu0 %202 }
  0xd5   :  { %v301_v45 = vmax.bf16 %v203_v44, %v707_v48 }
  0xd7   :  { %351 = vst.msk [vmem:[%s957_s1 + $0xc0] sm:$0xf] %vm302_vm0, %v301_v45 }

// kernel: cnn_forward.10
= control target key start
LH: loop header
LB: loop body
LE: loop exit
PB: predicated region body
PF: predicated region fallthrough
CT: control target
= control target key end

     0   :  { %v2210_v0 = vmov 0   ;;  %vm785_vm0 = vcmask 130048   ;;  %vm1683_vm1 = vcmask 257024   ;;  %s2959_s1 = inlined_call_operand.vmem [shape: bf16[400,32], index: 1, kind: input, shape index: {}]   ;;  %s2960_s0 = inlined_call_operand.vmem [shape: bf16[392,400], index: 0, kind: input, shape index: {}]   ;;  %s2961_s2 = inlined_call_operand.vmem [shape: f32[1,32], index: 2, kind: input, shape index: {}]   ;;  %s2962_s3 = inlined_call_operand.vmem [shape: f32[1,32], index: 3, kind: input, shape index: {}]   ;;  %s2963_s4 = inlined_call_operand.vmem [shape: bf16[392,32], index: 4, kind: output, shape index: {}]  }
   0x1   :  { %861 = vmatprep.subr.bf16.mxu1 %v2210_v0  ;;  %v2037_v1 = vld [vmem:[%s2959_s1] sm:$0xff]   ;;  %1093 = vmatprep.subr.bf16.mxu0 %v2210_v0  ;;  %v2038_v2 = vld [vmem:[%s2959_s1 + $0x8] sm:$0xff]   ;;  %v2039_v3 = vld [vmem:[%s2959_s1 + $0x10] sm:$0xff]  }
   0x2   :  { %862 = vmatpush1.bf16.msra.mxu1 %v2037_v1  ;;  %v2044_v4 = vld [vmem:[%s2959_s1 + $0x80] sm:$0xff]   ;;  %v2046_v5 = vld [vmem:[%s2959_s1 + $0x88] sm:$0xff]   ;;  %v2040_v6 = vld [vmem:[%s2959_s1 + $0x18] sm:$0xff]  }
   0x3   :  { %863 = vmatprep.subr.bf16.mxu1 %v2210_v0  ;;  %1094 = vmatpush1.bf16.msra.mxu0 %v2044_v4  ;;  %v2048_v7 = vld [vmem:[%s2959_s1 + $0x90] sm:$0xff]   ;;  %v2041_v8 = vld [vmem:[%s2959_s1 + $0x20] sm:$0xff]   ;;  %v2050_v9 = vld [vmem:[%s2959_s1 + $0x98] sm:$0xff]  }
   0x4   :  { %1095 = vmatprep.subr.bf16.mxu0 %v2210_v0  ;;  %v2042_v10 = vld [vmem:[%s2959_s1 + $0x28] sm:$0xff]   ;;  %v2052_v11 = vld [vmem:[%s2959_s1 + $0xa0] sm:$0xff]   ;;  %v2043_v12 = vld [vmem:[%s2959_s1 + $0x30] sm:$0xff]  }
   0x5   :  { %v2054_v13 = vld [vmem:[%s2959_s1 + $0xa8] sm:$0xff]   ;;  %v2045_v15 = vld [vmem:[%s2959_s1 + $0x38] sm:$0xff]   ;;  %v2067_v16 = vld [vmem:[%s2960_s0 + $0x4] ss:$16 sps:$4 sm:$0xff]  }
   0x6   :  { %864 = vmatpush1.bf16.msra.mxu1 %v2038_v2  ;;  %v2063_v14 = vld [vmem:[%s2960_s0 + $0xc] ss:$16 sps:$4 sm:$0xff]   ;;  %v2056_v17 = vld [vmem:[%s2959_s1 + $0xb0] sm:$0xff]   ;;  %893 = vmatprep.mubr.bf16.mxu1 %v2067_v16  ;;  %v2047_v18 = vld [vmem:[%s2959_s1 + $0x40] sm:$0xff]  }
   0x7   :  { %865 = vmatprep.subr.bf16.mxu1 %v2210_v0  ;;  %1096 = vmatpush1.bf16.msra.mxu0 %v2046_v5  ;;  %v2058_v19 = vld [vmem:[%s2959_s1 + $0xb8] sm:$0xff]   ;;  %v2049_v20 = vld [vmem:[%s2959_s1 + $0x48] sm:$0xff]   ;;  %v2060_v21 = vld [vmem:[%s2959_s1 + $0xc0] sm:$0xff]  }
   0x8   :  { %1097 = vmatprep.subr.bf16.mxu0 %v2210_v0  ;;  %1862 = vmatprep.mubr.msk.bf16.mxu0 %vm785_vm0, %v2063_v14  ;;  %v2051_v22 = vld [vmem:[%s2959_s1 + $0x50] sm:$0xff]   ;;  %v2061_v23 = vld [vmem:[%s2960_s0 + $0x8] ss:$16 sps:$4 sm:$0xff]   ;;  %v2068_v24 = vld [vmem:[%s2960_s0 + $0x2c] ss:$16 sps:$4 sm:$0xff]  }
   0x9   :  { %v2053_v25 = vld [vmem:[%s2959_s1 + $0x58] sm:$0xff]   ;;  %v2055_v26 = vld [vmem:[%s2959_s1 + $0x60] sm:$0xff]   ;;  %v2057_v29 = vld [vmem:[%s2959_s1 + $0x68] sm:$0xff]  }
   0xa   :  { %866 = vmatpush1.bf16.msra.mxu1 %v2039_v3  ;;  %v2070_v27 = vld [vmem:[%s2960_s0 + $0x28] ss:$16 sps:$4 sm:$0xff]   ;;  %v2074_v28 = vld [vmem:[%s2960_s0 + $0x4c] ss:$16 sps:$4 sm:$0xff]   ;;  %v2059_v30 = vld [vmem:[%s2959_s1 + $0x70] sm:$0xff]  }
   0xb   :  { %867 = vmatprep.subr.bf16.mxu1 %v2210_v0  ;;  %1098 = vmatpush1.bf16.msra.mxu0 %v2048_v7  ;;  %v2076_v31 = vld [vmem:[%s2960_s0 + $0x48] ss:$16 sps:$4 sm:$0xff]   ;;  %v2080_v32 = vld [vmem:[%s2960_s0 + $0x6c] ss:$16 sps:$4 sm:$0xff]   ;;  %v2065_v34 = vld [vmem:[%s2960_s0] ss:$16 sps:$4 sm:$0xff]  }
   0xc   :  { %1099 = vmatprep.subr.bf16.mxu0 %v2210_v0  ;;  %v2064_v33 = vld [vmem:[%s2959_s1 + $0x78] sm:$0xff]   ;;  %v2071_v35 = vld [vmem:[%s2960_s0 + $0x24] ss:$16 sps:$4 sm:$0xff]   ;;  %v2073_v38 = vld [vmem:[%s2960_s0 + $0x20] ss:$16 sps:$4 sm:$0xff]  }
   0xd   :  { %v2082_v36 = vld [vmem:[%s2960_s0 + $0x68] ss:$16 sps:$4 sm:$0xff]   ;;  %v2086_v37 = vld [vmem:[%s2960_s0 + $0x8c] ss:$16 sps:$4 sm:$0xff]   ;;  %v2077_v39 = vld [vmem:[%s2960_s0 + $0x44] ss:$16 sps:$4 sm:$0xff]  }
   0xe   :  { %868 = vmatpush1.bf16.msra.mxu1 %v2040_v6  ;;  %v2088_v40 = vld [vmem:[%s2960_s0 + $0x88] ss:$16 sps:$4 sm:$0xff]   ;;  %v2092_v41 = vld [vmem:[%s2960_s0 + $0xac] ss:$16 sps:$4 sm:$0xff]   ;;  %v2079_v42 = vld [vmem:[%s2960_s0 + $0x40] ss:$16 sps:$4 sm:$0xff]  }
   0xf   :  { %869 = vmatprep.subr.bf16.mxu1 %v2210_v0  ;;  %1100 = vmatpush1.bf16.msra.mxu0 %v2050_v9  ;;  %v2083_v43 = vld [vmem:[%s2960_s0 + $0x64] ss:$16 sps:$4 sm:$0xff]   ;;  %v2094_v44 = vld [vmem:[%s2960_s0 + $0xa8] ss:$16 sps:$4 sm:$0xff]   ;;  %v2098_v45 = vld [vmem:[%s2960_s0 + $0xcc] ss:$16 sps:$4 sm:$0xff]  }
  0x10   :  { %1101 = vmatprep.subr.bf16.mxu0 %v2210_v0  ;;  %v2085_v46 = vld [vmem:[%s2960_s0 + $0x60] ss:$16 sps:$4 sm:$0xff]   ;;  %v2089_v47 = vld [vmem:[%s2960_s0 + $0x84] ss:$16 sps:$4 sm:$0xff]   ;;  %v2100_v48 = vld [vmem:[%s2960_s0 + $0xc8] ss:$16 sps:$4 sm:$0xff]  }
  0x11   :  { %v2104_v49 = vld [vmem:[%s2960_s0 + $0xec] ss:$16 sps:$4 sm:$0xff]   ;;  %v2091_v50 = vld [vmem:[%s2960_s0 + $0x80] ss:$16 sps:$4 sm:$0xff]   ;;  %v2095_v51 = vld [vmem:[%s2960_s0 + $0xa4] ss:$16 sps:$4 sm:$0xff]  }
  0x12   :  { %870 = vmatpush1.bf16.msra.mxu1 %v2041_v8  ;;  %v2106_v52 = vld [vmem:[%s2960_s0 + $0xe8] ss:$16 sps:$4 sm:$0xff]   ;;  %v2110_v53 = vld [vmem:[%s2960_s0 + $0x10c] ss:$16 sps:$4 sm:$0xff]   ;;  %v2097_v54 = vld [vmem:[%s2960_s0 + $0xa0] ss:$16 sps:$4 sm:$0xff]  }
  0x13   :  { %871 = vmatprep.subr.bf16.mxu1 %v2210_v0  ;;  %1102 = vmatpush1.bf16.msra.mxu0 %v2052_v11  ;;  %v2101_v55 = vld [vmem:[%s2960_s0 + $0xc4] ss:$16 sps:$4 sm:$0xff]   ;;  %v2112_v56 = vld [vmem:[%s2960_s0 + $0x108] ss:$16 sps:$4 sm:$0xff]   ;;  %v2116_v57 = vld [vmem:[%s2960_s0 + $0x12c] ss:$16 sps:$4 sm:$0xff]  }
  0x14   :  { %1103 = vmatprep.subr.bf16.mxu0 %v2210_v0  ;;  %v2103_v58 = vld [vmem:[%s2960_s0 + $0xc0] ss:$16 sps:$4 sm:$0xff]   ;;  %v2107_v59 = vld [vmem:[%s2960_s0 + $0xe4] ss:$16 sps:$4 sm:$0xff]   ;;  %v2118_v60 = vld [vmem:[%s2960_s0 + $0x128] ss:$16 sps:$4 sm:$0xff]  }
  0x15   :  { %v2122_v61 = vld [vmem:[%s2960_s0 + $0x14c] ss:$16 sps:$4 sm:$0xff]   ;;  %v2109_v62 = vld [vmem:[%s2960_s0 + $0xe0] ss:$16 sps:$4 sm:$0xff]   ;;  %v2113_v63 = vld [vmem:[%s2960_s0 + $0x104] ss:$16 sps:$4 sm:$0xff]  }
  0x16   :  { %872 = vmatpush1.bf16.msra.mxu1 %v2042_v10  ;;  %v2128_v1 = vld [vmem:[%s2960_s0 + $0x16c] ss:$16 sps:$4 sm:$0xff]   ;;  %v2115_v2 = vld [vmem:[%s2960_s0 + $0x100] ss:$16 sps:$4 sm:$0xff]   ;;  %v2119_v3 = vld [vmem:[%s2960_s0 + $0x124] ss:$16 sps:$4 sm:$0xff]  }
  0x17   :  { %873 = vmatprep.subr.bf16.mxu1 %v2210_v0  ;;  %1104 = vmatpush1.bf16.msra.mxu0 %v2054_v13  ;;  %v2130_v4 = vld [vmem:[%s2960_s0 + $0x168] ss:$16 sps:$4 sm:$0xff]   ;;  %v2134_v5 = vld [vmem:[%s2960_s0 + $0x18c] ss:$16 sps:$4 sm:$0xff]   ;;  %v2121_v6 = vld [vmem:[%s2960_s0 + $0x120] ss:$16 sps:$4 sm:$0xff]  }
  0x18   :  { %1105 = vmatprep.subr.bf16.mxu0 %v2210_v0  ;;  %v2125_v7 = vld [vmem:[%s2960_s0 + $0x144] ss:$16 sps:$4 sm:$0xff]   ;;  %v2136_v8 = vld [vmem:[%s2960_s0 + $0x188] ss:$16 sps:$4 sm:$0xff]   ;;  %v2140_v9 = vld [vmem:[%s2960_s0 + $0x1ac] ss:$16 sps:$4 sm:$0xff]  }
  0x19   :  { %v2127_v10 = vld [vmem:[%s2960_s0 + $0x140] ss:$16 sps:$4 sm:$0xff]   ;;  %v2131_v11 = vld [vmem:[%s2960_s0 + $0x164] ss:$16 sps:$4 sm:$0xff]   ;;  %v2146_v13 = vld [vmem:[%s2960_s0 + $0x1cc] ss:$16 sps:$4 sm:$0xff]  }
  0x1a   :  { %874 = vmatpush1.bf16.msra.mxu1 %v2043_v12  ;;  %v2142_v12 = vld [vmem:[%s2960_s0 + $0x1a8] ss:$16 sps:$4 sm:$0xff]   ;;  %v2133_v14 = vld [vmem:[%s2960_s0 + $0x160] ss:$16 sps:$4 sm:$0xff]  }
  0x1b   :  { %875 = vmatprep.subr.bf16.mxu1 %v2210_v0  ;;  %1106 = vmatpush1.bf16.msra.mxu0 %v2056_v17  ;;  %v2148_v16 = vld [vmem:[%s2960_s0 + $0x1c8] ss:$16 sps:$4 sm:$0xff]   ;;  %v2152_v17 = vld [vmem:[%s2960_s0 + $0x1ec] ss:$16 sps:$4 sm:$0xff]  }
  0x1c   :  { %1107 = vmatprep.subr.bf16.mxu0 %v2210_v0 }
  0x1e   :  { %876 = vmatpush1.bf16.msra.mxu1 %v2045_v15  ;;  %v2137_v15 = vld [vmem:[%s2960_s0 + $0x184] ss:$16 sps:$4 sm:$0xff]  }
  0x1f   :  { %877 = vmatprep.subr.bf16.mxu1 %v2210_v0  ;;  %1108 = vmatpush1.bf16.msra.mxu0 %v2058_v19  ;;  %v2143_v19 = vld [vmem:[%s2960_s0 + $0x1a4] ss:$16 sps:$4 sm:$0xff]  }
  0x20   :  { %1109 = vmatprep.subr.bf16.mxu0 %v2210_v0 }
  0x22   :  { %878 = vmatpush1.bf16.msra.mxu1 %v2047_v18  ;;  %v2139_v18 = vld [vmem:[%s2960_s0 + $0x180] ss:$16 sps:$4 sm:$0xff]  }
  0x23   :  { %879 = vmatprep.subr.bf16.mxu1 %v2210_v0  ;;  %1110 = vmatpush1.bf16.msra.mxu0 %v2060_v21  ;;  %v2158_v21 = vld [vmem:[%s2960_s0 + $0x20c] ss:$16 sps:$4 sm:$0xff]  }
  0x26   :  { %880 = vmatpush1.bf16.msra.mxu1 %v2049_v20  ;;  %1126 = vmatmul.mubr.bf16.vlgmr.msra.gmra.mrb[0].mxu0 %v2061_v23  ;;  %v2154_v20 = vld [vmem:[%s2960_s0 + $0x1e8] ss:$16 sps:$4 sm:$0xff]   ;;  %v2149_v23 = vld [vmem:[%s2960_s0 + $0x1c4] ss:$16 sps:$4 sm:$0xff]  }
  0x27   :  { %881 = vmatprep.subr.bf16.mxu1 %v2210_v0  ;;  %1863 = vmatprep.mubr.msk.bf16.mxu0 %vm785_vm0, %v2068_v24  ;;  %v2160_v24 = vld [vmem:[%s2960_s0 + $0x208] ss:$16 sps:$4 sm:$0xff]  }
  0x2a   :  { %882 = vmatpush1.bf16.msra.mxu1 %v2051_v22  ;;  %v2145_v22 = vld [vmem:[%s2960_s0 + $0x1a0] ss:$16 sps:$4 sm:$0xff]  }
  0x2b   :  { %883 = vmatprep.subr.bf16.mxu1 %v2210_v0 }
  0x2e   :  { %884 = vmatpush1.bf16.msra.mxu1 %v2053_v25  ;;  %1134 = vmatmul.mubr.bf16.gmra.mrb[4].mxu0 %v2070_v27  ;;  %v2164_v25 = vld [vmem:[%s2960_s0 + $0x22c] ss:$16 sps:$4 sm:$0xff]   ;;  %v2155_v27 = vld [vmem:[%s2960_s0 + $0x1e4] ss:$16 sps:$4 sm:$0xff]  }
  0x2f   :  { %885 = vmatprep.subr.bf16.mxu1 %v2210_v0  ;;  %1864 = vmatprep.mubr.msk.bf16.mxu0 %vm785_vm0, %v2074_v28  ;;  %v2166_v28 = vld [vmem:[%s2960_s0 + $0x228] ss:$16 sps:$4 sm:$0xff]  }
  0x32   :  { %886 = vmatpush1.bf16.msra.mxu1 %v2055_v26  ;;  %v2151_v26 = vld [vmem:[%s2960_s0 + $0x1c0] ss:$16 sps:$4 sm:$0xff]  }
  0x33   :  { %887 = vmatprep.subr.bf16.mxu1 %v2210_v0 }
  0x36   :  { %888 = vmatpush1.bf16.msra.mxu1 %v2057_v29  ;;  %1142 = vmatmul.mubr.bf16.gmra.mrb[8].mxu0 %v2076_v31  ;;  %v2170_v29 = vld [vmem:[%s2960_s0 + $0x24c] ss:$16 sps:$4 sm:$0xff]   ;;  %v2161_v31 = vld [vmem:[%s2960_s0 + $0x204] ss:$16 sps:$4 sm:$0xff]  }
  0x37   :  { %889 = vmatprep.subr.bf16.mxu1 %v2210_v0  ;;  %1865 = vmatprep.mubr.msk.bf16.mxu0 %vm785_vm0, %v2080_v32  ;;  %v2172_v32 = vld [vmem:[%s2960_s0 + $0x248] ss:$16 sps:$4 sm:$0xff]  }
  0x3a   :  { %890 = vmatpush1.bf16.msra.mxu1 %v2059_v30  ;;  %v2157_v30 = vld [vmem:[%s2960_s0 + $0x1e0] ss:$16 sps:$4 sm:$0xff]  }
  0x3b   :  { %891 = vmatprep.subr.bf16.mxu1 %v2210_v0  ;;  %v2124_v0 = vld [vmem:[%s2960_s0 + $0x148] ss:$16 sps:$4 sm:$0xff]  }
  0x3e   :  { %892 = vmatpush1.bf16.msra.mxu1 %v2064_v33  ;;  %1150 = vmatmul.mubr.bf16.gmra.mrb[12].mxu0 %v2082_v36  ;;  %v2176_v33 = vld [vmem:[%s2960_s0 + $0x26c] ss:$16 sps:$4 sm:$0xff]   ;;  %v2178_v36 = vld [vmem:[%s2960_s0 + $0x268] ss:$16 sps:$4 sm:$0xff]  }
  0x3f   :  { %1866 = vmatprep.mubr.msk.bf16.mxu0 %vm785_vm0, %v2086_v37  ;;  %v2182_v37 = vld [vmem:[%s2960_s0 + $0x28c] ss:$16 sps:$4 sm:$0xff]  }
  0x41   :  { %894 = vmatmul.mubr.bf16.vlgmr.msra.gmra.mrb[0].mxu1 %v2065_v34  ;;  %v2163_v34 = vld [vmem:[%s2960_s0 + $0x200] ss:$16 sps:$4 sm:$0xff]  }
  0x42   :  { %901 = vmatprep.mubr.bf16.mxu1 %v2071_v35  ;;  %v2167_v35 = vld [vmem:[%s2960_s0 + $0x224] ss:$16 sps:$4 sm:$0xff]  }
  0x46   :  { %1158 = vmatmul.mubr.bf16.gmra.mrb[16].mxu0 %v2088_v40  ;;  %v2184_v40 = vld [vmem:[%s2960_s0 + $0x288] ss:$16 sps:$4 sm:$0xff]  }
  0x47   :  { %1867 = vmatprep.mubr.msk.bf16.mxu0 %vm785_vm0, %v2092_v41  ;;  %v2188_v41 = vld [vmem:[%s2960_s0 + $0x2ac] ss:$16 sps:$4 sm:$0xff]  }
  0x49   :  { %902 = vmatmul.mubr.bf16.gmra.mrb[4].mxu1 %v2073_v38  ;;  %v2169_v38 = vld [vmem:[%s2960_s0 + $0x220] ss:$16 sps:$4 sm:$0xff]  }
  0x4a   :  { %909 = vmatprep.mubr.bf16.mxu1 %v2077_v39  ;;  %v2173_v39 = vld [vmem:[%s2960_s0 + $0x244] ss:$16 sps:$4 sm:$0xff]  }
  0x4e   :  { %1166 = vmatmul.mubr.bf16.gmra.mrb[20].mxu0 %v2094_v44  ;;  %v2190_v44 = vld [vmem:[%s2960_s0 + $0x2a8] ss:$16 sps:$4 sm:$0xff]  }
  0x4f   :  { %1868 = vmatprep.mubr.msk.bf16.mxu0 %vm785_vm0, %v2098_v45  ;;  %v2194_v45 = vld [vmem:[%s2960_s0 + $0x2cc] ss:$16 sps:$4 sm:$0xff]  }
  0x51   :  { %910 = vmatmul.mubr.bf16.gmra.mrb[8].mxu1 %v2079_v42  ;;  %v2175_v42 = vld [vmem:[%s2960_s0 + $0x240] ss:$16 sps:$4 sm:$0xff]  }
  0x52   :  { %917 = vmatprep.mubr.bf16.mxu1 %v2083_v43  ;;  %v2179_v43 = vld [vmem:[%s2960_s0 + $0x264] ss:$16 sps:$4 sm:$0xff]  }
  0x56   :  { %1174 = vmatmul.mubr.bf16.gmra.mrb[24].mxu0 %v2100_v48  ;;  %v2196_v48 = vld [vmem:[%s2960_s0 + $0x2c8] ss:$16 sps:$4 sm:$0xff]  }
  0x57   :  { %1869 = vmatprep.mubr.msk.bf16.mxu0 %vm785_vm0, %v2104_v49  ;;  %v2200_v49 = vld [vmem:[%s2960_s0 + $0x2ec] ss:$16 sps:$4 sm:$0xff]  }
  0x59   :  { %918 = vmatmul.mubr.bf16.gmra.mrb[12].mxu1 %v2085_v46  ;;  %v2181_v46 = vld [vmem:[%s2960_s0 + $0x260] ss:$16 sps:$4 sm:$0xff]  }
  0x5a   :  { %925 = vmatprep.mubr.bf16.mxu1 %v2089_v47  ;;  %v2185_v47 = vld [vmem:[%s2960_s0 + $0x284] ss:$16 sps:$4 sm:$0xff]  }
  0x5e   :  { %1182 = vmatmul.mubr.bf16.gmra.mrb[28].mxu0 %v2106_v52  ;;  %v115_v52 = vld [vmem:[%s2960_s0 + $0x308] sm:$0xff] }
  0x5f   :  { %1870 = vmatprep.mubr.msk.bf16.mxu0 %vm785_vm0, %v2110_v53  ;;  %v2202_v53 = vld [vmem:[%s2960_s0 + $0x2e8] ss:$16 sps:$4 sm:$0xff]  }
  0x61   :  { %926 = vmatmul.mubr.bf16.gmra.mrb[16].mxu1 %v2091_v50  ;;  %v2187_v50 = vld [vmem:[%s2960_s0 + $0x280] ss:$16 sps:$4 sm:$0xff]  }
  0x62   :  { %933 = vmatprep.mubr.bf16.mxu1 %v2095_v51  ;;  %v2191_v51 = vld [vmem:[%s2960_s0 + $0x2a4] ss:$16 sps:$4 sm:$0xff]  }
  0x66   :  { %1190 = vmatmul.mubr.bf16.gmra.mrb[32].mxu0 %v2112_v56  ;;  %v2197_v56 = vld [vmem:[%s2960_s0 + $0x2c4] ss:$16 sps:$4 sm:$0xff]  }
  0x67   :  { %1871 = vmatprep.mubr.msk.bf16.mxu0 %vm785_vm0, %v2116_v57  ;;  %v1835_v57 = vcombine.low %v115_v52, %v115_v52 }
  0x69   :  { %934 = vmatmul.mubr.bf16.gmra.mrb[20].mxu1 %v2097_v54  ;;  %v1836_v54 = vcombine.high %v115_v52, %v115_v52 }
  0x6a   :  { %941 = vmatprep.mubr.bf16.mxu1 %v2101_v55  ;;  %v2193_v55 = vld [vmem:[%s2960_s0 + $0x2a0] ss:$16 sps:$4 sm:$0xff]  }
  0x6e   :  { %1198 = vmatmul.mubr.bf16.gmra.mrb[36].mxu0 %v2118_v60  ;;  %v114_v60 = vld [vmem:[%s2960_s0 + $0x300] sm:$0xff] }
  0x6f   :  { %1872 = vmatprep.mubr.msk.bf16.mxu0 %vm785_vm0, %v2122_v61  ;;  %v2205_v61 = vld [vmem:[%s2960_s0 + $0x2e0] ss:$16 sps:$4 sm:$0xff]  }
  0x71   :  { %942 = vmatmul.mubr.bf16.gmra.mrb[24].mxu1 %v2103_v58  ;;  %v2199_v58 = vld [vmem:[%s2960_s0 + $0x2c0] ss:$16 sps:$4 sm:$0xff]  }
  0x72   :  { %949 = vmatprep.mubr.bf16.mxu1 %v2107_v59  ;;  %v2203_v59 = vld [vmem:[%s2960_s0 + $0x2e4] ss:$16 sps:$4 sm:$0xff]  }
  0x76   :  { %1206 = vmatmul.mubr.bf16.gmra.mrb[40].mxu0 %v2124_v0 }
  0x77   :  { %1873 = vmatprep.mubr.msk.bf16.mxu0 %vm785_vm0, %v2128_v1 }
  0x79   :  { %950 = vmatmul.mubr.bf16.gmra.mrb[28].mxu1 %v2109_v62  ;;  %v1834_v62 = vcombine.high %v114_v60, %v114_v60 }
  0x7a   :  { %957 = vmatprep.mubr.bf16.mxu1 %v2113_v63  ;;  %v1833_v63 = vcombine.low %v114_v60, %v114_v60 }
  0x7e   :  { %1214 = vmatmul.mubr.bf16.gmra.mrb[44].mxu0 %v2130_v4 }
  0x7f   :  { %1874 = vmatprep.mubr.msk.bf16.mxu0 %vm785_vm0, %v2134_v5 }
  0x81   :  { %958 = vmatmul.mubr.bf16.gmra.mrb[32].mxu1 %v2115_v2 }
  0x82   :  { %965 = vmatprep.mubr.bf16.mxu1 %v2119_v3 }
  0x86   :  { %1222 = vmatmul.mubr.bf16.gmra.mrb[48].mxu0 %v2136_v8 }
  0x87   :  { %1875 = vmatprep.mubr.msk.bf16.mxu0 %vm785_vm0, %v2140_v9 }
  0x89   :  { %966 = vmatmul.mubr.bf16.gmra.mrb[36].mxu1 %v2121_v6 }
  0x8a   :  { %973 = vmatprep.mubr.bf16.mxu1 %v2125_v7 }
  0x8e   :  { %1230 = vmatmul.mubr.bf16.gmra.mrb[52].mxu0 %v2142_v12 }
  0x8f   :  { %1876 = vmatprep.mubr.msk.bf16.mxu0 %vm785_vm0, %v2146_v13  ;;  %v2658_v13 = vld [vmem:[%s2961_s2] ss:$0 sm:$0xff] }
  0x91   :  { %974 = vmatmul.mubr.bf16.gmra.mrb[40].mxu1 %v2127_v10 }
  0x92   :  { %981 = vmatprep.mubr.bf16.mxu1 %v2131_v11 }
  0x96   :  { %1238 = vmatmul.mubr.bf16.gmra.mrb[56].mxu0 %v2148_v16  ;;  %v2663_v16 = vld [vmem:[%s2962_s3] ss:$0 sm:$0xff] }
  0x97   :  { %1877 = vmatprep.mubr.msk.bf16.mxu0 %vm785_vm0, %v2152_v17 }
  0x99   :  { %982 = vmatmul.mubr.bf16.gmra.mrb[44].mxu1 %v2133_v14 }
  0x9a   :  { %989 = vmatprep.mubr.bf16.mxu1 %v2137_v15 }
  0x9e   :  { %1246 = vmatmul.mubr.bf16.gmra.mrb[60].mxu0 %v2154_v20 }
  0x9f   :  { %1878 = vmatprep.mubr.msk.bf16.mxu0 %vm785_vm0, %v2158_v21 }
  0xa1   :  { %990 = vmatmul.mubr.bf16.gmra.mrb[48].mxu1 %v2139_v18 }
  0xa2   :  { %997 = vmatprep.mubr.bf16.mxu1 %v2143_v19 }
  0xa6   :  { %1254 = vmatmul.mubr.bf16.gmra.mrb[64].mxu0 %v2160_v24 }
  0xa7   :  { %1879 = vmatprep.mubr.msk.bf16.mxu0 %vm785_vm0, %v2164_v25 }
  0xa9   :  { %998 = vmatmul.mubr.bf16.gmra.mrb[52].mxu1 %v2145_v22 }
  0xaa   :  { %1005 = vmatprep.mubr.bf16.mxu1 %v2149_v23 }
  0xae   :  { %1262 = vmatmul.mubr.bf16.gmra.mrb[68].mxu0 %v2166_v28 }
  0xaf   :  { %1880 = vmatprep.mubr.msk.bf16.mxu0 %vm785_vm0, %v2170_v29 }
  0xb1   :  { %1006 = vmatmul.mubr.bf16.gmra.mrb[56].mxu1 %v2151_v26 }
  0xb2   :  { %1013 = vmatprep.mubr.bf16.mxu1 %v2155_v27 }
  0xb6   :  { %1270 = vmatmul.mubr.bf16.gmra.mrb[72].mxu0 %v2172_v32 }
  0xb7   :  { %1881 = vmatprep.mubr.msk.bf16.mxu0 %vm785_vm0, %v2176_v33 }
  0xb9   :  { %1014 = vmatmul.mubr.bf16.gmra.mrb[60].mxu1 %v2157_v30 }
  0xba   :  { %1021 = vmatprep.mubr.bf16.mxu1 %v2161_v31 }
  0xbe   :  { %1278 = vmatmul.mubr.bf16.gmra.mrb[76].mxu0 %v2178_v36 }
  0xbf   :  { %1882 = vmatprep.mubr.msk.bf16.mxu0 %vm785_vm0, %v2182_v37 }
  0xc1   :  { %1022 = vmatmul.mubr.bf16.gmra.mrb[64].mxu1 %v2163_v34 }
  0xc2   :  { %1029 = vmatprep.mubr.bf16.mxu1 %v2167_v35 }
  0xc6   :  { %1286 = vmatmul.mubr.bf16.gmra.mrb[80].mxu0 %v2184_v40 }
  0xc7   :  { %1883 = vmatprep.mubr.msk.bf16.mxu0 %vm785_vm0, %v2188_v41 }
  0xc9   :  { %1030 = vmatmul.mubr.bf16.gmra.mrb[68].mxu1 %v2169_v38 }
  0xca   :  { %1037 = vmatprep.mubr.bf16.mxu1 %v2173_v39 }
  0xce   :  { %1294 = vmatmul.mubr.bf16.gmra.mrb[84].mxu0 %v2190_v44 }
  0xcf   :  { %1884 = vmatprep.mubr.msk.bf16.mxu0 %vm785_vm0, %v2194_v45 }
  0xd1   :  { %1038 = vmatmul.mubr.bf16.gmra.mrb[72].mxu1 %v2175_v42 }
  0xd2   :  { %1045 = vmatprep.mubr.bf16.mxu1 %v2179_v43 }
  0xd6   :  { %1302 = vmatmul.mubr.bf16.gmra.mrb[88].mxu0 %v2196_v48 }
  0xd7   :  { %1885 = vmatprep.mubr.msk.bf16.mxu0 %vm785_vm0, %v2200_v49 }
  0xd9   :  { %1046 = vmatmul.mubr.bf16.gmra.mrb[76].mxu1 %v2181_v46 }
  0xda   :  { %1053 = vmatprep.mubr.bf16.mxu1 %v2185_v47 }
  0xde   :  { %1310 = vmatmul.mubr.bf16.gmra.mrb[92].mxu0 %v2202_v53 }
  0xdf   :  { %1886 = vmatprep.mubr.msk.bf16.mxu0 %vm785_vm0, %v1836_v54 }
  0xe1   :  { %1054 = vmatmul.mubr.bf16.gmra.mrb[80].mxu1 %v2187_v50 }
  0xe2   :  { %1061 = vmatprep.mubr.bf16.mxu1 %v2191_v51 }
  0xe6   :  { %1318 = vmatmul.mubr.bf16.gmra.mrb[96].mxu0 %v1835_v57 }
  0xe9   :  { %1062 = vmatmul.mubr.bf16.gmra.mrb[84].mxu1 %v2193_v55 }
  0xea   :  { %1069 = vmatprep.mubr.bf16.mxu1 %v2197_v56 }
  0xf1   :  { %1070 = vmatmul.mubr.bf16.gmra.mrb[88].mxu1 %v2199_v58 }
  0xf2   :  { %1077 = vmatprep.mubr.bf16.mxu1 %v2203_v59 }
  0xf9   :  { %1078 = vmatmul.mubr.bf16.gmra.mrb[92].mxu1 %v2205_v61  ;;  %v1127_v0 = vpop.f32.mrb[0].mxu0 }
  0xfa   :  { %1085 = vmatprep.mubr.bf16.mxu1 %v1834_v62  ;;  %v1129_v1 = vpop.f32.mrb[1].mxu0 }
  0xfb   :  { %v1130_v2 = vpop.f32.mrb[2].mxu0 }
  0xfc   :  { %v1132_v3 = vpop.f32.mrb[3].mxu0 }
 0x101   :  { %1086 = vmatmul.mubr.bf16.gmra.mrb[96].mxu1 %v1833_v63  ;;  %v1135_v4 = vpop.f32.mrb[4].mxu0 }
 0x102   :  { %v1137_v5 = vpop.f32.mrb[5].mxu0 }
 0x103   :  { %v1138_v6 = vpop.f32.mrb[6].mxu0 }
 0x104   :  { %v1140_v7 = vpop.f32.mrb[7].mxu0 }
 0x109   :  { %v1143_v8 = vpop.f32.mrb[8].mxu0 }
 0x10a   :  { %v1145_v9 = vpop.f32.mrb[9].mxu0 }
 0x10b   :  { %v1146_v10 = vpop.f32.mrb[10].mxu0 }
 0x10c   :  { %v1148_v11 = vpop.f32.mrb[11].mxu0 }
 0x111   :  { %v1151_v21 = vpop.f32.mrb[12].mxu0 }
 0x112   :  { %v1153_v22 = vpop.f32.mrb[13].mxu0 }
 0x113   :  { %v1154_v25 = vpop.f32.mrb[14].mxu0 }
 0x114   :  { %v895_v12 = vpop.f32.mrb[0].mxu1  ;;  %v1156_v26 = vpop.f32.mrb[15].mxu0 }
 0x115   :  { %v1128_v14 = vadd.f32 %v1127_v0, %v895_v12  ;;  %v897_v15 = vpop.f32.mrb[1].mxu1 }
 0x116   :  { %v898_v17 = vpop.f32.mrb[2].mxu1 }
 0x117   :  { %v1332_v18 = vmul.f32 %v2658_v13, %v1128_v14  ;;  %v1131_v19 = vadd.f32 %v1130_v2, %v898_v17  ;;  %v900_v20 = vpop.f32.mrb[3].mxu1 }
 0x119   :  { %v1388_v23 = vadd.f32 %v2663_v16, %v1332_v18  ;;  %v1333_v24 = vmul.f32 %v2658_v13, %v1131_v19  ;;  %v1159_v39 = vpop.f32.mrb[16].mxu0 }
 0x11a   :  { %v1161_v40 = vpop.f32.mrb[17].mxu0 }
 0x11b   :  { %v1437_v27 = vmax.f32 %v1388_v23, 0.0  ;;  %v1389_v28 = vadd.f32 %v2663_v16, %v1333_v24  ;;  %v1162_v43 = vpop.f32.mrb[18].mxu0 }
 0x11c   :  { %v903_v29 = vpop.f32.mrb[4].mxu1  ;;  %v1164_v44 = vpop.f32.mrb[19].mxu0 }
 0x11d   :  { %v1938_v30 = vpack.c.bf16 %v1437_v27, %v1437_v27  ;;  %v1438_v31 = vmax.f32 %v1389_v28, 0.0  ;;  %v1136_v32 = vadd.f32 %v1135_v4, %v903_v29  ;;  %v905_v33 = vpop.f32.mrb[5].mxu1 }
 0x11e   :  { %v906_v34 = vpop.f32.mrb[6].mxu1 }
 0x11f   :  { %1684 = vst.msk [vmem:[%s2963_s4] sm:$0xf] %vm1683_vm1, %v1938_v30  ;;  %v1939_v35 = vpack.c.bf16 %v1438_v31, %v1438_v31  ;;  %v1334_v36 = vmul.f32 %v2658_v13, %v1136_v32  ;;  %v1139_v37 = vadd.f32 %v1138_v6, %v906_v34  ;;  %v908_v38 = vpop.f32.mrb[7].mxu1 }
 0x121   :  { %1685 = vst.msk [vmem:[%s2963_s4 + $0x4] sm:$0xf] %vm1683_vm1, %v1939_v35  ;;  %v1390_v41 = vadd.f32 %v2663_v16, %v1334_v36  ;;  %v1335_v42 = vmul.f32 %v2658_v13, %v1139_v37  ;;  %v1167_v57 = vpop.f32.mrb[20].mxu0 }
 0x122   :  { %v1169_v58 = vpop.f32.mrb[21].mxu0 }
 0x123   :  { %v1439_v45 = vmax.f32 %v1390_v41, 0.0  ;;  %v1391_v46 = vadd.f32 %v2663_v16, %v1335_v42  ;;  %v1170_v61 = vpop.f32.mrb[22].mxu0 }
 0x124   :  { %v911_v47 = vpop.f32.mrb[8].mxu1  ;;  %v1172_v62 = vpop.f32.mrb[23].mxu0 }
 0x125   :  { %v1940_v48 = vpack.c.bf16 %v1439_v45, %v1439_v45  ;;  %v1440_v49 = vmax.f32 %v1391_v46, 0.0  ;;  %v1144_v50 = vadd.f32 %v1143_v8, %v911_v47  ;;  %v913_v51 = vpop.f32.mrb[9].mxu1 }
 0x126   :  { %v914_v52 = vpop.f32.mrb[10].mxu1 }
 0x127   :  { %1686 = vst.msk [vmem:[%s2963_s4 + $0x8] sm:$0xf] %vm1683_vm1, %v1940_v48  ;;  %v1941_v53 = vpack.c.bf16 %v1440_v49, %v1440_v49  ;;  %v1336_v54 = vmul.f32 %v2658_v13, %v1144_v50  ;;  %v1147_v55 = vadd.f32 %v1146_v10, %v914_v52  ;;  %v916_v56 = vpop.f32.mrb[11].mxu1 }
 0x129   :  { %1687 = vst.msk [vmem:[%s2963_s4 + $0xc] sm:$0xf] %vm1683_vm1, %v1941_v53  ;;  %v1392_v59 = vadd.f32 %v2663_v16, %v1336_v54  ;;  %v1337_v60 = vmul.f32 %v2658_v13, %v1147_v55  ;;  %v1175_v11 = vpop.f32.mrb[24].mxu0 }
 0x12a   :  { %v1177_v12 = vpop.f32.mrb[25].mxu0 }
 0x12b   :  { %v1441_v63 = vmax.f32 %v1392_v59, 0.0  ;;  %v1393_v0 = vadd.f32 %v2663_v16, %v1337_v60  ;;  %v1178_v17 = vpop.f32.mrb[26].mxu0 }
 0x12c   :  { %v919_v1 = vpop.f32.mrb[12].mxu1  ;;  %v1180_v18 = vpop.f32.mrb[27].mxu0 }
 0x12d   :  { %v1942_v2 = vpack.c.bf16 %v1441_v63, %v1441_v63  ;;  %v1442_v3 = vmax.f32 %v1393_v0, 0.0  ;;  %v1152_v4 = vadd.f32 %v1151_v21, %v919_v1  ;;  %v921_v5 = vpop.f32.mrb[13].mxu1 }
 0x12e   :  { %v922_v6 = vpop.f32.mrb[14].mxu1 }
 0x12f   :  { %1688 = vst.msk [vmem:[%s2963_s4 + $0x10] sm:$0xf] %vm1683_vm1, %v1942_v2  ;;  %v1943_v7 = vpack.c.bf16 %v1442_v3, %v1442_v3  ;;  %v1338_v8 = vmul.f32 %v2658_v13, %v1152_v4  ;;  %v1155_v9 = vadd.f32 %v1154_v25, %v922_v6  ;;  %v924_v10 = vpop.f32.mrb[15].mxu1 }
 0x131   :  { %1689 = vst.msk [vmem:[%s2963_s4 + $0x14] sm:$0xf] %vm1683_vm1, %v1943_v7  ;;  %v1394_v14 = vadd.f32 %v2663_v16, %v1338_v8  ;;  %v1339_v15 = vmul.f32 %v2658_v13, %v1155_v9  ;;  %v1183_v31 = vpop.f32.mrb[28].mxu0 }
 0x132   :  { %v1185_v32 = vpop.f32.mrb[29].mxu0 }
 0x133   :  { %v1443_v19 = vmax.f32 %v1394_v14, 0.0  ;;  %v1395_v20 = vadd.f32 %v2663_v16, %v1339_v15  ;;  %v1186_v35 = vpop.f32.mrb[30].mxu0 }
 0x134   :  { %v927_v21 = vpop.f32.mrb[16].mxu1  ;;  %v1188_v36 = vpop.f32.mrb[31].mxu0 }
 0x135   :  { %v1944_v22 = vpack.c.bf16 %v1443_v19, %v1443_v19  ;;  %v1444_v23 = vmax.f32 %v1395_v20, 0.0  ;;  %v1160_v24 = vadd.f32 %v1159_v39, %v927_v21  ;;  %v929_v25 = vpop.f32.mrb[17].mxu1 }
 0x136   :  { %v930_v26 = vpop.f32.mrb[18].mxu1 }
 0x137   :  { %1690 = vst.msk [vmem:[%s2963_s4 + $0x18] sm:$0xf] %vm1683_vm1, %v1944_v22  ;;  %v1945_v27 = vpack.c.bf16 %v1444_v23, %v1444_v23  ;;  %v1340_v28 = vmul.f32 %v2658_v13, %v1160_v24  ;;  %v1163_v29 = vadd.f32 %v1162_v43, %v930_v26  ;;  %v932_v30 = vpop.f32.mrb[19].mxu1 }
 0x139   :  { %1691 = vst.msk [vmem:[%s2963_s4 + $0x1c] sm:$0xf] %vm1683_vm1, %v1945_v27  ;;  %v1396_v33 = vadd.f32 %v2663_v16, %v1340_v28  ;;  %v1341_v34 = vmul.f32 %v2658_v13, %v1163_v29  ;;  %v1191_v49 = vpop.f32.mrb[32].mxu0 }
 0x13a   :  { %v1193_v50 = vpop.f32.mrb[33].mxu0 }
 0x13b   :  { %v1445_v37 = vmax.f32 %v1396_v33, 0.0  ;;  %v1397_v38 = vadd.f32 %v2663_v16, %v1341_v34  ;;  %v1194_v53 = vpop.f32.mrb[34].mxu0 }
 0x13c   :  { %v935_v39 = vpop.f32.mrb[20].mxu1  ;;  %v1196_v54 = vpop.f32.mrb[35].mxu0 }
 0x13d   :  { %v1946_v40 = vpack.c.bf16 %v1445_v37, %v1445_v37  ;;  %v1446_v41 = vmax.f32 %v1397_v38, 0.0  ;;  %v1168_v42 = vadd.f32 %v1167_v57, %v935_v39  ;;  %v937_v43 = vpop.f32.mrb[21].mxu1 }
 0x13e   :  { %v938_v44 = vpop.f32.mrb[22].mxu1 }
 0x13f   :  { %1692 = vst.msk [vmem:[%s2963_s4 + $0x20] sm:$0xf] %vm1683_vm1, %v1946_v40  ;;  %v1947_v45 = vpack.c.bf16 %v1446_v41, %v1446_v41  ;;  %v1342_v46 = vmul.f32 %v2658_v13, %v1168_v42  ;;  %v1171_v47 = vadd.f32 %v1170_v61, %v938_v44  ;;  %v940_v48 = vpop.f32.mrb[23].mxu1 }
 0x141   :  { %1693 = vst.msk [vmem:[%s2963_s4 + $0x24] sm:$0xf] %vm1683_vm1, %v1947_v45  ;;  %v1398_v51 = vadd.f32 %v2663_v16, %v1342_v46  ;;  %v1343_v52 = vmul.f32 %v2658_v13, %v1171_v47  ;;  %v1199_v3 = vpop.f32.mrb[36].mxu0 }
 0x142   :  { %v1201_v4 = vpop.f32.mrb[37].mxu0 }
 0x143   :  { %v1447_v55 = vmax.f32 %v1398_v51, 0.0  ;;  %v1399_v56 = vadd.f32 %v2663_v16, %v1343_v52  ;;  %v1202_v7 = vpop.f32.mrb[38].mxu0 }
 0x144   :  { %v943_v57 = vpop.f32.mrb[24].mxu1  ;;  %v1204_v8 = vpop.f32.mrb[39].mxu0 }
 0x145   :  { %v1948_v58 = vpack.c.bf16 %v1447_v55, %v1447_v55  ;;  %v1448_v59 = vmax.f32 %v1399_v56, 0.0  ;;  %v1176_v60 = vadd.f32 %v1175_v11, %v943_v57  ;;  %v945_v61 = vpop.f32.mrb[25].mxu1 }
 0x146   :  { %v946_v62 = vpop.f32.mrb[26].mxu1 }
 0x147   :  { %1694 = vst.msk [vmem:[%s2963_s4 + $0x28] sm:$0xf] %vm1683_vm1, %v1948_v58  ;;  %v1949_v63 = vpack.c.bf16 %v1448_v59, %v1448_v59  ;;  %v1344_v0 = vmul.f32 %v2658_v13, %v1176_v60  ;;  %v1179_v1 = vadd.f32 %v1178_v17, %v946_v62  ;;  %v948_v2 = vpop.f32.mrb[27].mxu1 }
 0x149   :  { %1695 = vst.msk [vmem:[%s2963_s4 + $0x2c] sm:$0xf] %vm1683_vm1, %v1949_v63  ;;  %v1400_v5 = vadd.f32 %v2663_v16, %v1344_v0  ;;  %v1345_v6 = vmul.f32 %v2658_v13, %v1179_v1  ;;  %v1207_v23 = vpop.f32.mrb[40].mxu0 }
 0x14a   :  { %v1209_v24 = vpop.f32.mrb[41].mxu0 }
 0x14b   :  { %v1449_v9 = vmax.f32 %v1400_v5, 0.0  ;;  %v1401_v10 = vadd.f32 %v2663_v16, %v1345_v6  ;;  %v1210_v27 = vpop.f32.mrb[42].mxu0 }
 0x14c   :  { %v951_v11 = vpop.f32.mrb[28].mxu1  ;;  %v1212_v28 = vpop.f32.mrb[43].mxu0 }
 0x14d   :  { %v1950_v12 = vpack.c.bf16 %v1449_v9, %v1449_v9  ;;  %v1450_v14 = vmax.f32 %v1401_v10, 0.0  ;;  %v1184_v15 = vadd.f32 %v1183_v31, %v951_v11  ;;  %v953_v17 = vpop.f32.mrb[29].mxu1 }
 0x14e   :  { %v954_v18 = vpop.f32.mrb[30].mxu1 }
 0x14f   :  { %1696 = vst.msk [vmem:[%s2963_s4 + $0x30] sm:$0xf] %vm1683_vm1, %v1950_v12  ;;  %v1951_v19 = vpack.c.bf16 %v1450_v14, %v1450_v14  ;;  %v1346_v20 = vmul.f32 %v2658_v13, %v1184_v15  ;;  %v1187_v21 = vadd.f32 %v1186_v35, %v954_v18  ;;  %v956_v22 = vpop.f32.mrb[31].mxu1 }
 0x151   :  { %1697 = vst.msk [vmem:[%s2963_s4 + $0x34] sm:$0xf] %vm1683_vm1, %v1951_v19  ;;  %v1402_v25 = vadd.f32 %v2663_v16, %v1346_v20  ;;  %v1347_v26 = vmul.f32 %v2658_v13, %v1187_v21  ;;  %v1215_v41 = vpop.f32.mrb[44].mxu0 }
 0x152   :  { %v1217_v42 = vpop.f32.mrb[45].mxu0 }
 0x153   :  { %v1451_v29 = vmax.f32 %v1402_v25, 0.0  ;;  %v1403_v30 = vadd.f32 %v2663_v16, %v1347_v26  ;;  %v1218_v45 = vpop.f32.mrb[46].mxu0 }
 0x154   :  { %v959_v31 = vpop.f32.mrb[32].mxu1  ;;  %v1220_v46 = vpop.f32.mrb[47].mxu0 }
 0x155   :  { %v1952_v32 = vpack.c.bf16 %v1451_v29, %v1451_v29  ;;  %v1452_v33 = vmax.f32 %v1403_v30, 0.0  ;;  %v1192_v34 = vadd.f32 %v1191_v49, %v959_v31  ;;  %v961_v35 = vpop.f32.mrb[33].mxu1 }
 0x156   :  { %v962_v36 = vpop.f32.mrb[34].mxu1 }
 0x157   :  { %1698 = vst.msk [vmem:[%s2963_s4 + $0x38] sm:$0xf] %vm1683_vm1, %v1952_v32  ;;  %v1953_v37 = vpack.c.bf16 %v1452_v33, %v1452_v33  ;;  %v1348_v38 = vmul.f32 %v2658_v13, %v1192_v34  ;;  %v1195_v39 = vadd.f32 %v1194_v53, %v962_v36  ;;  %v964_v40 = vpop.f32.mrb[35].mxu1 }
 0x159   :  { %1699 = vst.msk [vmem:[%s2963_s4 + $0x3c] sm:$0xf] %vm1683_vm1, %v1953_v37  ;;  %v1404_v43 = vadd.f32 %v2663_v16, %v1348_v38  ;;  %v1349_v44 = vmul.f32 %v2658_v13, %v1195_v39  ;;  %v1223_v59 = vpop.f32.mrb[48].mxu0 }
 0x15a   :  { %v1225_v60 = vpop.f32.mrb[49].mxu0 }
 0x15b   :  { %v1453_v47 = vmax.f32 %v1404_v43, 0.0  ;;  %v1405_v48 = vadd.f32 %v2663_v16, %v1349_v44  ;;  %v1226_v63 = vpop.f32.mrb[50].mxu0 }
 0x15c   :  { %v967_v49 = vpop.f32.mrb[36].mxu1  ;;  %v1228_v0 = vpop.f32.mrb[51].mxu0 }
 0x15d   :  { %v1954_v50 = vpack.c.bf16 %v1453_v47, %v1453_v47  ;;  %v1454_v51 = vmax.f32 %v1405_v48, 0.0  ;;  %v1200_v52 = vadd.f32 %v1199_v3, %v967_v49  ;;  %v969_v53 = vpop.f32.mrb[37].mxu1 }
 0x15e   :  { %v970_v54 = vpop.f32.mrb[38].mxu1 }
 0x15f   :  { %1700 = vst.msk [vmem:[%s2963_s4 + $0x40] sm:$0xf] %vm1683_vm1, %v1954_v50  ;;  %v1955_v55 = vpack.c.bf16 %v1454_v51, %v1454_v51  ;;  %v1350_v56 = vmul.f32 %v2658_v13, %v1200_v52  ;;  %v1203_v57 = vadd.f32 %v1202_v7, %v970_v54  ;;  %v972_v58 = vpop.f32.mrb[39].mxu1 }
 0x161   :  { %1701 = vst.msk [vmem:[%s2963_s4 + $0x44] sm:$0xf] %vm1683_vm1, %v1955_v55  ;;  %v1406_v61 = vadd.f32 %v2663_v16, %v1350_v56  ;;  %v1351_v62 = vmul.f32 %v2658_v13, %v1203_v57  ;;  %v1231_v14 = vpop.f32.mrb[52].mxu0 }
 0x162   :  { %v1233_v15 = vpop.f32.mrb[53].mxu0 }
 0x163   :  { %v1455_v1 = vmax.f32 %v1406_v61, 0.0  ;;  %v1407_v2 = vadd.f32 %v2663_v16, %v1351_v62  ;;  %v1234_v19 = vpop.f32.mrb[54].mxu0 }
 0x164   :  { %v975_v3 = vpop.f32.mrb[40].mxu1  ;;  %v1236_v20 = vpop.f32.mrb[55].mxu0 }
 0x165   :  { %v1956_v4 = vpack.c.bf16 %v1455_v1, %v1455_v1  ;;  %v1456_v5 = vmax.f32 %v1407_v2, 0.0  ;;  %v1208_v6 = vadd.f32 %v1207_v23, %v975_v3  ;;  %v977_v7 = vpop.f32.mrb[41].mxu1 }
 0x166   :  { %v978_v8 = vpop.f32.mrb[42].mxu1 }
 0x167   :  { %1702 = vst.msk [vmem:[%s2963_s4 + $0x48] sm:$0xf] %vm1683_vm1, %v1956_v4  ;;  %v1957_v9 = vpack.c.bf16 %v1456_v5, %v1456_v5  ;;  %v1352_v10 = vmul.f32 %v2658_v13, %v1208_v6  ;;  %v1211_v11 = vadd.f32 %v1210_v27, %v978_v8  ;;  %v980_v12 = vpop.f32.mrb[43].mxu1 }
 0x169   :  { %1703 = vst.msk [vmem:[%s2963_s4 + $0x4c] sm:$0xf] %vm1683_vm1, %v1957_v9  ;;  %v1408_v17 = vadd.f32 %v2663_v16, %v1352_v10  ;;  %v1353_v18 = vmul.f32 %v2658_v13, %v1211_v11  ;;  %v1239_v33 = vpop.f32.mrb[56].mxu0 }
 0x16a   :  { %v1241_v34 = vpop.f32.mrb[57].mxu0 }
 0x16b   :  { %v1457_v21 = vmax.f32 %v1408_v17, 0.0  ;;  %v1409_v22 = vadd.f32 %v2663_v16, %v1353_v18  ;;  %v1242_v37 = vpop.f32.mrb[58].mxu0 }
 0x16c   :  { %v983_v23 = vpop.f32.mrb[44].mxu1  ;;  %v1244_v38 = vpop.f32.mrb[59].mxu0 }
 0x16d   :  { %v1958_v24 = vpack.c.bf16 %v1457_v21, %v1457_v21  ;;  %v1458_v25 = vmax.f32 %v1409_v22, 0.0  ;;  %v1216_v26 = vadd.f32 %v1215_v41, %v983_v23  ;;  %v985_v27 = vpop.f32.mrb[45].mxu1 }
 0x16e   :  { %v986_v28 = vpop.f32.mrb[46].mxu1 }
 0x16f   :  { %1704 = vst.msk [vmem:[%s2963_s4 + $0x50] sm:$0xf] %vm1683_vm1, %v1958_v24  ;;  %v1959_v29 = vpack.c.bf16 %v1458_v25, %v1458_v25  ;;  %v1354_v30 = vmul.f32 %v2658_v13, %v1216_v26  ;;  %v1219_v31 = vadd.f32 %v1218_v45, %v986_v28  ;;  %v988_v32 = vpop.f32.mrb[47].mxu1 }
 0x171   :  { %1705 = vst.msk [vmem:[%s2963_s4 + $0x54] sm:$0xf] %vm1683_vm1, %v1959_v29  ;;  %v1410_v35 = vadd.f32 %v2663_v16, %v1354_v30  ;;  %v1355_v36 = vmul.f32 %v2658_v13, %v1219_v31  ;;  %v1247_v51 = vpop.f32.mrb[60].mxu0 }
 0x172   :  { %v1249_v52 = vpop.f32.mrb[61].mxu0 }
 0x173   :  { %v1459_v39 = vmax.f32 %v1410_v35, 0.0  ;;  %v1411_v40 = vadd.f32 %v2663_v16, %v1355_v36  ;;  %v1250_v55 = vpop.f32.mrb[62].mxu0 }
 0x174   :  { %v991_v41 = vpop.f32.mrb[48].mxu1  ;;  %v1252_v56 = vpop.f32.mrb[63].mxu0 }
 0x175   :  { %v1960_v42 = vpack.c.bf16 %v1459_v39, %v1459_v39  ;;  %v1460_v43 = vmax.f32 %v1411_v40, 0.0  ;;  %v1224_v44 = vadd.f32 %v1223_v59, %v991_v41  ;;  %v993_v45 = vpop.f32.mrb[49].mxu1 }
 0x176   :  { %v994_v46 = vpop.f32.mrb[50].mxu1 }
 0x177   :  { %1706 = vst.msk [vmem:[%s2963_s4 + $0x58] sm:$0xf] %vm1683_vm1, %v1960_v42  ;;  %v1961_v47 = vpack.c.bf16 %v1460_v43, %v1460_v43  ;;  %v1356_v48 = vmul.f32 %v2658_v13, %v1224_v44  ;;  %v1227_v49 = vadd.f32 %v1226_v63, %v994_v46  ;;  %v996_v50 = vpop.f32.mrb[51].mxu1 }
 0x179   :  { %1707 = vst.msk [vmem:[%s2963_s4 + $0x5c] sm:$0xf] %vm1683_vm1, %v1961_v47  ;;  %v1412_v53 = vadd.f32 %v2663_v16, %v1356_v48  ;;  %v1357_v54 = vmul.f32 %v2658_v13, %v1227_v49  ;;  %v1255_v5 = vpop.f32.mrb[64].mxu0 }
 0x17a   :  { %v1257_v6 = vpop.f32.mrb[65].mxu0 }
 0x17b   :  { %v1461_v57 = vmax.f32 %v1412_v53, 0.0  ;;  %v1413_v58 = vadd.f32 %v2663_v16, %v1357_v54  ;;  %v1258_v9 = vpop.f32.mrb[66].mxu0 }
 0x17c   :  { %v999_v59 = vpop.f32.mrb[52].mxu1  ;;  %v1260_v10 = vpop.f32.mrb[67].mxu0 }
 0x17d   :  { %v1962_v60 = vpack.c.bf16 %v1461_v57, %v1461_v57  ;;  %v1462_v61 = vmax.f32 %v1413_v58, 0.0  ;;  %v1232_v62 = vadd.f32 %v1231_v14, %v999_v59  ;;  %v1001_v63 = vpop.f32.mrb[53].mxu1 }
 0x17e   :  { %v1002_v0 = vpop.f32.mrb[54].mxu1 }
 0x17f   :  { %1708 = vst.msk [vmem:[%s2963_s4 + $0x60] sm:$0xf] %vm1683_vm1, %v1962_v60  ;;  %v1963_v1 = vpack.c.bf16 %v1462_v61, %v1462_v61  ;;  %v1358_v2 = vmul.f32 %v2658_v13, %v1232_v62  ;;  %v1235_v3 = vadd.f32 %v1234_v19, %v1002_v0  ;;  %v1004_v4 = vpop.f32.mrb[55].mxu1 }
 0x181   :  { %1709 = vst.msk [vmem:[%s2963_s4 + $0x64] sm:$0xf] %vm1683_vm1, %v1963_v1  ;;  %v1414_v7 = vadd.f32 %v2663_v16, %v1358_v2  ;;  %v1359_v8 = vmul.f32 %v2658_v13, %v1235_v3  ;;  %v1263_v25 = vpop.f32.mrb[68].mxu0 }
 0x182   :  { %v1265_v26 = vpop.f32.mrb[69].mxu0 }
 0x183   :  { %v1463_v11 = vmax.f32 %v1414_v7, 0.0  ;;  %v1415_v12 = vadd.f32 %v2663_v16, %v1359_v8  ;;  %v1266_v29 = vpop.f32.mrb[70].mxu0 }
 0x184   :  { %v1007_v14 = vpop.f32.mrb[56].mxu1  ;;  %v1268_v30 = vpop.f32.mrb[71].mxu0 }
 0x185   :  { %v1964_v15 = vpack.c.bf16 %v1463_v11, %v1463_v11  ;;  %v1464_v17 = vmax.f32 %v1415_v12, 0.0  ;;  %v1240_v18 = vadd.f32 %v1239_v33, %v1007_v14  ;;  %v1009_v19 = vpop.f32.mrb[57].mxu1 }
 0x186   :  { %v1010_v20 = vpop.f32.mrb[58].mxu1 }
 0x187   :  { %1710 = vst.msk [vmem:[%s2963_s4 + $0x68] sm:$0xf] %vm1683_vm1, %v1964_v15  ;;  %v1965_v21 = vpack.c.bf16 %v1464_v17, %v1464_v17  ;;  %v1360_v22 = vmul.f32 %v2658_v13, %v1240_v18  ;;  %v1243_v23 = vadd.f32 %v1242_v37, %v1010_v20  ;;  %v1012_v24 = vpop.f32.mrb[59].mxu1 }
 0x189   :  { %1711 = vst.msk [vmem:[%s2963_s4 + $0x6c] sm:$0xf] %vm1683_vm1, %v1965_v21  ;;  %v1416_v27 = vadd.f32 %v2663_v16, %v1360_v22  ;;  %v1361_v28 = vmul.f32 %v2658_v13, %v1243_v23  ;;  %v1271_v43 = vpop.f32.mrb[72].mxu0 }
 0x18a   :  { %v1273_v44 = vpop.f32.mrb[73].mxu0 }
 0x18b   :  { %v1465_v31 = vmax.f32 %v1416_v27, 0.0  ;;  %v1417_v32 = vadd.f32 %v2663_v16, %v1361_v28  ;;  %v1274_v47 = vpop.f32.mrb[74].mxu0 }
 0x18c   :  { %v1015_v33 = vpop.f32.mrb[60].mxu1  ;;  %v1276_v48 = vpop.f32.mrb[75].mxu0 }
 0x18d   :  { %v1966_v34 = vpack.c.bf16 %v1465_v31, %v1465_v31  ;;  %v1466_v35 = vmax.f32 %v1417_v32, 0.0  ;;  %v1248_v36 = vadd.f32 %v1247_v51, %v1015_v33  ;;  %v1017_v37 = vpop.f32.mrb[61].mxu1 }
 0x18e   :  { %v1018_v38 = vpop.f32.mrb[62].mxu1 }
 0x18f   :  { %1712 = vst.msk [vmem:[%s2963_s4 + $0x70] sm:$0xf] %vm1683_vm1, %v1966_v34  ;;  %v1967_v39 = vpack.c.bf16 %v1466_v35, %v1466_v35  ;;  %v1362_v40 = vmul.f32 %v2658_v13, %v1248_v36  ;;  %v1251_v41 = vadd.f32 %v1250_v55, %v1018_v38  ;;  %v1020_v42 = vpop.f32.mrb[63].mxu1 }
 0x191   :  { %1713 = vst.msk [vmem:[%s2963_s4 + $0x74] sm:$0xf] %vm1683_vm1, %v1967_v39  ;;  %v1418_v45 = vadd.f32 %v2663_v16, %v1362_v40  ;;  %v1363_v46 = vmul.f32 %v2658_v13, %v1251_v41  ;;  %v1279_v61 = vpop.f32.mrb[76].mxu0 }
 0x192   :  { %v1281_v62 = vpop.f32.mrb[77].mxu0 }
 0x193   :  { %v1467_v49 = vmax.f32 %v1418_v45, 0.0  ;;  %v1419_v50 = vadd.f32 %v2663_v16, %v1363_v46  ;;  %v1282_v1 = vpop.f32.mrb[78].mxu0 }
 0x194   :  { %v1023_v51 = vpop.f32.mrb[64].mxu1  ;;  %v1284_v2 = vpop.f32.mrb[79].mxu0 }
 0x195   :  { %v1968_v52 = vpack.c.bf16 %v1467_v49, %v1467_v49  ;;  %v1468_v53 = vmax.f32 %v1419_v50, 0.0  ;;  %v1256_v54 = vadd.f32 %v1255_v5, %v1023_v51  ;;  %v1025_v55 = vpop.f32.mrb[65].mxu1 }
 0x196   :  { %v1026_v56 = vpop.f32.mrb[66].mxu1 }
 0x197   :  { %1714 = vst.msk [vmem:[%s2963_s4 + $0x78] sm:$0xf] %vm1683_vm1, %v1968_v52  ;;  %v1969_v57 = vpack.c.bf16 %v1468_v53, %v1468_v53  ;;  %v1364_v58 = vmul.f32 %v2658_v13, %v1256_v54  ;;  %v1259_v59 = vadd.f32 %v1258_v9, %v1026_v56  ;;  %v1028_v60 = vpop.f32.mrb[67].mxu1 }
 0x199   :  { %1715 = vst.msk [vmem:[%s2963_s4 + $0x7c] sm:$0xf] %vm1683_vm1, %v1969_v57  ;;  %v1420_v63 = vadd.f32 %v2663_v16, %v1364_v58  ;;  %v1365_v0 = vmul.f32 %v2658_v13, %v1259_v59  ;;  %v1287_v17 = vpop.f32.mrb[80].mxu0 }
 0x19a   :  { %v1289_v18 = vpop.f32.mrb[81].mxu0 }
 0x19b   :  { %v1469_v3 = vmax.f32 %v1420_v63, 0.0  ;;  %v1421_v4 = vadd.f32 %v2663_v16, %v1365_v0  ;;  %v1290_v21 = vpop.f32.mrb[82].mxu0 }
 0x19c   :  { %v1031_v5 = vpop.f32.mrb[68].mxu1  ;;  %v1292_v22 = vpop.f32.mrb[83].mxu0 }
 0x19d   :  { %v1970_v6 = vpack.c.bf16 %v1469_v3, %v1469_v3  ;;  %v1470_v7 = vmax.f32 %v1421_v4, 0.0  ;;  %v1264_v8 = vadd.f32 %v1263_v25, %v1031_v5  ;;  %v1033_v9 = vpop.f32.mrb[69].mxu1 }
 0x19e   :  { %v1034_v10 = vpop.f32.mrb[70].mxu1 }
 0x19f   :  { %1716 = vst.msk [vmem:[%s2963_s4 + $0x80] sm:$0xf] %vm1683_vm1, %v1970_v6  ;;  %v1971_v11 = vpack.c.bf16 %v1470_v7, %v1470_v7  ;;  %v1366_v12 = vmul.f32 %v2658_v13, %v1264_v8  ;;  %v1267_v14 = vadd.f32 %v1266_v29, %v1034_v10  ;;  %v1036_v15 = vpop.f32.mrb[71].mxu1 }
 0x1a1   :  { %1717 = vst.msk [vmem:[%s2963_s4 + $0x84] sm:$0xf] %vm1683_vm1, %v1971_v11  ;;  %v1422_v19 = vadd.f32 %v2663_v16, %v1366_v12  ;;  %v1367_v20 = vmul.f32 %v2658_v13, %v1267_v14  ;;  %v1295_v35 = vpop.f32.mrb[84].mxu0 }
 0x1a2   :  { %v1297_v36 = vpop.f32.mrb[85].mxu0 }
 0x1a3   :  { %v1471_v23 = vmax.f32 %v1422_v19, 0.0  ;;  %v1423_v24 = vadd.f32 %v2663_v16, %v1367_v20  ;;  %v1298_v39 = vpop.f32.mrb[86].mxu0 }
 0x1a4   :  { %v1039_v25 = vpop.f32.mrb[72].mxu1  ;;  %v1300_v40 = vpop.f32.mrb[87].mxu0 }
 0x1a5   :  { %v1972_v26 = vpack.c.bf16 %v1471_v23, %v1471_v23  ;;  %v1472_v27 = vmax.f32 %v1423_v24, 0.0  ;;  %v1272_v28 = vadd.f32 %v1271_v43, %v1039_v25  ;;  %v1041_v29 = vpop.f32.mrb[73].mxu1 }
 0x1a6   :  { %v1042_v30 = vpop.f32.mrb[74].mxu1 }
 0x1a7   :  { %1718 = vst.msk [vmem:[%s2963_s4 + $0x88] sm:$0xf] %vm1683_vm1, %v1972_v26  ;;  %v1973_v31 = vpack.c.bf16 %v1472_v27, %v1472_v27  ;;  %v1368_v32 = vmul.f32 %v2658_v13, %v1272_v28  ;;  %v1275_v33 = vadd.f32 %v1274_v47, %v1042_v30  ;;  %v1044_v34 = vpop.f32.mrb[75].mxu1 }
 0x1a9   :  { %1719 = vst.msk [vmem:[%s2963_s4 + $0x8c] sm:$0xf] %vm1683_vm1, %v1973_v31  ;;  %v1424_v37 = vadd.f32 %v2663_v16, %v1368_v32  ;;  %v1369_v38 = vmul.f32 %v2658_v13, %v1275_v33  ;;  %v1303_v53 = vpop.f32.mrb[88].mxu0 }
 0x1aa   :  { %v1305_v54 = vpop.f32.mrb[89].mxu0 }
 0x1ab   :  { %v1473_v41 = vmax.f32 %v1424_v37, 0.0  ;;  %v1425_v42 = vadd.f32 %v2663_v16, %v1369_v38  ;;  %v1306_v57 = vpop.f32.mrb[90].mxu0 }
 0x1ac   :  { %v1047_v43 = vpop.f32.mrb[76].mxu1  ;;  %v1308_v58 = vpop.f32.mrb[91].mxu0 }
 0x1ad   :  { %v1974_v44 = vpack.c.bf16 %v1473_v41, %v1473_v41  ;;  %v1474_v45 = vmax.f32 %v1425_v42, 0.0  ;;  %v1280_v46 = vadd.f32 %v1279_v61, %v1047_v43  ;;  %v1049_v47 = vpop.f32.mrb[77].mxu1 }
 0x1ae   :  { %v1050_v48 = vpop.f32.mrb[78].mxu1 }
 0x1af   :  { %1720 = vst.msk [vmem:[%s2963_s4 + $0x90] sm:$0xf] %vm1683_vm1, %v1974_v44  ;;  %v1975_v49 = vpack.c.bf16 %v1474_v45, %v1474_v45  ;;  %v1370_v50 = vmul.f32 %v2658_v13, %v1280_v46  ;;  %v1283_v51 = vadd.f32 %v1282_v1, %v1050_v48  ;;  %v1052_v52 = vpop.f32.mrb[79].mxu1 }
 0x1b1   :  { %1721 = vst.msk [vmem:[%s2963_s4 + $0x94] sm:$0xf] %vm1683_vm1, %v1975_v49  ;;  %v1426_v55 = vadd.f32 %v2663_v16, %v1370_v50  ;;  %v1371_v56 = vmul.f32 %v2658_v13, %v1283_v51  ;;  %v1311_v7 = vpop.f32.mrb[92].mxu0 }
 0x1b2   :  { %v1313_v8 = vpop.f32.mrb[93].mxu0 }
 0x1b3   :  { %v1475_v59 = vmax.f32 %v1426_v55, 0.0  ;;  %v1427_v60 = vadd.f32 %v2663_v16, %v1371_v56  ;;  %v1314_v11 = vpop.f32.mrb[94].mxu0 }
 0x1b4   :  { %v1055_v61 = vpop.f32.mrb[80].mxu1  ;;  %v1316_v12 = vpop.f32.mrb[95].mxu0 }
 0x1b5   :  { %v1976_v62 = vpack.c.bf16 %v1475_v59, %v1475_v59  ;;  %v1476_v63 = vmax.f32 %v1427_v60, 0.0  ;;  %v1288_v0 = vadd.f32 %v1287_v17, %v1055_v61  ;;  %v1057_v1 = vpop.f32.mrb[81].mxu1 }
 0x1b6   :  { %v1058_v2 = vpop.f32.mrb[82].mxu1 }
 0x1b7   :  { %1722 = vst.msk [vmem:[%s2963_s4 + $0x98] sm:$0xf] %vm1683_vm1, %v1976_v62  ;;  %v1977_v3 = vpack.c.bf16 %v1476_v63, %v1476_v63  ;;  %v1372_v4 = vmul.f32 %v2658_v13, %v1288_v0  ;;  %v1291_v5 = vadd.f32 %v1290_v21, %v1058_v2  ;;  %v1060_v6 = vpop.f32.mrb[83].mxu1 }
 0x1b9   :  { %1723 = vst.msk [vmem:[%s2963_s4 + $0x9c] sm:$0xf] %vm1683_vm1, %v1977_v3  ;;  %v1428_v9 = vadd.f32 %v2663_v16, %v1372_v4  ;;  %v1373_v10 = vmul.f32 %v2658_v13, %v1291_v5  ;;  %v1319_v27 = vpop.f32.mrb[96].mxu0 }
 0x1ba   :  { %v1321_v28 = vpop.f32.mrb[97].mxu0 }
 0x1bb   :  { %v1477_v14 = vmax.f32 %v1428_v9, 0.0  ;;  %v1429_v15 = vadd.f32 %v2663_v16, %v1373_v10  ;;  %v1322_v31 = vpop.f32.mrb[98].mxu0 }
 0x1bc   :  { %v1063_v17 = vpop.f32.mrb[84].mxu1  ;;  %v1323_v32 = vpop.f32.mrb[99].mxu0 }
 0x1bd   :  { %v1978_v18 = vpack.c.bf16 %v1477_v14, %v1477_v14  ;;  %v1478_v19 = vmax.f32 %v1429_v15, 0.0  ;;  %v1296_v20 = vadd.f32 %v1295_v35, %v1063_v17  ;;  %v1065_v21 = vpop.f32.mrb[85].mxu1 }
 0x1be   :  { %v1066_v22 = vpop.f32.mrb[86].mxu1 }
 0x1bf   :  { %1724 = vst.msk [vmem:[%s2963_s4 + $0xa0] sm:$0xf] %vm1683_vm1, %v1978_v18  ;;  %v1979_v23 = vpack.c.bf16 %v1478_v19, %v1478_v19  ;;  %v1374_v24 = vmul.f32 %v2658_v13, %v1296_v20  ;;  %v1299_v25 = vadd.f32 %v1298_v39, %v1066_v22  ;;  %v1068_v26 = vpop.f32.mrb[87].mxu1 }
 0x1c1   :  { %1725 = vst.msk [vmem:[%s2963_s4 + $0xa4] sm:$0xf] %vm1683_vm1, %v1979_v23  ;;  %v1430_v29 = vadd.f32 %v2663_v16, %v1374_v24  ;;  %v1375_v30 = vmul.f32 %v2658_v13, %v1299_v25 }
 0x1c3   :  { %v1479_v33 = vmax.f32 %v1430_v29, 0.0  ;;  %v1431_v34 = vadd.f32 %v2663_v16, %v1375_v30 }
 0x1c4   :  { %v1071_v35 = vpop.f32.mrb[88].mxu1 }
 0x1c5   :  { %v1980_v36 = vpack.c.bf16 %v1479_v33, %v1479_v33  ;;  %v1480_v37 = vmax.f32 %v1431_v34, 0.0  ;;  %v1304_v38 = vadd.f32 %v1303_v53, %v1071_v35  ;;  %v1073_v39 = vpop.f32.mrb[89].mxu1 }
 0x1c6   :  { %v1074_v40 = vpop.f32.mrb[90].mxu1 }
 0x1c7   :  { %1726 = vst.msk [vmem:[%s2963_s4 + $0xa8] sm:$0xf] %vm1683_vm1, %v1980_v36  ;;  %v1981_v41 = vpack.c.bf16 %v1480_v37, %v1480_v37  ;;  %v1376_v42 = vmul.f32 %v2658_v13, %v1304_v38  ;;  %v1307_v43 = vadd.f32 %v1306_v57, %v1074_v40  ;;  %v1076_v44 = vpop.f32.mrb[91].mxu1 }
 0x1c9   :  { %1727 = vst.msk [vmem:[%s2963_s4 + $0xac] sm:$0xf] %vm1683_vm1, %v1981_v41  ;;  %v1432_v45 = vadd.f32 %v2663_v16, %v1376_v42  ;;  %v1377_v46 = vmul.f32 %v2658_v13, %v1307_v43 }
 0x1cb   :  { %v1481_v47 = vmax.f32 %v1432_v45, 0.0  ;;  %v1433_v48 = vadd.f32 %v2663_v16, %v1377_v46 }
 0x1cc   :  { %v1079_v49 = vpop.f32.mrb[92].mxu1 }
 0x1cd   :  { %v1982_v50 = vpack.c.bf16 %v1481_v47, %v1481_v47  ;;  %v1482_v51 = vmax.f32 %v1433_v48, 0.0  ;;  %v1312_v52 = vadd.f32 %v1311_v7, %v1079_v49  ;;  %v1081_v53 = vpop.f32.mrb[93].mxu1 }
 0x1ce   :  { %v1082_v54 = vpop.f32.mrb[94].mxu1 }
 0x1cf   :  { %1728 = vst.msk [vmem:[%s2963_s4 + $0xb0] sm:$0xf] %vm1683_vm1, %v1982_v50  ;;  %v1983_v55 = vpack.c.bf16 %v1482_v51, %v1482_v51  ;;  %v1378_v56 = vmul.f32 %v2658_v13, %v1312_v52  ;;  %v1315_v57 = vadd.f32 %v1314_v11, %v1082_v54  ;;  %v1084_v58 = vpop.f32.mrb[95].mxu1 }
 0x1d1   :  { %1729 = vst.msk [vmem:[%s2963_s4 + $0xb4] sm:$0xf] %vm1683_vm1, %v1983_v55  ;;  %v1434_v59 = vadd.f32 %v2663_v16, %v1378_v56  ;;  %v1379_v60 = vmul.f32 %v2658_v13, %v1315_v57 }
 0x1d3   :  { %v1483_v61 = vmax.f32 %v1434_v59, 0.0  ;;  %v1435_v62 = vadd.f32 %v2663_v16, %v1379_v60 }
 0x1d4   :  { %v1087_v63 = vpop.f32.mrb[96].mxu1 }
 0x1d5   :  { %v1984_v0 = vpack.c.bf16 %v1483_v61, %v1483_v61  ;;  %v1484_v1 = vmax.f32 %v1435_v62, 0.0  ;;  %v1320_v2 = vadd.f32 %v1319_v27, %v1087_v63  ;;  %v1089_v3 = vpop.f32.mrb[97].mxu1 }
 0x1d6   :  { %v1090_v4 = vpop.f32.mrb[98].mxu1 }
 0x1d7   :  { %1730 = vst.msk [vmem:[%s2963_s4 + $0xb8] sm:$0xf] %vm1683_vm1, %v1984_v0  ;;  %v1985_v5 = vpack.c.bf16 %v1484_v1, %v1484_v1  ;;  %v1380_v6 = vmul.f32 %v2658_v13, %v1320_v2  ;;  %v1091_v7 = vpop.f32.mrb[99].mxu1 }
 0x1d9   :  { %1731 = vst.msk [vmem:[%s2963_s4 + $0xbc] sm:$0xf] %vm1683_vm1, %v1985_v5  ;;  %v1436_v8 = vadd.f32 %v2663_v16, %v1380_v6 }
 0x1db   :  { %v1485_v9 = vmax.f32 %v1436_v8, 0.0 }
 0x1dd   :  { %v1986_v10 = vpack.c.bf16 %v1485_v9, %v1485_v9 }
 0x1df   :  { %1732 = vst.msk [vmem:[%s2963_s4 + $0xc0] sm:$0xf] %vm1683_vm1, %v1986_v10 }

// kernel: cnn_forward.11
= control target key start
LH: loop header
LB: loop body
LE: loop exit
PB: predicated region body
PF: predicated region fallthrough
CT: control target
= control target key end

     0   :  { %s73_s10 = smov 64   ;;  %vm40_vm0 = vcmask 1043456   ;;  %vm42_vm1 = vcmask 523264   ;;  %vm60_vm2 = vcmask 523268   ;;  %vm64_vm3 = vcmask 1042432   ;;  %s130_s0 = inlined_call_operand.vmem [shape: bf16[14,896], index: 0, kind: input, shape index: {}]   ;;  %s131_s1 = inlined_call_operand.vmem [shape: bf16[14,448], index: 1, kind: output, shape index: {}]  }
   0x1   :  { %v11_v0 = vld [vmem:[%s130_s0 + $0x18] sm:$0xf]  ;;  %v9_v1 = vld [vmem:[%s130_s0 + $0x8] sm:$0xff]  ;;  %v10_v3 = vld [vmem:[%s130_s0 + $0x10] sm:$0xff]  ;;  %vm65_vm5 = vcmask 522244  }
   0x2   :  { %26 = vrot.lane.b32.xlu1 %v11_v0, %s73_s10  ;;  %22 = vrot.lane.b32.xlu0 %v9_v1, %s73_s10  ;;  %v13_v2 = vld [vmem:[%s130_s0 + $0x24] sm:$0x77]  ;;  %v15_v4 = vld [vmem:[%s130_s0 + $0x34] sm:$0x7]  ;;  %vm61_vm4 = vmor %vm60_vm2, %vm40_vm0 }
   0x3   :  { %v14_v5 = vld [vmem:[%s130_s0 + $0x2c] sm:$0x77]  ;;  %v8_v13 = vld [vmem:[%s130_s0] sm:$0xff]  ;;  %vm66_vm6 = vmor %vm65_vm5, %vm64_vm3 }
   0x4   :  { %v12_v25 = vld [vmem:[%s130_s0 + $0x1c] sm:$0x77] }
   0x6   :  { %28 = vrot.lane.b32.xlu1 %v13_v2, %s73_s10  ;;  %24 = vrot.lane.b32.xlu0 %v10_v3, %s73_s10 }
   0xa   :  { %32 = vrot.lane.b32.xlu1 %v15_v4, %s73_s10  ;;  %30 = vrot.lane.b32.xlu0 %v14_v5, %s73_s10 }
  0x74   :  { %v27_v6 = vpop.permute.xlu1 %26  ;;  %v23_v7 = vpop.permute.xlu0 %22 }
  0x75   :  { %v36_v10 = vrot.slane %v27_v6, 4  ;;  %v34_v11 = vrot.slane %v23_v7, 4 }
  0x78   :  { %v29_v8 = vpop.permute.xlu1 %28  ;;  %v25_v9 = vpop.permute.xlu0 %24 }
  0x79   :  { %v35_v12 = vrot.slane %v25_v9, 4  ;;  %v37_v16 = vrot.slane %v29_v8, 4 }
  0x7b   :  { %v41_v14 = vsel %vm40_vm0, %v34_v11, %v35_v12  ;;  %v44_v15 = vsel %vm40_vm0, %v35_v12, %v36_v10 }
  0x7c   :  { %v43_v17 = vsel %vm42_vm1, %v41_v14, %v25_v9  ;;  %v45_v18 = vsel %vm42_vm1, %v44_v15, %v27_v6  ;;  %v33_v19 = vpop.permute.xlu1 %32  ;;  %v31_v20 = vpop.permute.xlu0 %30 }
  0x7d   :  { %v54_v21 = vmax.bf16 %v43_v17, %v8_v13  ;;  %v55_v22 = vmax.bf16 %v45_v18, %v9_v1  ;;  %v39_v23 = vrot.slane %v33_v19, 4  ;;  %v38_v24 = vrot.slane %v31_v20, 4 }
  0x7f   :  { %58 = vst [vmem:[%s131_s1] sm:$0xff] %v54_v21  ;;  %62 = vst.msk [vmem:[%s131_s1 + $0x8] sm:$0xff] %vm61_vm4, %v55_v22  ;;  %v46_v26 = vsel %vm40_vm0, %v37_v16, %v38_v24  ;;  %v48_v27 = vsel %vm40_vm0, %v38_v24, %v39_v23 }
  0x80   :  { %v47_v28 = vsel %vm42_vm1, %v46_v26, %v31_v20  ;;  %v49_v29 = vsel %vm42_vm1, %v48_v27, %v33_v19 }
  0x81   :  { %v56_v30 = vmax.bf16 %v47_v28, %v12_v25  ;;  %v57_v31 = vmax.bf16 %v49_v29, %v13_v2 }
  0x83   :  { %63 = vst [vmem:[%s131_s1 + $0x10] sm:$0x77] %v56_v30  ;;  %67 = vst.msk [vmem:[%s131_s1 + $0x18] sm:$0x77] %vm66_vm6, %v57_v31 }

// kernel: cnn_forward.12
= control target key start
LH: loop header
LB: loop body
LE: loop exit
PB: predicated region body
PF: predicated region fallthrough
CT: control target
= control target key end

     0   :  { %s106_s10 = smov 96   ;;  %vm86_vm0 = vcmask 257024   ;;  %vm99_vm1 = vcmask 253952   ;;  %s207_s0 = inlined_call_operand.vmem [shape: bf16[98,64], index: 0, kind: input, shape index: {}]   ;;  %s208_s1 = inlined_call_operand.vmem [shape: bf16[98,32], index: 1, kind: output, shape index: {}]  }
   0x1   :  { %v8_v0 = vld [vmem:[%s207_s0] sm:$0xf]  ;;  %v10_v1 = vld [vmem:[%s207_s0 + $0x8] sm:$0xf]  ;;  %v9_v2 = vld [vmem:[%s207_s0 + $0x4] sm:$0xf] }
   0x2   :  { %34 = vrot.lane.b32.xlu0 %v8_v0, %s106_s10  ;;  %38 = vrot.lane.b32.xlu1 %v10_v1, %s106_s10  ;;  %v11_v3 = vld [vmem:[%s207_s0 + $0xc] sm:$0xf]  ;;  %v12_v4 = vld [vmem:[%s207_s0 + $0x10] sm:$0xf] }
   0x3   :  { %v13_v5 = vld [vmem:[%s207_s0 + $0x14] sm:$0xf]  ;;  %v14_v6 = vld [vmem:[%s207_s0 + $0x18] sm:$0xf]  ;;  %v15_v7 = vld [vmem:[%s207_s0 + $0x1c] sm:$0xf] }
   0x4   :  { %v16_v8 = vld [vmem:[%s207_s0 + $0x20] sm:$0xf]  ;;  %v17_v9 = vld [vmem:[%s207_s0 + $0x24] sm:$0xf]  ;;  %v18_v10 = vld [vmem:[%s207_s0 + $0x28] sm:$0xf] }
   0x5   :  { %v19_v11 = vld [vmem:[%s207_s0 + $0x2c] sm:$0xf]  ;;  %v20_v12 = vld [vmem:[%s207_s0 + $0x30] sm:$0x1] }
   0x6   :  { %36 = vrot.lane.b32.xlu0 %v9_v2, %s106_s10  ;;  %40 = vrot.lane.b32.xlu1 %v11_v3, %s106_s10 }
   0xa   :  { %42 = vrot.lane.b32.xlu0 %v12_v4, %s106_s10  ;;  %44 = vrot.lane.b32.xlu1 %v13_v5, %s106_s10 }
   0xe   :  { %46 = vrot.lane.b32.xlu0 %v14_v6, %s106_s10  ;;  %48 = vrot.lane.b32.xlu1 %v15_v7, %s106_s10 }
  0x12   :  { %50 = vrot.lane.b32.xlu0 %v16_v8, %s106_s10  ;;  %52 = vrot.lane.b32.xlu1 %v17_v9, %s106_s10 }
  0x16   :  { %54 = vrot.lane.b32.xlu0 %v18_v10, %s106_s10  ;;  %56 = vrot.lane.b32.xlu1 %v19_v11, %s106_s10 }
  0x1a   :  { %58 = vrot.lane.b32.xlu0 %v20_v12, %s106_s10 }
  0x74   :  { %v35_v13 = vpop.permute.xlu0 %34  ;;  %v39_v14 = vpop.permute.xlu1 %38 }
  0x75   :  { %v73_v15 = vmax.bf16 %v35_v13, %v8_v0  ;;  %v75_v16 = vmax.bf16 %v39_v14, %v10_v1 }
  0x77   :  { %87 = vst.msk [vmem:[%s208_s1] sm:$0xf] %vm86_vm0, %v73_v15  ;;  %89 = vst.msk [vmem:[%s208_s1 + $0x8] sm:$0xf] %vm86_vm0, %v75_v16 }
  0x78   :  { %v37_v17 = vpop.permute.xlu0 %36  ;;  %v41_v18 = vpop.permute.xlu1 %40 }
  0x79   :  { %v74_v19 = vmax.bf16 %v37_v17, %v9_v2  ;;  %v76_v20 = vmax.bf16 %v41_v18, %v11_v3 }
  0x7b   :  { %88 = vst.msk [vmem:[%s208_s1 + $0x4] sm:$0xf] %vm86_vm0, %v74_v19  ;;  %90 = vst.msk [vmem:[%s208_s1 + $0xc] sm:$0xf] %vm86_vm0, %v76_v20 }
  0x7c   :  { %v43_v21 = vpop.permute.xlu0 %42  ;;  %v45_v22 = vpop.permute.xlu1 %44 }
  0x7d   :  { %v77_v23 = vmax.bf16 %v43_v21, %v12_v4  ;;  %v78_v24 = vmax.bf16 %v45_v22, %v13_v5 }
  0x7f   :  { %91 = vst.msk [vmem:[%s208_s1 + $0x10] sm:$0xf] %vm86_vm0, %v77_v23  ;;  %92 = vst.msk [vmem:[%s208_s1 + $0x14] sm:$0xf] %vm86_vm0, %v78_v24 }
  0x80   :  { %v47_v25 = vpop.permute.xlu0 %46  ;;  %v49_v26 = vpop.permute.xlu1 %48 }
  0x81   :  { %v79_v27 = vmax.bf16 %v47_v25, %v14_v6  ;;  %v80_v28 = vmax.bf16 %v49_v26, %v15_v7 }
  0x83   :  { %93 = vst.msk [vmem:[%s208_s1 + $0x18] sm:$0xf] %vm86_vm0, %v79_v27  ;;  %94 = vst.msk [vmem:[%s208_s1 + $0x1c] sm:$0xf] %vm86_vm0, %v80_v28 }
  0x84   :  { %v51_v29 = vpop.permute.xlu0 %50  ;;  %v53_v30 = vpop.permute.xlu1 %52 }
  0x85   :  { %v81_v31 = vmax.bf16 %v51_v29, %v16_v8  ;;  %v82_v32 = vmax.bf16 %v53_v30, %v17_v9 }
  0x87   :  { %95 = vst.msk [vmem:[%s208_s1 + $0x20] sm:$0xf] %vm86_vm0, %v81_v31  ;;  %96 = vst.msk [vmem:[%s208_s1 + $0x24] sm:$0xf] %vm86_vm0, %v82_v32 }
  0x88   :  { %v55_v33 = vpop.permute.xlu0 %54  ;;  %v57_v34 = vpop.permute.xlu1 %56 }
  0x89   :  { %v83_v35 = vmax.bf16 %v55_v33, %v18_v10  ;;  %v84_v36 = vmax.bf16 %v57_v34, %v19_v11 }
  0x8b   :  { %97 = vst.msk [vmem:[%s208_s1 + $0x28] sm:$0xf] %vm86_vm0, %v83_v35  ;;  %98 = vst.msk [vmem:[%s208_s1 + $0x2c] sm:$0xf] %vm86_vm0, %v84_v36 }
  0x8c   :  { %v59_v37 = vpop.permute.xlu0 %58 }
  0x8d   :  { %v85_v38 = vmax.bf16 %v59_v37, %v20_v12 }
  0x8f   :  { %100 = vst.msk [vmem:[%s208_s1 + $0x30] sm:$0x1] %vm99_vm1, %v85_v38 }

// kernel: cnn_forward.13
= control target key start
LH: loop header
LB: loop body
LE: loop exit
PB: predicated region body
PF: predicated region fallthrough
CT: control target
= control target key end

     0   :  { %v227_v29 = vlaneseq  ;;  %v1582_v35 = vmov 1966171168   ;;  %s1939_s0 = inlined_call_operand.vmem [shape: bf16[2,1568], index: 0, kind: input, shape index: {}]   ;;  %s1940_s1 = inlined_call_operand.vmem [shape: bf16[1568,10], index: 1, kind: input, shape index: {}]   ;;  %s1941_s2 = inlined_call_operand.vmem [shape: f32[1,10], index: 2, kind: input, shape index: {}]   ;;  %s1942_s3 = inlined_call_operand.hbm [shape: f32[2,10], index: 3, kind: output, shape index: {}]  }
   0x1   :  { %v1458_v0 = vld [vmem:[%s1940_s1 + $0x40] sm:$0xff]   ;;  %v1462_v4 = vld [vmem:[%s1940_s1 + $0x48] sm:$0xff]   ;;  %v1466_v8 = vld [vmem:[%s1940_s1 + $0x50] sm:$0xff]   ;;  %v225_v36 = vunpack.c.l.s4 %v1582_v35 }
   0x2   :  { %v1459_v1 = vld [vmem:[%s1940_s1] sm:$0xff]   ;;  %1311 = vmatprep.subr.bf16.mxu0 %v1458_v0  ;;  %v1463_v5 = vld [vmem:[%s1940_s1 + $0x8] sm:$0xff]   ;;  %v1467_v9 = vld [vmem:[%s1940_s1 + $0x10] sm:$0xff]   ;;  %v228_v33 = vshrl.u32 %v227_v29, 7 }
   0x3   :  { %v1460_v2 = vld [vmem:[%s1940_s1 + $0xc0] sm:$0xff]   ;;  %1312 = vmatpush3.bf16.msra.mxu0 %v1459_v1  ;;  %v1464_v6 = vld [vmem:[%s1940_s1 + $0xc8] sm:$0xff]   ;;  %v1468_v10 = vld [vmem:[%s1940_s1 + $0xd0] sm:$0xff]   ;;  %v226_v39 = vunpack.c.0.s8 %v225_v36 }
   0x4   :  { %v1461_v3 = vld [vmem:[%s1940_s1 + $0x80] sm:$0xff]   ;;  %1333 = vmatprep.subr.bf16.mxu1 %v1460_v2  ;;  %1313 = vmatprep.subr.bf16.mxu0 %v1462_v4  ;;  %v1465_v7 = vld [vmem:[%s1940_s1 + $0x88] sm:$0xff]   ;;  %v1469_v11 = vld [vmem:[%s1940_s1 + $0x90] sm:$0xff]  }
   0x5   :  { %1334 = vmatpush3.bf16.msra.mxu1 %v1461_v3  ;;  %v1470_v12 = vld [vmem:[%s1940_s1 + $0x58] sm:$0xff]   ;;  %v1474_v16 = vld [vmem:[%s1940_s1 + $0x60] sm:$0xff]   ;;  %v1478_v20 = vld [vmem:[%s1940_s1 + $0x68] sm:$0xff]   ;;  %v1711_v41 = vsub.s32 %v226_v39, %v228_v33 }
   0x6   :  { %1335 = vmatprep.subr.bf16.mxu1 %v1464_v6  ;;  %v1471_v13 = vld [vmem:[%s1940_s1 + $0x18] sm:$0xff]   ;;  %v1475_v17 = vld [vmem:[%s1940_s1 + $0x20] sm:$0xff]   ;;  %v1479_v21 = vld [vmem:[%s1940_s1 + $0x28] sm:$0xff]  }
   0x7   :  { %1314 = vmatpush3.bf16.msra.mxu0 %v1463_v5  ;;  %v1472_v14 = vld [vmem:[%s1940_s1 + $0xd8] sm:$0xff]   ;;  %v1476_v18 = vld [vmem:[%s1940_s1 + $0xe0] sm:$0xff]   ;;  %v1480_v22 = vld [vmem:[%s1940_s1 + $0xe8] sm:$0xff]  }
   0x8   :  { %1315 = vmatprep.subr.bf16.mxu0 %v1466_v8  ;;  %v1473_v15 = vld [vmem:[%s1940_s1 + $0x98] sm:$0xff]   ;;  %v1477_v19 = vld [vmem:[%s1940_s1 + $0xa0] sm:$0xff]   ;;  %v1481_v23 = vld [vmem:[%s1940_s1 + $0xa8] sm:$0xff]  }
   0x9   :  { %1336 = vmatpush3.bf16.msra.mxu1 %v1465_v7  ;;  %v1482_v24 = vld [vmem:[%s1940_s1 + $0x70] sm:$0xff]   ;;  %v1486_v28 = vld [vmem:[%s1940_s1 + $0x78] sm:$0xff]   ;;  %v1491_v34 = vld [vmem:[%s1940_s1 + $0x140] sm:$0xff]  }
   0xa   :  { %1337 = vmatprep.subr.bf16.mxu1 %v1468_v10  ;;  %v1483_v25 = vld [vmem:[%s1940_s1 + $0x30] sm:$0xff]   ;;  %v1487_v30 = vld [vmem:[%s1940_s1 + $0x38] sm:$0xff]   ;;  %v16_v37 = vld [vmem:[%s1939_s0] sm:$0xff] }
   0xb   :  { %1316 = vmatpush3.bf16.msra.mxu0 %v1467_v9  ;;  %v1484_v26 = vld [vmem:[%s1940_s1 + $0xf0] sm:$0xff]   ;;  %v1488_v31 = vld [vmem:[%s1940_s1 + $0xf8] sm:$0xff]   ;;  %v223_v38 = vcombine.high %v16_v37, %v16_v37  ;;  %v1493_v40 = vld [vmem:[%s1940_s1 + $0x1c0] sm:$0xff]   ;;  %v230_v42 = vrot.slane %v16_v37, %v1711_v41 }
   0xc   :  { %1317 = vmatprep.subr.bf16.mxu0 %v1470_v12  ;;  %v1485_v27 = vld [vmem:[%s1940_s1 + $0xb0] sm:$0xff]   ;;  %v1489_v32 = vld [vmem:[%s1940_s1 + $0xb8] sm:$0xff]   ;;  %v1492_v48 = vld [vmem:[%s1940_s1 + $0x100] sm:$0xff]  }
   0xd   :  { %1338 = vmatpush3.bf16.msra.mxu1 %v1469_v11  ;;  %v1715_v43 = vrot.slane %v223_v38, %v1711_v41  ;;  %v238_v44 = vcombine.high %v230_v42, %v230_v42  ;;  %v246_v45 = vrot.slane %v230_v42, %v1711_v41  ;;  %v1495_v51 = vld [vmem:[%s1940_s1 + $0x148] sm:$0xff]   ;;  %v1494_v53 = vld [vmem:[%s1940_s1 + $0x180] sm:$0xff]   ;;  %v1499_v57 = vld [vmem:[%s1940_s1 + $0x150] sm:$0xff]  }
   0xe   :  { %1339 = vmatprep.subr.bf16.mxu1 %v1472_v14  ;;  %v1497_v54 = vld [vmem:[%s1940_s1 + $0x1c8] sm:$0xff]   ;;  %v1501_v59 = vld [vmem:[%s1940_s1 + $0x1d0] sm:$0xff]   ;;  %v1503_v61 = vld [vmem:[%s1940_s1 + $0x158] sm:$0xff]  }
   0xf   :  { %1318 = vmatpush3.bf16.msra.mxu0 %v1471_v13  ;;  %v239_v46 = vcombine.high %v1715_v43, %v1715_v43  ;;  %v260_v47 = vrot.slane %v238_v44, %v1711_v41  ;;  %v268_v50 = vcombine.high %v246_v45, %v246_v45  ;;  %v1496_v56 = vld [vmem:[%s1940_s1 + $0x108] sm:$0xff]   ;;  %v1500_v60 = vld [vmem:[%s1940_s1 + $0x110] sm:$0xff]   ;;  %v1505_v63 = vld [vmem:[%s1940_s1 + $0x1d8] sm:$0xff]  }
  0x10   :  { %1319 = vmatprep.subr.bf16.mxu0 %v1474_v16  ;;  %v1498_v58 = vld [vmem:[%s1940_s1 + $0x188] sm:$0xff]   ;;  %v1502_v62 = vld [vmem:[%s1940_s1 + $0x190] sm:$0xff]   ;;  %v1504_v0 = vld [vmem:[%s1940_s1 + $0x118] sm:$0xff]  }
  0x11   :  { %1340 = vmatpush3.bf16.msra.mxu1 %v1473_v15  ;;  %v267_v49 = vrot.slane %v239_v46, %v1711_v41  ;;  %947 = vmatprep.mubr.bf16.mxu0 %v260_v47  ;;  %v270_v52 = vcombine.high %v260_v47, %v260_v47  ;;  %v1507_v1 = vld [vmem:[%s1940_s1 + $0x160] sm:$0xff]   ;;  %v1506_v2 = vld [vmem:[%s1940_s1 + $0x198] sm:$0xff]   ;;  %v1511_v5 = vld [vmem:[%s1940_s1 + $0x168] sm:$0xff]  }
  0x12   :  { %1341 = vmatprep.subr.bf16.mxu1 %v1476_v18  ;;  %v1509_v3 = vld [vmem:[%s1940_s1 + $0x1e0] sm:$0xff]   ;;  %v1513_v7 = vld [vmem:[%s1940_s1 + $0x1e8] sm:$0xff]   ;;  %v1515_v9 = vld [vmem:[%s1940_s1 + $0x170] sm:$0xff]  }
  0x13   :  { %1320 = vmatpush3.bf16.msra.mxu0 %v1475_v17  ;;  %v271_v55 = vcombine.high %v267_v49, %v267_v49  ;;  %987 = vmatprep.mubr.bf16.mxu1 %v270_v52  ;;  %v1508_v4 = vld [vmem:[%s1940_s1 + $0x120] sm:$0xff]   ;;  %v1512_v8 = vld [vmem:[%s1940_s1 + $0x128] sm:$0xff]   ;;  %v1517_v11 = vld [vmem:[%s1940_s1 + $0x1f0] sm:$0xff]   ;;  %v253_v17 = vrot.slane %v1715_v43, %v1711_v41 }
  0x14   :  { %1321 = vmatprep.subr.bf16.mxu0 %v1478_v20  ;;  %v1510_v6 = vld [vmem:[%s1940_s1 + $0x1a0] sm:$0xff]   ;;  %v1514_v10 = vld [vmem:[%s1940_s1 + $0x1a8] sm:$0xff]   ;;  %v1516_v12 = vld [vmem:[%s1940_s1 + $0x130] sm:$0xff]  }
  0x15   :  { %1342 = vmatpush3.bf16.msra.mxu1 %v1477_v19  ;;  %v1519_v13 = vld [vmem:[%s1940_s1 + $0x178] sm:$0xff]   ;;  %v1518_v14 = vld [vmem:[%s1940_s1 + $0x1b0] sm:$0xff]   ;;  %v1523_v18 = vld [vmem:[%s1940_s1 + $0x240] sm:$0xff]  }
  0x16   :  { %1343 = vmatprep.subr.bf16.mxu1 %v1480_v22  ;;  %v1521_v15 = vld [vmem:[%s1940_s1 + $0x1f8] sm:$0xff]   ;;  %v1525_v20 = vld [vmem:[%s1940_s1 + $0x2c0] sm:$0xff]   ;;  %v269_v22 = vcombine.high %v253_v17, %v253_v17  ;;  %v1533_v29 = vld [vmem:[%s1940_s1 + $0x2d0] sm:$0xff]  }
  0x17   :  { %1322 = vmatpush3.bf16.msra.mxu0 %v1479_v21  ;;  %v1520_v16 = vld [vmem:[%s1940_s1 + $0x138] sm:$0xff]   ;;  %v1524_v21 = vld [vmem:[%s1940_s1 + $0x200] sm:$0xff]   ;;  %v1543_v39 = vld [vmem:[%s1940_s1 + $0x268] sm:$0xff]  }
  0x18   :  { %1323 = vmatprep.subr.bf16.mxu0 %v1482_v24  ;;  %v1522_v19 = vld [vmem:[%s1940_s1 + $0x1b8] sm:$0xff]   ;;  %v1526_v24 = vld [vmem:[%s1940_s1 + $0x280] sm:$0xff]   ;;  %v1545_v42 = vld [vmem:[%s1940_s1 + $0x2e8] sm:$0xff]  }
  0x19   :  { %1344 = vmatpush3.bf16.msra.mxu1 %v1481_v23  ;;  %v1527_v23 = vld [vmem:[%s1940_s1 + $0x248] sm:$0xff]   ;;  %v1537_v33 = vld [vmem:[%s1940_s1 + $0x2d8] sm:$0xff]   ;;  %v1539_v35 = vld [vmem:[%s1940_s1 + $0x260] sm:$0xff]  }
  0x1a   :  { %1345 = vmatprep.subr.bf16.mxu1 %v1484_v26  ;;  %v1528_v26 = vld [vmem:[%s1940_s1 + $0x208] sm:$0xff]   ;;  %v1538_v36 = vld [vmem:[%s1940_s1 + $0x298] sm:$0xff]   ;;  %v1541_v37 = vld [vmem:[%s1940_s1 + $0x2e0] sm:$0xff]  }
  0x1b   :  { %1324 = vmatpush3.bf16.msra.mxu0 %v1483_v25  ;;  %v1529_v25 = vld [vmem:[%s1940_s1 + $0x2c8] sm:$0xff]   ;;  %v1540_v38 = vld [vmem:[%s1940_s1 + $0x220] sm:$0xff]   ;;  %v1547_v44 = vld [vmem:[%s1940_s1 + $0x270] sm:$0xff]  }
  0x1c   :  { %1325 = vmatprep.subr.bf16.mxu0 %v1486_v28  ;;  %v1530_v28 = vld [vmem:[%s1940_s1 + $0x288] sm:$0xff]  }
  0x1d   :  { %1346 = vmatpush3.bf16.msra.mxu1 %v1485_v27  ;;  %v1531_v27 = vld [vmem:[%s1940_s1 + $0x250] sm:$0xff]   ;;  %v1544_v43 = vld [vmem:[%s1940_s1 + $0x228] sm:$0xff]  }
  0x1e   :  { %1347 = vmatprep.subr.bf16.mxu1 %v1488_v31  ;;  %v1535_v31 = vld [vmem:[%s1940_s1 + $0x258] sm:$0xff]   ;;  %v1546_v46 = vld [vmem:[%s1940_s1 + $0x2a8] sm:$0xff]  }
  0x1f   :  { %1326 = vmatpush3.bf16.msra.mxu0 %v1487_v30  ;;  %v1532_v30 = vld [vmem:[%s1940_s1 + $0x210] sm:$0xff]  }
  0x20   :  { %1355 = vmatprep.subr.bf16.mxu0 %v1491_v34  ;;  %v1536_v34 = vld [vmem:[%s1940_s1 + $0x218] sm:$0xff]  }
  0x21   :  { %1348 = vmatpush3.bf16.msra.mxu1 %v1489_v32  ;;  %v1534_v32 = vld [vmem:[%s1940_s1 + $0x290] sm:$0xff]  }
  0x22   :  { %1377 = vmatprep.subr.bf16.mxu1 %v1493_v40  ;;  %948 = vmatmul.mubr.bf16.vlgmr.msra.gmra.mrb[0].mxu0 %v246_v45  ;;  %v1542_v40 = vld [vmem:[%s1940_s1 + $0x2a0] sm:$0xff]   ;;  %v17_v45 = vld [vmem:[%s1939_s0 + $0x8] sm:$0x1f] }
  0x23   :  { %1356 = vmatpush3.bf16.msra.mxu0 %v1492_v48  ;;  %1027 = vmatprep.mubr.bf16.mxu0 %v267_v49  ;;  %v279_v47 = vrot.slane %v17_v45, %v1711_v41  ;;  %v1549_v48 = vld [vmem:[%s1940_s1 + $0x2f0] sm:$0xff]  }
  0x24   :  { %988 = vmatmul.mubr.bf16.vlgmr.msra.gmra.mrb[0].mxu1 %v268_v50  ;;  %1357 = vmatprep.subr.bf16.mxu0 %v1495_v51 }
  0x25   :  { %1378 = vmatpush3.bf16.msra.mxu1 %v1494_v53  ;;  %1067 = vmatprep.mubr.bf16.mxu1 %v271_v55 }
  0x26   :  { %1379 = vmatprep.subr.bf16.mxu1 %v1497_v54 }
  0x27   :  { %1358 = vmatpush3.bf16.msra.mxu0 %v1496_v56 }
  0x28   :  { %1359 = vmatprep.subr.bf16.mxu0 %v1499_v57 }
  0x29   :  { %1380 = vmatpush3.bf16.msra.mxu1 %v1498_v58 }
  0x2a   :  { %1381 = vmatprep.subr.bf16.mxu1 %v1501_v59 }
  0x2b   :  { %1360 = vmatpush3.bf16.msra.mxu0 %v1500_v60 }
  0x2c   :  { %1361 = vmatprep.subr.bf16.mxu0 %v1503_v61 }
  0x2d   :  { %1382 = vmatpush3.bf16.msra.mxu1 %v1502_v62 }
  0x2e   :  { %1383 = vmatprep.subr.bf16.mxu1 %v1505_v63 }
  0x2f   :  { %1362 = vmatpush3.bf16.msra.mxu0 %v1504_v0 }
  0x30   :  { %1363 = vmatprep.subr.bf16.mxu0 %v1507_v1 }
  0x31   :  { %1384 = vmatpush3.bf16.msra.mxu1 %v1506_v2 }
  0x32   :  { %1385 = vmatprep.subr.bf16.mxu1 %v1509_v3 }
  0x33   :  { %1364 = vmatpush3.bf16.msra.mxu0 %v1508_v4 }
  0x34   :  { %1365 = vmatprep.subr.bf16.mxu0 %v1511_v5 }
  0x35   :  { %1386 = vmatpush3.bf16.msra.mxu1 %v1510_v6 }
  0x36   :  { %1387 = vmatprep.subr.bf16.mxu1 %v1513_v7 }
  0x37   :  { %1366 = vmatpush3.bf16.msra.mxu0 %v1512_v8 }
  0x38   :  { %1367 = vmatprep.subr.bf16.mxu0 %v1515_v9 }
  0x39   :  { %1388 = vmatpush3.bf16.msra.mxu1 %v1514_v10 }
  0x3a   :  { %1389 = vmatprep.subr.bf16.mxu1 %v1517_v11 }
  0x3b   :  { %1368 = vmatpush3.bf16.msra.mxu0 %v1516_v12 }
  0x3c   :  { %1369 = vmatprep.subr.bf16.mxu0 %v1519_v13 }
  0x3d   :  { %1390 = vmatpush3.bf16.msra.mxu1 %v1518_v14 }
  0x3e   :  { %1391 = vmatprep.subr.bf16.mxu1 %v1521_v15 }
  0x3f   :  { %1370 = vmatpush3.bf16.msra.mxu0 %v1520_v16 }
  0x40   :  { %1399 = vmatprep.subr.bf16.mxu0 %v1523_v18 }
  0x41   :  { %1392 = vmatpush3.bf16.msra.mxu1 %v1522_v19 }
  0x42   :  { %1028 = vmatmul.mubr.bf16.vlgmr.msra.gmra.mrb[4].mxu0 %v253_v17  ;;  %1421 = vmatprep.subr.bf16.mxu1 %v1525_v20 }
  0x43   :  { %1400 = vmatpush3.bf16.msra.mxu0 %v1524_v21 }
  0x44   :  { %1068 = vmatmul.mubr.bf16.vlgmr.msra.gmra.mrb[4].mxu1 %v269_v22  ;;  %1401 = vmatprep.subr.bf16.mxu0 %v1527_v23 }
  0x45   :  { %1422 = vmatpush3.bf16.msra.mxu1 %v1526_v24 }
  0x46   :  { %1423 = vmatprep.subr.bf16.mxu1 %v1529_v25 }
  0x47   :  { %1402 = vmatpush3.bf16.msra.mxu0 %v1528_v26 }
  0x48   :  { %1403 = vmatprep.subr.bf16.mxu0 %v1531_v27 }
  0x49   :  { %1424 = vmatpush3.bf16.msra.mxu1 %v1530_v28 }
  0x4a   :  { %1425 = vmatprep.subr.bf16.mxu1 %v1533_v29 }
  0x4b   :  { %1404 = vmatpush3.bf16.msra.mxu0 %v1532_v30 }
  0x4c   :  { %1405 = vmatprep.subr.bf16.mxu0 %v1535_v31 }
  0x4d   :  { %1426 = vmatpush3.bf16.msra.mxu1 %v1534_v32 }
  0x4e   :  { %1427 = vmatprep.subr.bf16.mxu1 %v1537_v33 }
  0x4f   :  { %1406 = vmatpush3.bf16.msra.mxu0 %v1536_v34 }
  0x50   :  { %1407 = vmatprep.subr.bf16.mxu0 %v1539_v35 }
  0x51   :  { %1428 = vmatpush3.bf16.msra.mxu1 %v1538_v36 }
  0x52   :  { %1429 = vmatprep.subr.bf16.mxu1 %v1541_v37 }
  0x53   :  { %1408 = vmatpush3.bf16.msra.mxu0 %v1540_v38 }
  0x54   :  { %1409 = vmatprep.subr.bf16.mxu0 %v1543_v39 }
  0x55   :  { %1430 = vmatpush3.bf16.msra.mxu1 %v1542_v40 }
  0x56   :  { %1431 = vmatprep.subr.bf16.mxu1 %v1545_v42 }
  0x57   :  { %8 = vsyncpa [#allocation3], 0  ;;  %1410 = vmatpush3.bf16.msra.mxu0 %v1544_v43  ;;  %v1548_v49 = vld [vmem:[%s1940_s1 + $0x230] sm:$0xff]   ;;  %v287_v50 = vcombine.high %v279_v47, %v279_v47  ;;  %v1551_v51 = vld [vmem:[%s1940_s1 + $0x278] sm:$0xff]   ;;  %v294_v57 = vrot.slane %v279_v47, %v1711_v41  ;;  %v272_v59 = vcombine.high %v17_v45, %v17_v45  ;;  %v1583_v61 = vmov 0.0  }
  0x58   :  { %1411 = vmatprep.subr.bf16.mxu0 %v1547_v44  ;;  %v1550_v52 = vld [vmem:[%s1940_s1 + $0x2b0] sm:$0xff]   ;;  %v1553_v54 = vld [vmem:[%s1940_s1 + $0x2f8] sm:$0xff]   ;;  %v1556_v60 = vld [vmem:[%s1940_s1 + $0x300] sm:$0xff]   ;;  %vm1584_vm0 = vmmov 0   ;;  %vm911_vm1 = vcmask 261120   ;;  %vm1195_vm2 = vcmask 74752  }
  0x59   :  { %1432 = vmatpush3.bf16.msra.mxu1 %v1546_v46  ;;  %v308_v53 = vrot.slane %v287_v50, %v1711_v41  ;;  %v1552_v55 = vld [vmem:[%s1940_s1 + $0x238] sm:$0xff]   ;;  %v309_v62 = vcombine.high %v294_v57, %v294_v57  ;;  %v286_v63 = vrot.slane %v272_v59, %v1711_v41  ;;  %v1557_v0 = vld [vmem:[%s1940_s1 + $0x308] sm:$0xff]   ;;  %v1211_v3 = vld [vmem:[%s1941_s2] ss:$0 sm:$0xff] }
  0x5a   :  { %1433 = vmatprep.subr.bf16.mxu1 %v1549_v48  ;;  %v1554_v58 = vld [vmem:[%s1940_s1 + $0x2b8] sm:$0xff]   ;;  %s1585_s1 = smov [#allocation2]  }
  0x5b   :  { %1412 = vmatpush3.bf16.msra.mxu0 %v1548_v49  ;;  %1107 = vmatprep.mubr.bf16.mxu0 %v308_v53  ;;  %v310_v56 = vcombine.high %v308_v53, %v308_v53  ;;  %v301_v1 = vrot.slane %v286_v63, %v1711_v41  ;;  %s1203_s2 = sshll.u32 %s1585_s1, 4  ;;  %s1204_s2 = int_to_ptr.vmem [resolvable:$true] %s1203_s2 }
  0x5c   :  { %1413 = vmatprep.subr.bf16.mxu0 %v1551_v51  ;;  %s1558_s24 = scalar_lea.vmem %s1204_s2, 32  ;;  %p1563_p1 = scmp.lt.s32.totalorder %s1204_s2, %s1204_s2 }
  0x5d   :  { %1434 = vmatpush3.bf16.msra.mxu1 %v1550_v52  ;;  %1147 = vmatprep.mubr.bf16.mxu1 %v310_v56  ;;  %p1559_p0 = scmp.ne.s32.totalorder %s1204_s2, %s1558_s24  ;;  %p1564_p2 = scmp.lt.s32.totalorder %s1558_s24, %s1558_s24 }
  0x5e   :  { %1435 = vmatprep.subr.bf16.mxu1 %v1553_v54 }
  0x5f   :  { %1414 = vmatpush3.bf16.msra.mxu0 %v1552_v55  ;;  %p1565_p3 = por %p1564_p2, %p1563_p1 }
  0x60   :  { %1446 = vmatprep.subr.bf16.mxu0 %v1583_v61 }
  0x61   :  { %1436 = vmatpush3.bf16.msra.mxu1 %v1554_v58  ;;  %p1566_p4 = pnand %p1565_p3, %p1559_p0 }
  0x62   :  { %1108 = vmatmul.mubr.bf16.vlgmr.msra.gmra.mrb[8].mxu0 %v294_v57 }
  0x63   :  { %1447 = vmatpush3.bf16.msra.mxu0 %v1556_v60  ;;  %1450 = vmatprep.mubr.msk.bf16.mxu0 %vm1584_vm0, %v1583_v61 }
  0x64   :  { %1148 = vmatmul.mubr.bf16.vlgmr.msra.gmra.mrb[8].mxu1 %v309_v62  ;;  %1448 = vmatprep.subr.bf16.mxu0 %v1583_v61 }
  0x67   :  { %1449 = vmatpush3.bf16.msra.mxu0 %v1557_v0 }
  0x6a   :  { %1451 = vmatmul.mubr.msk.bf16.vlgmr.msra.gmra.mrb[12].mxu0 %vm911_vm1, %v301_v1 }
  0xf5   :  { %v1327_v2 = vpop.f32.mrb[0].mxu0 }
  0xf6   :  { %v1328_v4 = vpop.f32.mrb[1].mxu0 }
  0xf7   :  { %v1329_v5 = vadd.f32 %v1328_v4, %v1327_v2  ;;  %v1330_v6 = vpop.f32.mrb[2].mxu0  ;;  %v1349_v7 = vpop.f32.mrb[0].mxu1 }
  0xf8   :  { %v1331_v8 = vpop.f32.mrb[3].mxu0  ;;  %v1350_v9 = vpop.f32.mrb[1].mxu1 }
  0xf9   :  { %v950_v10 = vadd.f32 %v1329_v5, %v1211_v3  ;;  %v1351_v11 = vadd.f32 %v1350_v9, %v1349_v7  ;;  %v1352_v12 = vpop.f32.mrb[2].mxu1 }
  0xfa   :  { %v1353_v13 = vpop.f32.mrb[3].mxu1 }
  0xfb   :  { %v990_v14 = vadd.f32 %v1351_v11, %v950_v10 }
 0x115   :  { %v1371_v41 = vpop.f32.mrb[4].mxu0 }
 0x116   :  { %v1372_v15 = vpop.f32.mrb[5].mxu0 }
 0x117   :  { %v1373_v16 = vadd.f32 %v1372_v15, %v1371_v41  ;;  %v1374_v17 = vpop.f32.mrb[6].mxu0  ;;  %v1393_v18 = vpop.f32.mrb[4].mxu1 }
 0x118   :  { %v1375_v19 = vpop.f32.mrb[7].mxu0  ;;  %v1394_v20 = vpop.f32.mrb[5].mxu1 }
 0x119   :  { %v1030_v21 = vadd.f32 %v1373_v16, %v990_v14  ;;  %v1395_v22 = vadd.f32 %v1394_v20, %v1393_v18  ;;  %v1396_v23 = vpop.f32.mrb[6].mxu1 }
 0x11a   :  { %v1397_v24 = vpop.f32.mrb[7].mxu1 }
 0x11b   :  { %v1070_v25 = vadd.f32 %v1395_v22, %v1030_v21 }
 0x135   :  { %v1415_v26 = vpop.f32.mrb[8].mxu0 }
 0x136   :  { %v1416_v27 = vpop.f32.mrb[9].mxu0 }
 0x137   :  { %v1417_v28 = vadd.f32 %v1416_v27, %v1415_v26  ;;  %v1437_v29 = vpop.f32.mrb[8].mxu1  ;;  %v1418_v30 = vpop.f32.mrb[10].mxu0 }
 0x138   :  { %v1438_v31 = vpop.f32.mrb[9].mxu1  ;;  %v1419_v32 = vpop.f32.mrb[11].mxu0 }
 0x139   :  { %v1110_v33 = vadd.f32 %v1417_v28, %v1070_v25  ;;  %v1439_v34 = vadd.f32 %v1438_v31, %v1437_v29  ;;  %v1440_v35 = vpop.f32.mrb[10].mxu1 }
 0x13a   :  { %v1441_v36 = vpop.f32.mrb[11].mxu1 }
 0x13b   :  { %v1150_v37 = vadd.f32 %v1439_v34, %v1110_v33 }
 0x13d   :  { %v1189_v38 = vpop.f32.mrb[12].mxu0 }
 0x13e   :  { %v1190_v39 = vadd.f32 %v1189_v38, %v1150_v37  ;;  %v1452_v40 = vpop.f32.mrb[13].mxu0 }
 0x13f   :  { %v1192_v42 = vpop.f32.mrb[14].mxu0 }
 0x140   :  { %v1453_v43 = vpop.f32.mrb[15].mxu0  ;;  %1196 = vst.msk [vmem:[#allocation2] sm:$0x3] %vm1195_vm2, %v1190_v39 }
 0x141   :  { %1569 = shalt.err (!%p1566_p4)
}
 0x142   :  { %s1570_s27 = scalar_lea.hbm %s1942_s3, 32 }
 0x143   :  { %p1571_p5 = scmp.ne.s32.totalorder %s1942_s3, %s1570_s27  ;;  %p1574_p6 = scmp.lt.u32.totalorder %s1570_s27, %s1942_s3 }
 0x145   :  { %p1576_p7 = pnand %p1574_p6, %p1571_p5 }
 0x147   :  { %1579 = shalt.err (!%p1576_p7)
}
 0x148   :  { %1206 = dma.vmem_to_hbm [thread:$0]  %s1204_s2, 32, %s1942_s3, [#allocation3]  }
 0x149   :  { %1580 = dma.done.wait [#allocation3], 32  }
 0x14a   :  { %1581 = vsyncadd [#allocation3], 4294967264 }
 0x14b   :  { %1210 = vsyncpa [#allocation3], 1 }

</bundles_post_ra>
